<compile_context>
chip_gen: v7x
topology: tpu7x:2x2x1
jax: 0.10.0
libtpu: 0.0.40
codegen_flags: <defaults>
</compile_context>

<pallas_src>
import functools

import jax
import jax.numpy as jnp
from jax import lax
from jax.experimental import pallas as pl
from jax.experimental.pallas import tpu as pltpu

BN_EPS = 1e-5
_CPAD = 128                       # conv output channels padded to lane width
_TILE_M = 512                     # rows of the im2col matrix per grid step
_TILE_N = 512                     # fc batch rows per grid step
_Y_STAGE_BUDGET = 12 * 1024 * 1024  # max bytes for the VMEM-staged pre-BN y

_CONV_CFG = [  # (out_ch, kernel, stride)  -- fixed DQN Nature architecture
    (32, 8, 4),
    (64, 4, 2),
    (64, 3, 1),
]


def _round_up(x, m):
    return ((x + m - 1) // m) * m


@functools.lru_cache(maxsize=None)
def _vmem_limit_bytes():
    """Per-generation VMEM budget: ~48 MiB on v7x (64 MiB phys), 64 MiB on v5e/v6e."""
    cap = 128 * 1024 * 1024
    try:
        cap = int(getattr(pltpu.get_tpu_info(), "vmem_capacity_bytes", cap))
    except Exception:
        pass
    return int(min(64 * 1024 * 1024, (cap * 3) // 4))


# ----------------------------- Pallas kernels ------------------------------ #

def _conv_bn_relu_kernel(x_ref, w_ref, bn_ref, o_ref, y_buf, acc_ref,
                         *, m_real, tile_m, cout, stage_y, rows_padded):
    """Fused conv(im2col matmul)+bias -> BN(batch stats) -> ReLU.

    grid = (2, grid_m); pass 0: matmul + stats (y staged in VMEM),
    pass 1: scale/shift + ReLU + bf16 store at real channel width.
    bn_ref rows: 0 = conv bias, 1 = gamma, 2 = beta.
    acc_ref rows: 0 = sum, 1 = sum of squares, 2 = scale, 3 = shift.
    """
    pss = pl.program_id(0)
    m = pl.program_id(1)
    last_m = pl.num_programs(1) - 1

    def _matmul():
        y = jnp.dot(x_ref[...], w_ref[...], preferred_element_type=jnp.float32)
        return y + bn_ref[0:1, :]

    @pl.when(pss == 0)
    def _pass_a():
        @pl.when(m == 0)
        def _():
            acc_ref[...] = jnp.zeros_like(acc_ref)

        y = _matmul()
        if stage_y:
            off = pl.multiple_of(m * tile_m, 8)
            y_buf[pl.ds(off, tile_m), :] = y

        def _accum(yv):
            acc_ref[0:1, :] += jnp.sum(yv, axis=0, keepdims=True)
            acc_ref[1:2, :] += jnp.sum(yv * yv, axis=0, keepdims=True)

        if rows_padded:
            # Only the last tile can contain zero-padded rows -> mask only there.
            @pl.when(m == last_m)
            def _():
                rows = m * tile_m + lax.broadcasted_iota(jnp.int32, y.shape, 0)
                _accum(jnp.where(rows < m_real, y, 0.0))

            @pl.when(m != last_m)
            def _():
                _accum(y)
        else:
            _accum(y)

        @pl.when(m == last_m)
        def _():
            inv_m = 1.0 / float(m_real)
            mean = acc_ref[0:1, :] * inv_m
            var = acc_ref[1:2, :] * inv_m - mean * mean   # biased batch variance
            scale = bn_ref[1:2, :] * lax.rsqrt(var + BN_EPS)
            acc_ref[2:3, :] = scale
            acc_ref[3:4, :] = bn_ref[2:3, :] - mean * scale

    @pl.when(pss == 1)
    def _pass_b():
        if stage_y:
            off = pl.multiple_of(m * tile_m, 8)
            y = y_buf[pl.ds(off, tile_m), :]
        else:
            y = _matmul()          # large-M fallback: recompute instead of stage
        o = jnp.maximum(y * acc_ref[2:3, :] + acc_ref[3:4, :], 0.0)
        o_ref[...] = o[:, :cout].astype(o_ref.dtype)


def _fc_kernel(x_ref, w1_ref, b1_ref, w2_ref, b2_ref, o_ref):
    """Fused Linear -> ReLU -> Linear (bf16 matmuls, f32 accumulation)."""
    h = jnp.dot(x_ref[...], w1_ref[...], preferred_element_type=jnp.float32)
    h = jnp.maximum(h + b1_ref[0:1, :], 0.0).astype(jnp.bfloat16)
    o_ref[...] = (jnp.dot(h, w2_ref[...], preferred_element_type=jnp.float32)
                  + b2_ref[0:1, :])


# ------------------------------ layer wrappers ------------------------------ #

def _im2col(x_nhwc, kh, kw, stride):
    N, H, W, Cin = x_nhwc.shape
    OH = (H - kh) // stride + 1
    OW = (W - kw) // stride + 1
    patches = []
    for i in range(kh):
        for j in range(kw):
            patches.append(
                x_nhwc[:, i:i + stride * OH:stride, j:j + stride * OW:stride, :])
    p = jnp.stack(patches, axis=3)                     # (N, OH, OW, kh*kw, Cin)
    return p.reshape(N * OH * OW, kh * kw * Cin), (N, OH, OW)


def conv_bn_relu(x_nhwc, wm, bn, *, kh, kw, stride, cout):
    # wm: (K, 128) bf16 pre-transposed/padded; bn: (8, 128) f32 (bias/gamma/beta)
    p, (N, OH, OW) = _im2col(x_nhwc, kh, kw, stride)
    M, K = p.shape
    tile_m = min(_TILE_M, _round_up(M, 8))
    m_pad = _round_up(M, tile_m)
    if m_pad != M:
        p = jnp.pad(p, ((0, m_pad - M), (0, 0)))
    grid_m = m_pad // tile_m
    stage_y = (m_pad * _CPAD * 4) <= _Y_STAGE_BUDGET

    kern = functools.partial(
        _conv_bn_relu_kernel, m_real=M, tile_m=tile_m, cout=cout,
        stage_y=stage_y, rows_padded=(m_pad != M))

    if stage_y:
        # pass 1 reads the VMEM-staged y: keep patches at block 0 (no re-fetch)
        x_map = lambda p_, m: ((1 - p_) * m, 0)
        y_rows = m_pad
    else:
        # pass 1 recomputes the matmul: re-fetch patches tile-by-tile
        x_map = lambda p_, m: (m, 0)
        y_rows = 8

    act = pl.pallas_call(
        kern,
        out_shape=jax.ShapeDtypeStruct((m_pad, cout), jnp.bfloat16),
        grid_spec=pltpu.PrefetchScalarGridSpec(
            num_scalar_prefetch=0,
            grid=(2, grid_m),
            in_specs=[
                pl.BlockSpec((tile_m, K), x_map),
                pl.BlockSpec((K, _CPAD), lambda p_, m: (0, 0)),
                pl.BlockSpec((8, _CPAD), lambda p_, m: (0, 0)),
            ],
            # Pass 0 never writes the output; blocks stay resident (index 0)
            # until pass 1 writes them, so each HBM block is stored exactly once.
            out_specs=pl.BlockSpec((tile_m, cout), lambda p_, m: (p_ * m, 0)),
            scratch_shapes=[pltpu.VMEM((y_rows, _CPAD), jnp.float32),
                            pltpu.VMEM((8, _CPAD), jnp.float32)],
        ),
        compiler_params=pltpu.CompilerParams(
            dimension_semantics=("arbitrary", "arbitrary"),
            vmem_limit_bytes=_vmem_limit_bytes()),
        cost_estimate=pl.CostEstimate(
            flops=2 * m_pad * K * _CPAD * (1 if stage_y else 2) + 4 * m_pad * _CPAD,
            transcendentals=_CPAD,
            bytes_accessed=(m_pad * K * 2 + K * _CPAD * 2 + 8 * _CPAD * 4
                            + m_pad * cout * 2)),
    )(p, wm, bn)

    return act[:M].reshape(N, OH, OW, cout)


def fc_forward(x, w1p, b1, w2p, b2):
    # x: (N, F) bf16 (NHWC-flattened); w1p: (F, H) bf16 (columns pre-permuted);
    # w2p: (H, A_pad) bf16; b1/b2: (8, H) / (8, A_pad) f32 (row 0 = bias).
    N, F = x.shape
    H = w1p.shape[1]
    A_pad = w2p.shape[1]
    tile_n = min(_TILE_N, _round_up(N, 8))
    n_pad = _round_up(N, tile_n)
    if n_pad != N:
        x = jnp.pad(x, ((0, n_pad - N), (0, 0)))
    grid_n = n_pad // tile_n

    out = pl.pallas_call(
        _fc_kernel,
        out_shape=jax.ShapeDtypeStruct((n_pad, A_pad), jnp.float32),
        grid_spec=pltpu.PrefetchScalarGridSpec(
            num_scalar_prefetch=0,
            grid=(grid_n,),
            in_specs=[
                pl.BlockSpec((tile_n, F), lambda i: (i, 0)),
                pl.BlockSpec((F, H), lambda i: (0, 0)),
                pl.BlockSpec((8, H), lambda i: (0, 0)),
                pl.BlockSpec((H, A_pad), lambda i: (0, 0)),
                pl.BlockSpec((8, A_pad), lambda i: (0, 0)),
            ],
            out_specs=pl.BlockSpec((tile_n, A_pad), lambda i: (i, 0)),
        ),
        compiler_params=pltpu.CompilerParams(
            dimension_semantics=("parallel",),
            vmem_limit_bytes=_vmem_limit_bytes()),
        cost_estimate=pl.CostEstimate(
            flops=2 * n_pad * F * H + 2 * n_pad * H * A_pad,
            transcendentals=0,
            bytes_accessed=(n_pad * F * 2 + F * H * 2 + H * A_pad * 2
                            + n_pad * A_pad * 4)),
    )(x, w1p, b1, w2p, b2)
    return out[:N]


# ------------------------------- DQN module --------------------------------- #

def _conv_out_chw(input_shape):
    c, h, w = input_shape
    for cout, k, s in _CONV_CFG:
        h = (h - k) // s + 1
        w = (w - k) // s + 1
        c = cout
    return c, h, w


def init_dqn_params(key, input_shape, n_actions):
    """Raw PyTorch-layout parameters (f32)."""
    cin = input_shape[0]
    conv_params = []
    for cout, k, _s in _CONV_CFG:
        key, k1, k2, k3, k4 = jax.random.split(key, 5)
        fan_in = cin * k * k
        w = jax.random.normal(k1, (cout, cin, k, k), jnp.float32) / jnp.sqrt(fan_in)
        b = 0.01 * jax.random.normal(k2, (cout,), jnp.float32)
        gamma = 1.0 + 0.1 * jax.random.normal(k3, (cout,), jnp.float32)
        beta = 0.1 * jax.random.normal(k4, (cout,), jnp.float32)
        conv_params.append((w, b, gamma, beta))
        cin = cout

    c, h, w_ = _conv_out_chw(input_shape)
    f = c * h * w_
    key, k1, k2, k3, k4 = jax.random.split(key, 5)
    w1 = jax.random.normal(k1, (512, f), jnp.float32) / jnp.sqrt(f)
    b1 = 0.01 * jax.random.normal(k2, (512,), jnp.float32)
    w2 = jax.random.normal(k3, (n_actions, 512), jnp.float32) / jnp.sqrt(512.0)
    b2 = 0.01 * jax.random.normal(k4, (n_actions,), jnp.float32)
    return {"conv": conv_params, "fc": (w1, b1, w2, b2)}


def prepare_dqn_params(params, input_shape):
    """One-time weight layout work: transposes, channel padding, bf16 casts,
    bias/gamma/beta merge, and fc1 column permutation (NCHW -> NHWC flatten)."""
    conv_prep = []
    for (w, b, g, bt), (cout, k, _s) in zip(params["conv"], _CONV_CFG):
        cin = w.shape[1]
        wm = jnp.transpose(w, (2, 3, 1, 0)).reshape(k * k * cin, cout)
        wm = jnp.pad(wm, ((0, 0), (0, _CPAD - cout))).astype(jnp.bfloat16)
        bn = jnp.zeros((8, _CPAD), jnp.float32)
        bn = bn.at[0, :cout].set(b).at[1, :cout].set(g).at[2, :cout].set(bt)
        conv_prep.append((wm, bn))

    c, h, w_ = _conv_out_chw(input_shape)
    w1, b1, w2, b2 = params["fc"]
    hidden = w1.shape[0]
    # fc1 columns are in NCHW-flatten order; permute to NHWC-flatten order so
    # the conv activation can be fed without a per-call transpose pass.
    w1p = (w1.reshape(hidden, c, h, w_).transpose(0, 2, 3, 1)
             .reshape(hidden, c * h * w_).T).astype(jnp.bfloat16)      # (F, 512)
    a = w2.shape[0]
    a_pad = _round_up(a, 128)
    w2p = jnp.pad(w2.T, ((0, 0), (0, a_pad - a))).astype(jnp.bfloat16)  # (512, A_pad)
    b1p = jnp.zeros((8, hidden), jnp.float32).at[0].set(b1)
    b2p = jnp.zeros((8, a_pad), jnp.float32).at[0, :a].set(b2)
    return {"conv": conv_prep, "fc": (w1p, b1p, w2p, b2p)}


def dqn_forward(prep, x_nchw, n_actions):
    x = jnp.transpose(x_nchw, (0, 2, 3, 1)).astype(jnp.bfloat16)   # NCHW -> NHWC
    for (wm, bn), (cout, k, s) in zip(prep["conv"], _CONV_CFG):
        x = conv_bn_relu(x, wm, bn, kh=k, kw=k, stride=s, cout=cout)
    # NHWC flatten (fc1 columns were permuted at prepare time to match the
    # PyTorch NCHW view(B, -1) semantics).
    xf = x.reshape(x.shape[0], -1)
    w1p, b1, w2p, b2 = prep["fc"]
    q = fc_forward(xf, w1p, b1, w2p, b2)
    return q[:, :n_actions]


# ------------------------------ pure-JAX reference --------------------------- #
# Mirrors the intended math of the kernels (bf16 matmul inputs, f32
# accumulation, f32 BN) using the raw PyTorch-layout parameters and the
# original NCHW flatten, so it validates the Pallas implementation tightly.

def _ref_forward(params, x_nchw):
    x = jnp.transpose(x_nchw, (0, 2, 3, 1)).astype(jnp.bfloat16)
    for (w, b, g, bt), (cout, k, s) in zip(params["conv"], _CONV_CFG):
        cin = w.shape[1]
        p, (N, OH, OW) = _im2col(x, k, k, s)
        wm = jnp.transpose(w, (2, 3, 1, 0)).reshape(k * k * cin, cout)
        y = jnp.dot(p, wm.astype(jnp.bfloat16),
                    preferred_element_type=jnp.float32) + b[None, :]
        mean = jnp.mean(y, axis=0, keepdims=True)
        var = jnp.mean(y * y, axis=0, keepdims=True) - mean * mean
        scale = g[None, :] * lax.rsqrt(var + BN_EPS)
        shift = bt[None, :] - mean * scale
        x = jnp.maximum(y * scale + shift, 0.0).astype(jnp.bfloat16)
        x = x.reshape(N, OH, OW, cout)
    xf = jnp.transpose(x, (0, 3, 1, 2)).reshape(x.shape[0], -1)   # NCHW flatten
    w1, b1, w2, b2 = params["fc"]
    h = jnp.dot(xf, w1.T.astype(jnp.bfloat16),
                preferred_element_type=jnp.float32) + b1[None, :]
    h = jnp.maximum(h, 0.0).astype(jnp.bfloat16)
    return jnp.dot(h, w2.T.astype(jnp.bfloat16),
                   preferred_element_type=jnp.float32) + b2[None, :]


if __name__ == "__main__":
    # 44x44 is a small input the DQN conv stack accepts that leaves a >1x1
    # conv output (64 x 2 x 2), so the NHWC-flatten weight permutation is
    # actually exercised.
    input_shape = (4, 44, 44)
    n_actions = 6
    batch = 4

    key = jax.random.PRNGKey(0)
    key, pkey, xkey = jax.random.split(key, 3)
    raw_params = init_dqn_params(pkey, input_shape, n_actions)
    prep_params = prepare_dqn_params(raw_params, input_shape)
    x = jax.random.normal(xkey, (batch,) + input_shape, jnp.float32)

    fwd = jax.jit(dqn_forward, static_argnums=2)
    out = jax.block_until_ready(fwd(prep_params, x, n_actions))
    ref = jax.block_until_ready(_ref_forward(raw_params, x))

    assert out.shape == (batch, n_actions), out.shape
    assert bool(jnp.all(jnp.isfinite(out)))
    assert jnp.allclose(out, ref, rtol=1e-2, atol=1e-2), (out, ref)
    print("KERNEL_OK")
</pallas_src>

<mosaic_0001>
module attributes {stable_mosaic.version = 11 : i64} {
  func.func @_conv_bn_relu_kernel(%arg0: i32, %arg1: i32, %arg2: memref<400x256xbf16, #tpu.memory_space<vmem>>, %arg3: memref<256x128xbf16, #tpu.memory_space<vmem>>, %arg4: memref<8x128xf32, #tpu.memory_space<vmem>>, %arg5: memref<400x32xbf16, #tpu.memory_space<vmem>>, %arg6: memref<400x128xf32, #tpu.memory_space<vmem>>, %arg7: memref<8x128xf32, #tpu.memory_space<vmem>>) attributes {dimension_semantics = [#tpu.dimension_semantics<arbitrary>, #tpu.dimension_semantics<arbitrary>], iteration_bounds = array<i64: 2, 1>, scalar_prefetch = 0 : i64, scratch_operands = 2 : i64, tpu.core_type = #tpu.core_type<tc>, window_params = [{transform_indices = @transform_0, window_bounds = array<i64: 400, 256>}, {pipeline_mode = #tpu.pipeline_mode<synchronous>, transform_indices = @transform_1, window_bounds = array<i64: 256, 128>}, {pipeline_mode = #tpu.pipeline_mode<synchronous>, transform_indices = @transform_2, window_bounds = array<i64: 8, 128>}, {transform_indices = @transform_3, window_bounds = array<i64: 400, 32>}]} {
    %c0_i32 = arith.constant 0 : i32
    %0 = arith.cmpi eq, %arg0, %c0_i32 : i32
    %1 = arith.extui %0 : i1 to i32
    %c0_i32_0 = arith.constant 0 : i32
    %2 = arith.cmpi ne, %1, %c0_i32_0 : i32
    scf.if %2 {
      %c0_i32_2 = arith.constant 0 : i32
      %6 = arith.cmpi eq, %arg1, %c0_i32_2 : i32
      %7 = arith.extui %6 : i1 to i32
      %c0_i32_3 = arith.constant 0 : i32
      %8 = arith.cmpi ne, %7, %c0_i32_3 : i32
      scf.if %8 {
        %cst_21 = arith.constant 0.000000e+00 : f32
        %33 = vector.broadcast %cst_21 : f32 to vector<8x128xf32>
        %c0_22 = arith.constant 0 : index
        %c0_23 = arith.constant 0 : index
        %34 = vector.load %arg7[%c0_22, %c0_23] : memref<8x128xf32, #tpu.memory_space<vmem>>, vector<8x128xf32>
        tpu.vector_store %arg7[%c0_22, %c0_23], %33 {strides = array<i32>} : memref<8x128xf32, #tpu.memory_space<vmem>>, vector<8x128xf32>,
      } else {
      }
      %c0 = arith.constant 0 : index
      %c0_4 = arith.constant 0 : index
      %9 = vector.load %arg2[%c0, %c0_4] : memref<400x256xbf16, #tpu.memory_space<vmem>>, vector<400x256xbf16>
      %c0_5 = arith.constant 0 : index
      %c0_6 = arith.constant 0 : index
      %10 = vector.load %arg3[%c0_5, %c0_6] : memref<256x128xbf16, #tpu.memory_space<vmem>>, vector<256x128xbf16>
      %cst = arith.constant dense<0.000000e+00> : vector<400x128xf32>
      %11 = tpu.matmul %9, %10, %cst {dimension_numbers = #tpu.dot_dimension_numbers<[1], [0], [0], [1], [0, 0, 1, 1], [], []>} : vector<400x256xbf16>, vector<256x128xbf16>, vector<400x128xf32> -> vector<400x128xf32>
      %c0_7 = arith.constant 0 : index
      %c0_8 = arith.constant 0 : index
      %12 = vector.load %arg4[%c0_7, %c0_8] : memref<8x128xf32, #tpu.memory_space<vmem>>, vector<1x128xf32>
      %13 = vector.broadcast %12 : vector<1x128xf32> to vector<400x128xf32>
      %14 = arith.addf %11, %13 : vector<400x128xf32>
      %c400_i32 = arith.constant 400 : i32
      %15 = arith.muli %arg1, %c400_i32 : i32
      %16 = tpu.assume_multiple %15, 8 : i32
      %17 = arith.index_cast %16 : i32 to index
      %c0_9 = arith.constant 0 : index
      %18 = vector.load %arg6[%17, %c0_9] : memref<400x128xf32, #tpu.memory_space<vmem>>, vector<400x128xf32>
      tpu.vector_store %arg6[%17, %c0_9], %14 {strides = array<i32>} : memref<400x128xf32, #tpu.memory_space<vmem>>, vector<400x128xf32>,
      %c0_10 = arith.constant 0 : index
      %c0_11 = arith.constant 0 : index
      %19 = vector.load %arg7[%c0_10, %c0_11] : memref<8x128xf32, #tpu.memory_space<vmem>>, vector<1x128xf32>
      %cst_12 = arith.constant dense<0.000000e+00> : vector<128xf32>
      %20 = vector.multi_reduction <add>, %14, %cst_12 [0] : vector<400x128xf32> to vector<128xf32>
      %21 = vector.shape_cast %20 : vector<128xf32> to vector<1x128xf32>
      %22 = arith.addf %19, %21 : vector<1x128xf32>
      %c0_13 = arith.constant 0 : index
      %c0_14 = arith.constant 0 : index
      %23 = vector.load %arg7[%c0_13, %c0_14] : memref<8x128xf32, #tpu.memory_space<vmem>>, vector<1x128xf32>
      tpu.vector_store %arg7[%c0_13, %c0_14], %22 {strides = array<i32>} : memref<8x128xf32, #tpu.memory_space<vmem>>, vector<1x128xf32>,
      %c1 = arith.constant 1 : index
      %c0_15 = arith.constant 0 : index
      %24 = vector.load %arg7[%c1, %c0_15] : memref<8x128xf32, #tpu.memory_space<vmem>>, vector<1x128xf32>
      %25 = arith.mulf %14, %14 : vector<400x128xf32>
      %cst_16 = arith.constant dense<0.000000e+00> : vector<128xf32>
      %26 = vector.multi_reduction <add>, %25, %cst_16 [0] : vector<400x128xf32> to vector<128xf32>
      %27 = vector.shape_cast %26 : vector<128xf32> to vector<1x128xf32>
      %28 = arith.addf %24, %27 : vector<1x128xf32>
      %c1_17 = arith.constant 1 : index
      %c0_18 = arith.constant 0 : index
      %29 = vector.load %arg7[%c1_17, %c0_18] : memref<8x128xf32, #tpu.memory_space<vmem>>, vector<1x128xf32>
      tpu.vector_store %arg7[%c1_17, %c0_18], %28 {strides = array<i32>} : memref<8x128xf32, #tpu.memory_space<vmem>>, vector<1x128xf32>,
      %c0_i32_19 = arith.constant 0 : i32
      %30 = arith.cmpi eq, %arg1, %c0_i32_19 : i32
      %31 = arith.extui %30 : i1 to i32
      %c0_i32_20 = arith.constant 0 : i32
      %32 = arith.cmpi ne, %31, %c0_i32_20 : i32
      scf.if %32 {
        %c0_21 = arith.constant 0 : index
        %c0_22 = arith.constant 0 : index
        %33 = vector.load %arg7[%c0_21, %c0_22] : memref<8x128xf32, #tpu.memory_space<vmem>>, vector<1x128xf32>
        %cst_23 = arith.constant 2.500000e-03 : f32
        %34 = vector.broadcast %cst_23 : f32 to vector<1x128xf32>
        %35 = arith.mulf %33, %34 : vector<1x128xf32>
        %c1_24 = arith.constant 1 : index
        %c0_25 = arith.constant 0 : index
        %36 = vector.load %arg7[%c1_24, %c0_25] : memref<8x128xf32, #tpu.memory_space<vmem>>, vector<1x128xf32>
        %cst_26 = arith.constant 2.500000e-03 : f32
        %37 = vector.broadcast %cst_26 : f32 to vector<1x128xf32>
        %38 = arith.mulf %36, %37 : vector<1x128xf32>
        %39 = arith.mulf %35, %35 : vector<1x128xf32>
        %40 = arith.subf %38, %39 : vector<1x128xf32>
        %c1_27 = arith.constant 1 : index
        %c0_28 = arith.constant 0 : index
        %41 = vector.load %arg4[%c1_27, %c0_28] : memref<8x128xf32, #tpu.memory_space<vmem>>, vector<1x128xf32>
        %cst_29 = arith.constant 9.99999974E-6 : f32
        %42 = vector.broadcast %cst_29 : f32 to vector<1x128xf32>
        %43 = arith.addf %40, %42 : vector<1x128xf32>
        %44 = math.rsqrt %43 : vector<1x128xf32>
        %45 = arith.mulf %41, %44 : vector<1x128xf32>
        %c2 = arith.constant 2 : index
        %c0_30 = arith.constant 0 : index
        %46 = vector.load %arg7[%c2, %c0_30] : memref<8x128xf32, #tpu.memory_space<vmem>>, vector<1x128xf32>
        tpu.vector_store %arg7[%c2, %c0_30], %45 {strides = array<i32>} : memref<8x128xf32, #tpu.memory_space<vmem>>, vector<1x128xf32>,
        %c2_31 = arith.constant 2 : index
        %c0_32 = arith.constant 0 : index
        %47 = vector.load %arg4[%c2_31, %c0_32] : memref<8x128xf32, #tpu.memory_space<vmem>>, vector<1x128xf32>
        %48 = arith.mulf %35, %45 : vector<1x128xf32>
        %49 = arith.subf %47, %48 : vector<1x128xf32>
        %c3 = arith.constant 3 : index
        %c0_33 = arith.constant 0 : index
        %50 = vector.load %arg7[%c3, %c0_33] : memref<8x128xf32, #tpu.memory_space<vmem>>, vector<1x128xf32>
        tpu.vector_store %arg7[%c3, %c0_33], %49 {strides = array<i32>} : memref<8x128xf32, #tpu.memory_space<vmem>>, vector<1x128xf32>,
      } else {
      }
    } else {
    }
    %c1_i32 = arith.constant 1 : i32
    %3 = arith.cmpi eq, %arg0, %c1_i32 : i32
    %4 = arith.extui %3 : i1 to i32
    %c0_i32_1 = arith.constant 0 : i32
    %5 = arith.cmpi ne, %4, %c0_i32_1 : i32
    scf.if %5 {
      %c400_i32 = arith.constant 400 : i32
      %6 = arith.muli %arg1, %c400_i32 : i32
      %7 = tpu.assume_multiple %6, 8 : i32
      %8 = arith.index_cast %7 : i32 to index
      %c0 = arith.constant 0 : index
      %9 = vector.load %arg6[%8, %c0] : memref<400x128xf32, #tpu.memory_space<vmem>>, vector<400x128xf32>
      %c2 = arith.constant 2 : index
      %c0_2 = arith.constant 0 : index
      %10 = vector.load %arg7[%c2, %c0_2] : memref<8x128xf32, #tpu.memory_space<vmem>>, vector<1x128xf32>
      %11 = vector.broadcast %10 : vector<1x128xf32> to vector<400x128xf32>
      %12 = arith.mulf %9, %11 : vector<400x128xf32>
      %c3 = arith.constant 3 : index
      %c0_3 = arith.constant 0 : index
      %13 = vector.load %arg7[%c3, %c0_3] : memref<8x128xf32, #tpu.memory_space<vmem>>, vector<1x128xf32>
      %14 = vector.broadcast %13 : vector<1x128xf32> to vector<400x128xf32>
      %15 = arith.addf %12, %14 : vector<400x128xf32>
      %cst = arith.constant 0.000000e+00 : f32
      %16 = vector.broadcast %cst : f32 to vector<400x128xf32>
      %17 = arith.maximumf %15, %16 : vector<400x128xf32>
      %18 = vector.extract_strided_slice %17 {offsets = [0, 0], sizes = [400, 32], strides = [1, 1]} : vector<400x128xf32> to vector<400x32xf32>
      %19 = arith.truncf %18 : vector<400x32xf32> to vector<400x32xbf16>
      %c0_4 = arith.constant 0 : index
      %c0_5 = arith.constant 0 : index
      %20 = vector.load %arg5[%c0_4, %c0_5] : memref<400x32xbf16, #tpu.memory_space<vmem>>, vector<400x32xbf16>
      tpu.vector_store %arg5[%c0_4, %c0_5], %19 {strides = array<i32>} : memref<400x32xbf16, #tpu.memory_space<vmem>>, vector<400x32xbf16>,
    } else {
    }
    return
  }
  func.func @transform_0(%arg0: i32, %arg1: i32) -> (i32, i32) {
    %c1_i32 = arith.constant 1 : i32
    %0 = arith.subi %c1_i32, %arg0 : i32
    %1 = arith.muli %0, %arg1 : i32
    %c0_i32 = arith.constant 0 : i32
    %c0_i32_0 = arith.constant 0 : i32
    return %1, %c0_i32 : i32, i32
  }
  func.func @transform_1(%arg0: i32, %arg1: i32) -> (i32, i32) {
    %c0_i32 = arith.constant 0 : i32
    %c0_i32_0 = arith.constant 0 : i32
    %c0_i32_1 = arith.constant 0 : i32
    return %c0_i32, %c0_i32_0 : i32, i32
  }
  func.func @transform_2(%arg0: i32, %arg1: i32) -> (i32, i32) {
    %c0_i32 = arith.constant 0 : i32
    %c0_i32_0 = arith.constant 0 : i32
    %c0_i32_1 = arith.constant 0 : i32
    return %c0_i32, %c0_i32_0 : i32, i32
  }
  func.func @transform_3(%arg0: i32, %arg1: i32) -> (i32, i32) {
    %0 = arith.muli %arg0, %arg1 : i32
    %c0_i32 = arith.constant 0 : i32
    %c0_i32_0 = arith.constant 0 : i32
    return %0, %c0_i32 : i32, i32
  }
}

module attributes {stable_mosaic.version = 11 : i64} {
  func.func @_conv_bn_relu_kernel(%arg0: i32, %arg1: i32, %arg2: memref<64x512xbf16, #tpu.memory_space<vmem>>, %arg3: memref<512x128xbf16, #tpu.memory_space<vmem>>, %arg4: memref<8x128xf32, #tpu.memory_space<vmem>>, %arg5: memref<64x64xbf16, #tpu.memory_space<vmem>>, %arg6: memref<64x128xf32, #tpu.memory_space<vmem>>, %arg7: memref<8x128xf32, #tpu.memory_space<vmem>>) attributes {dimension_semantics = [#tpu.dimension_semantics<arbitrary>, #tpu.dimension_semantics<arbitrary>], iteration_bounds = array<i64: 2, 1>, scalar_prefetch = 0 : i64, scratch_operands = 2 : i64, tpu.core_type = #tpu.core_type<tc>, window_params = [{transform_indices = @transform_0, window_bounds = array<i64: 64, 512>}, {pipeline_mode = #tpu.pipeline_mode<synchronous>, transform_indices = @transform_1, window_bounds = array<i64: 512, 128>}, {pipeline_mode = #tpu.pipeline_mode<synchronous>, transform_indices = @transform_2, window_bounds = array<i64: 8, 128>}, {transform_indices = @transform_3, window_bounds = array<i64: 64, 64>}]} {
    %c0_i32 = arith.constant 0 : i32
    %0 = arith.cmpi eq, %arg0, %c0_i32 : i32
    %1 = arith.extui %0 : i1 to i32
    %c0_i32_0 = arith.constant 0 : i32
    %2 = arith.cmpi ne, %1, %c0_i32_0 : i32
    scf.if %2 {
      %c0_i32_2 = arith.constant 0 : i32
      %6 = arith.cmpi eq, %arg1, %c0_i32_2 : i32
      %7 = arith.extui %6 : i1 to i32
      %c0_i32_3 = arith.constant 0 : i32
      %8 = arith.cmpi ne, %7, %c0_i32_3 : i32
      scf.if %8 {
        %cst_21 = arith.constant 0.000000e+00 : f32
        %33 = vector.broadcast %cst_21 : f32 to vector<8x128xf32>
        %c0_22 = arith.constant 0 : index
        %c0_23 = arith.constant 0 : index
        %34 = vector.load %arg7[%c0_22, %c0_23] : memref<8x128xf32, #tpu.memory_space<vmem>>, vector<8x128xf32>
        tpu.vector_store %arg7[%c0_22, %c0_23], %33 {strides = array<i32>} : memref<8x128xf32, #tpu.memory_space<vmem>>, vector<8x128xf32>,
      } else {
      }
      %c0 = arith.constant 0 : index
      %c0_4 = arith.constant 0 : index
      %9 = vector.load %arg2[%c0, %c0_4] : memref<64x512xbf16, #tpu.memory_space<vmem>>, vector<64x512xbf16>
      %c0_5 = arith.constant 0 : index
      %c0_6 = arith.constant 0 : index
      %10 = vector.load %arg3[%c0_5, %c0_6] : memref<512x128xbf16, #tpu.memory_space<vmem>>, vector<512x128xbf16>
      %cst = arith.constant dense<0.000000e+00> : vector<64x128xf32>
      %11 = tpu.matmul %9, %10, %cst {dimension_numbers = #tpu.dot_dimension_numbers<[1], [0], [0], [1], [0, 0, 1, 1], [], []>} : vector<64x512xbf16>, vector<512x128xbf16>, vector<64x128xf32> -> vector<64x128xf32>
      %c0_7 = arith.constant 0 : index
      %c0_8 = arith.constant 0 : index
      %12 = vector.load %arg4[%c0_7, %c0_8] : memref<8x128xf32, #tpu.memory_space<vmem>>, vector<1x128xf32>
      %13 = vector.broadcast %12 : vector<1x128xf32> to vector<64x128xf32>
      %14 = arith.addf %11, %13 : vector<64x128xf32>
      %c64_i32 = arith.constant 64 : i32
      %15 = arith.muli %arg1, %c64_i32 : i32
      %16 = tpu.assume_multiple %15, 8 : i32
      %17 = arith.index_cast %16 : i32 to index
      %c0_9 = arith.constant 0 : index
      %18 = vector.load %arg6[%17, %c0_9] : memref<64x128xf32, #tpu.memory_space<vmem>>, vector<64x128xf32>
      tpu.vector_store %arg6[%17, %c0_9], %14 {strides = array<i32>} : memref<64x128xf32, #tpu.memory_space<vmem>>, vector<64x128xf32>,
      %c0_10 = arith.constant 0 : index
      %c0_11 = arith.constant 0 : index
      %19 = vector.load %arg7[%c0_10, %c0_11] : memref<8x128xf32, #tpu.memory_space<vmem>>, vector<1x128xf32>
      %cst_12 = arith.constant dense<0.000000e+00> : vector<128xf32>
      %20 = vector.multi_reduction <add>, %14, %cst_12 [0] : vector<64x128xf32> to vector<128xf32>
      %21 = vector.shape_cast %20 : vector<128xf32> to vector<1x128xf32>
      %22 = arith.addf %19, %21 : vector<1x128xf32>
      %c0_13 = arith.constant 0 : index
      %c0_14 = arith.constant 0 : index
      %23 = vector.load %arg7[%c0_13, %c0_14] : memref<8x128xf32, #tpu.memory_space<vmem>>, vector<1x128xf32>
      tpu.vector_store %arg7[%c0_13, %c0_14], %22 {strides = array<i32>} : memref<8x128xf32, #tpu.memory_space<vmem>>, vector<1x128xf32>,
      %c1 = arith.constant 1 : index
      %c0_15 = arith.constant 0 : index
      %24 = vector.load %arg7[%c1, %c0_15] : memref<8x128xf32, #tpu.memory_space<vmem>>, vector<1x128xf32>
      %25 = arith.mulf %14, %14 : vector<64x128xf32>
      %cst_16 = arith.constant dense<0.000000e+00> : vector<128xf32>
      %26 = vector.multi_reduction <add>, %25, %cst_16 [0] : vector<64x128xf32> to vector<128xf32>
      %27 = vector.shape_cast %26 : vector<128xf32> to vector<1x128xf32>
      %28 = arith.addf %24, %27 : vector<1x128xf32>
      %c1_17 = arith.constant 1 : index
      %c0_18 = arith.constant 0 : index
      %29 = vector.load %arg7[%c1_17, %c0_18] : memref<8x128xf32, #tpu.memory_space<vmem>>, vector<1x128xf32>
      tpu.vector_store %arg7[%c1_17, %c0_18], %28 {strides = array<i32>} : memref<8x128xf32, #tpu.memory_space<vmem>>, vector<1x128xf32>,
      %c0_i32_19 = arith.constant 0 : i32
      %30 = arith.cmpi eq, %arg1, %c0_i32_19 : i32
      %31 = arith.extui %30 : i1 to i32
      %c0_i32_20 = arith.constant 0 : i32
      %32 = arith.cmpi ne, %31, %c0_i32_20 : i32
      scf.if %32 {
        %c0_21 = arith.constant 0 : index
        %c0_22 = arith.constant 0 : index
        %33 = vector.load %arg7[%c0_21, %c0_22] : memref<8x128xf32, #tpu.memory_space<vmem>>, vector<1x128xf32>
        %cst_23 = arith.constant 1.562500e-02 : f32
        %34 = vector.broadcast %cst_23 : f32 to vector<1x128xf32>
        %35 = arith.mulf %33, %34 : vector<1x128xf32>
        %c1_24 = arith.constant 1 : index
        %c0_25 = arith.constant 0 : index
        %36 = vector.load %arg7[%c1_24, %c0_25] : memref<8x128xf32, #tpu.memory_space<vmem>>, vector<1x128xf32>
        %cst_26 = arith.constant 1.562500e-02 : f32
        %37 = vector.broadcast %cst_26 : f32 to vector<1x128xf32>
        %38 = arith.mulf %36, %37 : vector<1x128xf32>
        %39 = arith.mulf %35, %35 : vector<1x128xf32>
        %40 = arith.subf %38, %39 : vector<1x128xf32>
        %c1_27 = arith.constant 1 : index
        %c0_28 = arith.constant 0 : index
        %41 = vector.load %arg4[%c1_27, %c0_28] : memref<8x128xf32, #tpu.memory_space<vmem>>, vector<1x128xf32>
        %cst_29 = arith.constant 9.99999974E-6 : f32
        %42 = vector.broadcast %cst_29 : f32 to vector<1x128xf32>
        %43 = arith.addf %40, %42 : vector<1x128xf32>
        %44 = math.rsqrt %43 : vector<1x128xf32>
        %45 = arith.mulf %41, %44 : vector<1x128xf32>
        %c2 = arith.constant 2 : index
        %c0_30 = arith.constant 0 : index
        %46 = vector.load %arg7[%c2, %c0_30] : memref<8x128xf32, #tpu.memory_space<vmem>>, vector<1x128xf32>
        tpu.vector_store %arg7[%c2, %c0_30], %45 {strides = array<i32>} : memref<8x128xf32, #tpu.memory_space<vmem>>, vector<1x128xf32>,
        %c2_31 = arith.constant 2 : index
        %c0_32 = arith.constant 0 : index
        %47 = vector.load %arg4[%c2_31, %c0_32] : memref<8x128xf32, #tpu.memory_space<vmem>>, vector<1x128xf32>
        %48 = arith.mulf %35, %45 : vector<1x128xf32>
        %49 = arith.subf %47, %48 : vector<1x128xf32>
        %c3 = arith.constant 3 : index
        %c0_33 = arith.constant 0 : index
        %50 = vector.load %arg7[%c3, %c0_33] : memref<8x128xf32, #tpu.memory_space<vmem>>, vector<1x128xf32>
        tpu.vector_store %arg7[%c3, %c0_33], %49 {strides = array<i32>} : memref<8x128xf32, #tpu.memory_space<vmem>>, vector<1x128xf32>,
      } else {
      }
    } else {
    }
    %c1_i32 = arith.constant 1 : i32
    %3 = arith.cmpi eq, %arg0, %c1_i32 : i32
    %4 = arith.extui %3 : i1 to i32
    %c0_i32_1 = arith.constant 0 : i32
    %5 = arith.cmpi ne, %4, %c0_i32_1 : i32
    scf.if %5 {
      %c64_i32 = arith.constant 64 : i32
      %6 = arith.muli %arg1, %c64_i32 : i32
      %7 = tpu.assume_multiple %6, 8 : i32
      %8 = arith.index_cast %7 : i32 to index
      %c0 = arith.constant 0 : index
      %9 = vector.load %arg6[%8, %c0] : memref<64x128xf32, #tpu.memory_space<vmem>>, vector<64x128xf32>
      %c2 = arith.constant 2 : index
      %c0_2 = arith.constant 0 : index
      %10 = vector.load %arg7[%c2, %c0_2] : memref<8x128xf32, #tpu.memory_space<vmem>>, vector<1x128xf32>
      %11 = vector.broadcast %10 : vector<1x128xf32> to vector<64x128xf32>
      %12 = arith.mulf %9, %11 : vector<64x128xf32>
      %c3 = arith.constant 3 : index
      %c0_3 = arith.constant 0 : index
      %13 = vector.load %arg7[%c3, %c0_3] : memref<8x128xf32, #tpu.memory_space<vmem>>, vector<1x128xf32>
      %14 = vector.broadcast %13 : vector<1x128xf32> to vector<64x128xf32>
      %15 = arith.addf %12, %14 : vector<64x128xf32>
      %cst = arith.constant 0.000000e+00 : f32
      %16 = vector.broadcast %cst : f32 to vector<64x128xf32>
      %17 = arith.maximumf %15, %16 : vector<64x128xf32>
      %18 = vector.extract_strided_slice %17 {offsets = [0, 0], sizes = [64, 64], strides = [1, 1]} : vector<64x128xf32> to vector<64x64xf32>
      %19 = arith.truncf %18 : vector<64x64xf32> to vector<64x64xbf16>
      %c0_4 = arith.constant 0 : index
      %c0_5 = arith.constant 0 : index
      %20 = vector.load %arg5[%c0_4, %c0_5] : memref<64x64xbf16, #tpu.memory_space<vmem>>, vector<64x64xbf16>
      tpu.vector_store %arg5[%c0_4, %c0_5], %19 {strides = array<i32>} : memref<64x64xbf16, #tpu.memory_space<vmem>>, vector<64x64xbf16>,
    } else {
    }
    return
  }
  func.func @transform_0(%arg0: i32, %arg1: i32) -> (i32, i32) {
    %c1_i32 = arith.constant 1 : i32
    %0 = arith.subi %c1_i32, %arg0 : i32
    %1 = arith.muli %0, %arg1 : i32
    %c0_i32 = arith.constant 0 : i32
    %c0_i32_0 = arith.constant 0 : i32
    return %1, %c0_i32 : i32, i32
  }
  func.func @transform_1(%arg0: i32, %arg1: i32) -> (i32, i32) {
    %c0_i32 = arith.constant 0 : i32
    %c0_i32_0 = arith.constant 0 : i32
    %c0_i32_1 = arith.constant 0 : i32
    return %c0_i32, %c0_i32_0 : i32, i32
  }
  func.func @transform_2(%arg0: i32, %arg1: i32) -> (i32, i32) {
    %c0_i32 = arith.constant 0 : i32
    %c0_i32_0 = arith.constant 0 : i32
    %c0_i32_1 = arith.constant 0 : i32
    return %c0_i32, %c0_i32_0 : i32, i32
  }
  func.func @transform_3(%arg0: i32, %arg1: i32) -> (i32, i32) {
    %0 = arith.muli %arg0, %arg1 : i32
    %c0_i32 = arith.constant 0 : i32
    %c0_i32_0 = arith.constant 0 : i32
    return %0, %c0_i32 : i32, i32
  }
}

module attributes {stable_mosaic.version = 11 : i64} {
  func.func @_conv_bn_relu_kernel(%arg0: i32, %arg1: i32, %arg2: memref<16x576xbf16, #tpu.memory_space<vmem>>, %arg3: memref<576x128xbf16, #tpu.memory_space<vmem>>, %arg4: memref<8x128xf32, #tpu.memory_space<vmem>>, %arg5: memref<16x64xbf16, #tpu.memory_space<vmem>>, %arg6: memref<16x128xf32, #tpu.memory_space<vmem>>, %arg7: memref<8x128xf32, #tpu.memory_space<vmem>>) attributes {dimension_semantics = [#tpu.dimension_semantics<arbitrary>, #tpu.dimension_semantics<arbitrary>], iteration_bounds = array<i64: 2, 1>, scalar_prefetch = 0 : i64, scratch_operands = 2 : i64, tpu.core_type = #tpu.core_type<tc>, window_params = [{transform_indices = @transform_0, window_bounds = array<i64: 16, 576>}, {pipeline_mode = #tpu.pipeline_mode<synchronous>, transform_indices = @transform_1, window_bounds = array<i64: 576, 128>}, {pipeline_mode = #tpu.pipeline_mode<synchronous>, transform_indices = @transform_2, window_bounds = array<i64: 8, 128>}, {transform_indices = @transform_3, window_bounds = array<i64: 16, 64>}]} {
    %c0_i32 = arith.constant 0 : i32
    %0 = arith.cmpi eq, %arg0, %c0_i32 : i32
    %1 = arith.extui %0 : i1 to i32
    %c0_i32_0 = arith.constant 0 : i32
    %2 = arith.cmpi ne, %1, %c0_i32_0 : i32
    scf.if %2 {
      %c0_i32_2 = arith.constant 0 : i32
      %6 = arith.cmpi eq, %arg1, %c0_i32_2 : i32
      %7 = arith.extui %6 : i1 to i32
      %c0_i32_3 = arith.constant 0 : i32
      %8 = arith.cmpi ne, %7, %c0_i32_3 : i32
      scf.if %8 {
        %cst_21 = arith.constant 0.000000e+00 : f32
        %33 = vector.broadcast %cst_21 : f32 to vector<8x128xf32>
        %c0_22 = arith.constant 0 : index
        %c0_23 = arith.constant 0 : index
        %34 = vector.load %arg7[%c0_22, %c0_23] : memref<8x128xf32, #tpu.memory_space<vmem>>, vector<8x128xf32>
        tpu.vector_store %arg7[%c0_22, %c0_23], %33 {strides = array<i32>} : memref<8x128xf32, #tpu.memory_space<vmem>>, vector<8x128xf32>,
      } else {
      }
      %c0 = arith.constant 0 : index
      %c0_4 = arith.constant 0 : index
      %9 = vector.load %arg2[%c0, %c0_4] : memref<16x576xbf16, #tpu.memory_space<vmem>>, vector<16x576xbf16>
      %c0_5 = arith.constant 0 : index
      %c0_6 = arith.constant 0 : index
      %10 = vector.load %arg3[%c0_5, %c0_6] : memref<576x128xbf16, #tpu.memory_space<vmem>>, vector<576x128xbf16>
      %cst = arith.constant dense<0.000000e+00> : vector<16x128xf32>
      %11 = tpu.matmul %9, %10, %cst {dimension_numbers = #tpu.dot_dimension_numbers<[1], [0], [0], [1], [0, 0, 1, 1], [], []>} : vector<16x576xbf16>, vector<576x128xbf16>, vector<16x128xf32> -> vector<16x128xf32>
      %c0_7 = arith.constant 0 : index
      %c0_8 = arith.constant 0 : index
      %12 = vector.load %arg4[%c0_7, %c0_8] : memref<8x128xf32, #tpu.memory_space<vmem>>, vector<1x128xf32>
      %13 = vector.broadcast %12 : vector<1x128xf32> to vector<16x128xf32>
      %14 = arith.addf %11, %13 : vector<16x128xf32>
      %c16_i32 = arith.constant 16 : i32
      %15 = arith.muli %arg1, %c16_i32 : i32
      %16 = tpu.assume_multiple %15, 8 : i32
      %17 = arith.index_cast %16 : i32 to index
      %c0_9 = arith.constant 0 : index
      %18 = vector.load %arg6[%17, %c0_9] : memref<16x128xf32, #tpu.memory_space<vmem>>, vector<16x128xf32>
      tpu.vector_store %arg6[%17, %c0_9], %14 {strides = array<i32>} : memref<16x128xf32, #tpu.memory_space<vmem>>, vector<16x128xf32>,
      %c0_10 = arith.constant 0 : index
      %c0_11 = arith.constant 0 : index
      %19 = vector.load %arg7[%c0_10, %c0_11] : memref<8x128xf32, #tpu.memory_space<vmem>>, vector<1x128xf32>
      %cst_12 = arith.constant dense<0.000000e+00> : vector<128xf32>
      %20 = vector.multi_reduction <add>, %14, %cst_12 [0] : vector<16x128xf32> to vector<128xf32>
      %21 = vector.shape_cast %20 : vector<128xf32> to vector<1x128xf32>
      %22 = arith.addf %19, %21 : vector<1x128xf32>
      %c0_13 = arith.constant 0 : index
      %c0_14 = arith.constant 0 : index
      %23 = vector.load %arg7[%c0_13, %c0_14] : memref<8x128xf32, #tpu.memory_space<vmem>>, vector<1x128xf32>
      tpu.vector_store %arg7[%c0_13, %c0_14], %22 {strides = array<i32>} : memref<8x128xf32, #tpu.memory_space<vmem>>, vector<1x128xf32>,
      %c1 = arith.constant 1 : index
      %c0_15 = arith.constant 0 : index
      %24 = vector.load %arg7[%c1, %c0_15] : memref<8x128xf32, #tpu.memory_space<vmem>>, vector<1x128xf32>
      %25 = arith.mulf %14, %14 : vector<16x128xf32>
      %cst_16 = arith.constant dense<0.000000e+00> : vector<128xf32>
      %26 = vector.multi_reduction <add>, %25, %cst_16 [0] : vector<16x128xf32> to vector<128xf32>
      %27 = vector.shape_cast %26 : vector<128xf32> to vector<1x128xf32>
      %28 = arith.addf %24, %27 : vector<1x128xf32>
      %c1_17 = arith.constant 1 : index
      %c0_18 = arith.constant 0 : index
      %29 = vector.load %arg7[%c1_17, %c0_18] : memref<8x128xf32, #tpu.memory_space<vmem>>, vector<1x128xf32>
      tpu.vector_store %arg7[%c1_17, %c0_18], %28 {strides = array<i32>} : memref<8x128xf32, #tpu.memory_space<vmem>>, vector<1x128xf32>,
      %c0_i32_19 = arith.constant 0 : i32
      %30 = arith.cmpi eq, %arg1, %c0_i32_19 : i32
      %31 = arith.extui %30 : i1 to i32
      %c0_i32_20 = arith.constant 0 : i32
      %32 = arith.cmpi ne, %31, %c0_i32_20 : i32
      scf.if %32 {
        %c0_21 = arith.constant 0 : index
        %c0_22 = arith.constant 0 : index
        %33 = vector.load %arg7[%c0_21, %c0_22] : memref<8x128xf32, #tpu.memory_space<vmem>>, vector<1x128xf32>
        %cst_23 = arith.constant 6.250000e-02 : f32
        %34 = vector.broadcast %cst_23 : f32 to vector<1x128xf32>
        %35 = arith.mulf %33, %34 : vector<1x128xf32>
        %c1_24 = arith.constant 1 : index
        %c0_25 = arith.constant 0 : index
        %36 = vector.load %arg7[%c1_24, %c0_25] : memref<8x128xf32, #tpu.memory_space<vmem>>, vector<1x128xf32>
        %cst_26 = arith.constant 6.250000e-02 : f32
        %37 = vector.broadcast %cst_26 : f32 to vector<1x128xf32>
        %38 = arith.mulf %36, %37 : vector<1x128xf32>
        %39 = arith.mulf %35, %35 : vector<1x128xf32>
        %40 = arith.subf %38, %39 : vector<1x128xf32>
        %c1_27 = arith.constant 1 : index
        %c0_28 = arith.constant 0 : index
        %41 = vector.load %arg4[%c1_27, %c0_28] : memref<8x128xf32, #tpu.memory_space<vmem>>, vector<1x128xf32>
        %cst_29 = arith.constant 9.99999974E-6 : f32
        %42 = vector.broadcast %cst_29 : f32 to vector<1x128xf32>
        %43 = arith.addf %40, %42 : vector<1x128xf32>
        %44 = math.rsqrt %43 : vector<1x128xf32>
        %45 = arith.mulf %41, %44 : vector<1x128xf32>
        %c2 = arith.constant 2 : index
        %c0_30 = arith.constant 0 : index
        %46 = vector.load %arg7[%c2, %c0_30] : memref<8x128xf32, #tpu.memory_space<vmem>>, vector<1x128xf32>
        tpu.vector_store %arg7[%c2, %c0_30], %45 {strides = array<i32>} : memref<8x128xf32, #tpu.memory_space<vmem>>, vector<1x128xf32>,
        %c2_31 = arith.constant 2 : index
        %c0_32 = arith.constant 0 : index
        %47 = vector.load %arg4[%c2_31, %c0_32] : memref<8x128xf32, #tpu.memory_space<vmem>>, vector<1x128xf32>
        %48 = arith.mulf %35, %45 : vector<1x128xf32>
        %49 = arith.subf %47, %48 : vector<1x128xf32>
        %c3 = arith.constant 3 : index
        %c0_33 = arith.constant 0 : index
        %50 = vector.load %arg7[%c3, %c0_33] : memref<8x128xf32, #tpu.memory_space<vmem>>, vector<1x128xf32>
        tpu.vector_store %arg7[%c3, %c0_33], %49 {strides = array<i32>} : memref<8x128xf32, #tpu.memory_space<vmem>>, vector<1x128xf32>,
      } else {
      }
    } else {
    }
    %c1_i32 = arith.constant 1 : i32
    %3 = arith.cmpi eq, %arg0, %c1_i32 : i32
    %4 = arith.extui %3 : i1 to i32
    %c0_i32_1 = arith.constant 0 : i32
    %5 = arith.cmpi ne, %4, %c0_i32_1 : i32
    scf.if %5 {
      %c16_i32 = arith.constant 16 : i32
      %6 = arith.muli %arg1, %c16_i32 : i32
      %7 = tpu.assume_multiple %6, 8 : i32
      %8 = arith.index_cast %7 : i32 to index
      %c0 = arith.constant 0 : index
      %9 = vector.load %arg6[%8, %c0] : memref<16x128xf32, #tpu.memory_space<vmem>>, vector<16x128xf32>
      %c2 = arith.constant 2 : index
      %c0_2 = arith.constant 0 : index
      %10 = vector.load %arg7[%c2, %c0_2] : memref<8x128xf32, #tpu.memory_space<vmem>>, vector<1x128xf32>
      %11 = vector.broadcast %10 : vector<1x128xf32> to vector<16x128xf32>
      %12 = arith.mulf %9, %11 : vector<16x128xf32>
      %c3 = arith.constant 3 : index
      %c0_3 = arith.constant 0 : index
      %13 = vector.load %arg7[%c3, %c0_3] : memref<8x128xf32, #tpu.memory_space<vmem>>, vector<1x128xf32>
      %14 = vector.broadcast %13 : vector<1x128xf32> to vector<16x128xf32>
      %15 = arith.addf %12, %14 : vector<16x128xf32>
      %cst = arith.constant 0.000000e+00 : f32
      %16 = vector.broadcast %cst : f32 to vector<16x128xf32>
      %17 = arith.maximumf %15, %16 : vector<16x128xf32>
      %18 = vector.extract_strided_slice %17 {offsets = [0, 0], sizes = [16, 64], strides = [1, 1]} : vector<16x128xf32> to vector<16x64xf32>
      %19 = arith.truncf %18 : vector<16x64xf32> to vector<16x64xbf16>
      %c0_4 = arith.constant 0 : index
      %c0_5 = arith.constant 0 : index
      %20 = vector.load %arg5[%c0_4, %c0_5] : memref<16x64xbf16, #tpu.memory_space<vmem>>, vector<16x64xbf16>
      tpu.vector_store %arg5[%c0_4, %c0_5], %19 {strides = array<i32>} : memref<16x64xbf16, #tpu.memory_space<vmem>>, vector<16x64xbf16>,
    } else {
    }
    return
  }
  func.func @transform_0(%arg0: i32, %arg1: i32) -> (i32, i32) {
    %c1_i32 = arith.constant 1 : i32
    %0 = arith.subi %c1_i32, %arg0 : i32
    %1 = arith.muli %0, %arg1 : i32
    %c0_i32 = arith.constant 0 : i32
    %c0_i32_0 = arith.constant 0 : i32
    return %1, %c0_i32 : i32, i32
  }
  func.func @transform_1(%arg0: i32, %arg1: i32) -> (i32, i32) {
    %c0_i32 = arith.constant 0 : i32
    %c0_i32_0 = arith.constant 0 : i32
    %c0_i32_1 = arith.constant 0 : i32
    return %c0_i32, %c0_i32_0 : i32, i32
  }
  func.func @transform_2(%arg0: i32, %arg1: i32) -> (i32, i32) {
    %c0_i32 = arith.constant 0 : i32
    %c0_i32_0 = arith.constant 0 : i32
    %c0_i32_1 = arith.constant 0 : i32
    return %c0_i32, %c0_i32_0 : i32, i32
  }
  func.func @transform_3(%arg0: i32, %arg1: i32) -> (i32, i32) {
    %0 = arith.muli %arg0, %arg1 : i32
    %c0_i32 = arith.constant 0 : i32
    %c0_i32_0 = arith.constant 0 : i32
    return %0, %c0_i32 : i32, i32
  }
}

module attributes {stable_mosaic.version = 11 : i64} {
  func.func @_fc_kernel(%arg0: i32, %arg1: memref<8x256xbf16, #tpu.memory_space<vmem>>, %arg2: memref<256x512xbf16, #tpu.memory_space<vmem>>, %arg3: memref<8x512xf32, #tpu.memory_space<vmem>>, %arg4: memref<512x128xbf16, #tpu.memory_space<vmem>>, %arg5: memref<8x128xf32, #tpu.memory_space<vmem>>, %arg6: memref<8x128xf32, #tpu.memory_space<vmem>>) attributes {dimension_semantics = [#tpu.dimension_semantics<parallel>], iteration_bounds = array<i64: 1>, scalar_prefetch = 0 : i64, scratch_operands = 0 : i64, tpu.core_type = #tpu.core_type<tc>, window_params = [{transform_indices = @transform_0, window_bounds = array<i64: 8, 256>}, {pipeline_mode = #tpu.pipeline_mode<synchronous>, transform_indices = @transform_1, window_bounds = array<i64: 256, 512>}, {pipeline_mode = #tpu.pipeline_mode<synchronous>, transform_indices = @transform_2, window_bounds = array<i64: 8, 512>}, {pipeline_mode = #tpu.pipeline_mode<synchronous>, transform_indices = @transform_3, window_bounds = array<i64: 512, 128>}, {pipeline_mode = #tpu.pipeline_mode<synchronous>, transform_indices = @transform_4, window_bounds = array<i64: 8, 128>}, {transform_indices = @transform_5, window_bounds = array<i64: 8, 128>}]} {
    %c0 = arith.constant 0 : index
    %c0_0 = arith.constant 0 : index
    %0 = vector.load %arg1[%c0, %c0_0] : memref<8x256xbf16, #tpu.memory_space<vmem>>, vector<8x256xbf16>
    %c0_1 = arith.constant 0 : index
    %c0_2 = arith.constant 0 : index
    %1 = vector.load %arg2[%c0_1, %c0_2] : memref<256x512xbf16, #tpu.memory_space<vmem>>, vector<256x512xbf16>
    %cst = arith.constant dense<0.000000e+00> : vector<8x512xf32>
    %2 = tpu.matmul %0, %1, %cst {dimension_numbers = #tpu.dot_dimension_numbers<[1], [0], [0], [1], [0, 0, 1, 1], [], []>} : vector<8x256xbf16>, vector<256x512xbf16>, vector<8x512xf32> -> vector<8x512xf32>
    %c0_3 = arith.constant 0 : index
    %c0_4 = arith.constant 0 : index
    %3 = vector.load %arg3[%c0_3, %c0_4] : memref<8x512xf32, #tpu.memory_space<vmem>>, vector<1x512xf32>
    %4 = vector.broadcast %3 : vector<1x512xf32> to vector<8x512xf32>
    %5 = arith.addf %2, %4 : vector<8x512xf32>
    %cst_5 = arith.constant 0.000000e+00 : f32
    %6 = vector.broadcast %cst_5 : f32 to vector<8x512xf32>
    %7 = arith.maximumf %5, %6 : vector<8x512xf32>
    %8 = arith.truncf %7 : vector<8x512xf32> to vector<8x512xbf16>
    %c0_6 = arith.constant 0 : index
    %c0_7 = arith.constant 0 : index
    %9 = vector.load %arg4[%c0_6, %c0_7] : memref<512x128xbf16, #tpu.memory_space<vmem>>, vector<512x128xbf16>
    %cst_8 = arith.constant dense<0.000000e+00> : vector<8x128xf32>
    %10 = tpu.matmul %8, %9, %cst_8 {dimension_numbers = #tpu.dot_dimension_numbers<[1], [0], [0], [1], [0, 0, 1, 1], [], []>} : vector<8x512xbf16>, vector<512x128xbf16>, vector<8x128xf32> -> vector<8x128xf32>
    %c0_9 = arith.constant 0 : index
    %c0_10 = arith.constant 0 : index
    %11 = vector.load %arg5[%c0_9, %c0_10] : memref<8x128xf32, #tpu.memory_space<vmem>>, vector<1x128xf32>
    %12 = vector.broadcast %11 : vector<1x128xf32> to vector<8x128xf32>
    %13 = arith.addf %10, %12 : vector<8x128xf32>
    %c0_11 = arith.constant 0 : index
    %c0_12 = arith.constant 0 : index
    %14 = vector.load %arg6[%c0_11, %c0_12] : memref<8x128xf32, #tpu.memory_space<vmem>>, vector<8x128xf32>
    tpu.vector_store %arg6[%c0_11, %c0_12], %13 {strides = array<i32>} : memref<8x128xf32, #tpu.memory_space<vmem>>, vector<8x128xf32>,
    return
  }
  func.func @transform_0(%arg0: i32) -> (i32, i32) {
    %c0_i32 = arith.constant 0 : i32
    %c0_i32_0 = arith.constant 0 : i32
    return %arg0, %c0_i32 : i32, i32
  }
  func.func @transform_1(%arg0: i32) -> (i32, i32) {
    %c0_i32 = arith.constant 0 : i32
    %c0_i32_0 = arith.constant 0 : i32
    %c0_i32_1 = arith.constant 0 : i32
    return %c0_i32, %c0_i32_0 : i32, i32
  }
  func.func @transform_2(%arg0: i32) -> (i32, i32) {
    %c0_i32 = arith.constant 0 : i32
    %c0_i32_0 = arith.constant 0 : i32
    %c0_i32_1 = arith.constant 0 : i32
    return %c0_i32, %c0_i32_0 : i32, i32
  }
  func.func @transform_3(%arg0: i32) -> (i32, i32) {
    %c0_i32 = arith.constant 0 : i32
    %c0_i32_0 = arith.constant 0 : i32
    %c0_i32_1 = arith.constant 0 : i32
    return %c0_i32, %c0_i32_0 : i32, i32
  }
  func.func @transform_4(%arg0: i32) -> (i32, i32) {
    %c0_i32 = arith.constant 0 : i32
    %c0_i32_0 = arith.constant 0 : i32
    %c0_i32_1 = arith.constant 0 : i32
    return %c0_i32, %c0_i32_0 : i32, i32
  }
  func.func @transform_5(%arg0: i32) -> (i32, i32) {
    %c0_i32 = arith.constant 0 : i32
    %c0_i32_0 = arith.constant 0 : i32
    return %arg0, %c0_i32 : i32, i32
  }
}

</mosaic_0001>

<bundles_post_ra>
// kernel: dqn_forward.4
= control target key start
LH: loop header
LB: loop body
LE: loop exit
PB: predicated region body
PF: predicated region fallthrough
CT: control target
= control target key end

     0   :  { %8 = vsyncpa [#allocation5], 0  ;;  %s2846_s0 = inlined_call_operand.hbm [shape: bf16[400,256], index: 0, kind: input, shape index: {}]   ;;  %s2847_s1 = inlined_call_operand.hbm [shape: bf16[256,128], index: 1, kind: input, shape index: {}]   ;;  %s2848_s2 = inlined_call_operand.hbm [shape: f32[8,128], index: 2, kind: input, shape index: {}]   ;;  %s2849_s3 = inlined_call_operand.hbm [shape: bf16[400,32], index: 3, kind: output, shape index: {}]  }
   0x1   :  { %10 = vsyncpa [#allocation5 + $0x1], 0 }
   0x2   :  { %11 = vsyncpa [#allocation8], 0 }
   0x3   :  { %12 = vsyncpa [#allocation6], 0 }
   0x4   :  { %14 = vsyncpa [#allocation6 + $0x1], 0  ;;  %s2306_s12 = smov 0   ;;  %s2308_s13 = smov 0  }
   0x5   :  { %s2310_s14 = smov 0  }
   0x6 LB: > { %s1740_s15 = sadd.s32 4294967295, %s2272_s14   ;;  %s1741_s16 = sadd.s32 4294967294, %s2272_s14   ;;  %s2272_s14 = sphi %s2310_s14, %s20_s14   ;;  %s2268_s13 = sphi %s2308_s13, %s2864_s13   ;;  %s2264_s12 = sphi %s2306_s12, %s2863_s12  }
   0x7   : > { %s32_s17 = sadd.s32 1, %s2268_s13  ;;  %p1742_p0 = scmp.ge.s32.totalorder %s2272_s14, 1 }
   0x8   : > { %p34_p1 = scmp.ge.s32.totalorder %s32_s17, 2  ;;  %p137_p2 = scmp.lt.s32.totalorder %s2272_s14, 3 }
   0x9   : > { %p2328_p3 = scmp.eq.s32.totalorder %s1740_s15, 0  ;;  %s2274_s20 = smov [#allocation7]  }
   0xa   : > { %s2866_s17 = smov (%p34_p1, %s32_s17), 0  ;;  %p2334_p4 = pnand %p1742_p0, %p137_p2 }
   0xb   : > { %s2853_s18 = scalar_select %p2328_p3, 1, 0 }
   0xc   : > { %s2854_s19 = scalar_select %p2334_p4, 1, 0 }
   0xd   : > { %s149_s21 = sshll.u32 %s2274_s20, 4  ;;  %p1974_p5 = pneg %p2334_p4  ;;  %s150_s21 = int_to_ptr.vmem [resolvable:$true] %s149_s21 }
   0xe   : > { %s2275_s23 = smov [#allocation9]   ;;  %s2128_s27 = scalar_lea.hbm %s2847_s1, 2048 }
   0xf   : > { %p2343_p7 = pnand %p2328_p3, %p1974_p5  ;;  %s163_s24 = sshll.u32 %s2275_s23, 4  ;;  %s164_s24 = int_to_ptr.vmem [resolvable:$true] %s163_s24 }
  0x10   : > { %p2129_p9 = scmp.ne.s32.totalorder %s2847_s1, %s2128_s27  ;;  %p2135_p13 = scmp.lt.u32.totalorder %s2128_s27, %s2847_s1 }
  0x11   : > { %p2130_p10 = pneg %p2343_p7 }
  0x13   : > { %p2131_p11 = pnand %p2130_p10, %p2129_p9 }
  0x15   : > { %p2132_p12 = pneg %p2131_p11 }
  0x17   : > { %p2137_p0 = pnand %p2135_p13, %p2132_p12 }
  0x19   : > { %2140 = shalt.err (!%p2137_p0)
}
  0x1a   : > { %s2141_s5 = scalar_lea.vmem %s150_s21, 2048  ;;  %p2149_p6 = scmp.lt.s32.totalorder %s150_s21, %s150_s21 }
  0x1b   : > { %p2142_p1 = scmp.ne.s32.totalorder %s150_s21, %s2141_s5  ;;  %p2150_p8 = scmp.lt.s32.totalorder %s2141_s5, %s2141_s5 }
  0x1d   : > { %p2144_p2 = pnand %p2142_p1, %p2130_p10  ;;  %p2151_p3 = por %p2150_p8, %p2149_p6 }
  0x1f   : > { %p2145_p5 = pneg %p2144_p2 }
  0x21   : > { %p2152_p4 = pnand %p2151_p3, %p2145_p5 }
  0x23   : > { %2155 = shalt.err (!%p2152_p4)
}
  0x24   : > { %s2276_s6 = smov 64   ;;  %s2277_s7 = smov 4  }
  0x25   : > { %1977 = dma.hbm_to_vmem [thread:$0]  (!%p2343_p7), %s2847_s1, 2048, %s150_s21, [#allocation8], %s2276_s6, %s2276_s6, %s2277_s7  }
  0x26   : > { %s2156_s20 = scalar_lea.hbm %s2848_s2, 128 }
  0x27   : > { %p2157_p3 = scmp.ne.s32.totalorder %s2848_s2, %s2156_s20  ;;  %p2163_p8 = scmp.lt.u32.totalorder %s2156_s20, %s2848_s2 }
  0x29   : > { %p2159_p4 = pnand %p2157_p3, %p2130_p10 }
  0x2b   : > { %p2160_p6 = pneg %p2159_p4 }
  0x2d   : > { %p2165_p11 = pnand %p2163_p8, %p2160_p6 }
  0x2f   : > { %2168 = shalt.err (!%p2165_p11)
}
  0x30   : > { %s2169_s21 = scalar_lea.vmem %s164_s24, 128  ;;  %p2177_p1 = scmp.lt.s32.totalorder %s164_s24, %s164_s24 }
  0x31   : > { %p2170_p12 = scmp.ne.s32.totalorder %s164_s24, %s2169_s21  ;;  %p2178_p2 = scmp.lt.s32.totalorder %s2169_s21, %s2169_s21 }
  0x33   : > { %p2172_p13 = pnand %p2170_p12, %p2130_p10  ;;  %p2179_p5 = por %p2178_p2, %p2177_p1 }
  0x35   : > { %p2173_p0 = pneg %p2172_p13 }
  0x37   : > { %p2180_p9 = pnand %p2179_p5, %p2173_p0 }
  0x39   : > { %2183 = shalt.err (!%p2180_p9)
}
  0x3a   : > { %1980 = dma.hbm_to_vmem [thread:$0]  (!%p2343_p7), %s2848_s2, 128, %s164_s24, [#allocation8]  }
  0x3b   : > { %p2856_p3 = scmp.lt.s32.totalorder %s2272_s14, 2  ;;  %p2857_p4 = scmp.eq.s32.totalorder %s2272_s14, 0 }
  0x3c   : > { %s2278_s4 = smov [#allocation4]   ;;  %s2184_s22 = scalar_lea.hbm %s2846_s0, 6400 }
  0x3d   : > { %p2395_p6 = pnand %p2857_p4, %p2856_p3  ;;  %s188_s5 = sshll.u32 %s2278_s4, 4  ;;  %s189_s5 = int_to_ptr.vmem [resolvable:$true] %s188_s5 }
  0x3e   : > { %p2185_p10 = scmp.ne.s32.totalorder %s2846_s0, %s2184_s22  ;;  %p2191_p11 = scmp.lt.u32.totalorder %s2184_s22, %s2846_s0 }
  0x3f   : > { %p2186_p7 = pneg %p2395_p6 }
  0x41   : > { %p2187_p9 = pnand %p2186_p7, %p2185_p10 }
  0x43   : > { %p2188_p8 = pneg %p2187_p9 }
  0x45   : > { %p2193_p12 = pnand %p2191_p11, %p2188_p8 }
  0x47   : > { %2196 = shalt.err (!%p2193_p12)
}
  0x48   : > { %s2197_s11 = scalar_lea.vmem %s189_s5, 6400  ;;  %s2204_s20 = scalar_lea.vmem %s189_s5, 12800 }
  0x49   : > { %p2198_p13 = scmp.ne.s32.totalorder %s189_s5, %s2197_s11  ;;  %p2205_p2 = scmp.lt.s32.totalorder %s189_s5, %s189_s5 }
  0x4a   : > { %p2206_p5 = scmp.lt.s32.totalorder %s2204_s20, %s2197_s11 }
  0x4b   : > { %p2200_p0 = pnand %p2198_p13, %p2186_p7 }
  0x4c   : > { %p2207_p3 = por %p2206_p5, %p2205_p2 }
  0x4d   : > { %p2201_p1 = pneg %p2200_p0 }
  0x4f   : > { %p2208_p4 = pnand %p2207_p3, %p2201_p1 }
  0x51   : > { %2211 = shalt.err (!%p2208_p4)
}
  0x52   : > { %s2279_s23 = smov 128   ;;  %s2280_s25 = smov 8  }
  0x53   : > { %1984 = dma.hbm_to_vmem [thread:$0]  (!%p2395_p6), %s2846_s0, 6400, %s189_s5, [#allocation5], %s2279_s23, %s2279_s23, %s2280_s25  }
  0x54   : > { %p2859_p10 = scmp.ne.s32.totalorder %s2854_s19, 0 }
  0x55   : > { %p2860_p7 = scmp.ne.s32.totalorder (!%p2859_p10), %s2853_s18, 0 }
  0x56   : > { %200 = sbr.rel (%p2859_p10) target bundleno = 660 (0x294), region = 32 }
  0x5d   : > { %2251 = dma.done.wait (%p2860_p7), [#allocation5], 6400  }
  0x5e   : > { %2253 = vsyncadd (%p2860_p7), [#allocation5], 4294960896 }
  0x5f   : > { %2255 = dma.done.wait (%p2860_p7), [#allocation8], 2176  }
  0x60   : > { %2257 = vsyncadd (%p2860_p7), [#allocation8], 4294965120  ;;  %p1751_p9 = scmp.ne.s32.totalorder %s2264_s12, 0 }
  0x61   : > { %v2035_v0 = vld [vmem:[#allocation7] sm:$0xff] (!%p1751_p9)   ;;  %v2281_v1 = vmov (!%p1751_p9), 0   ;;  %v2036_v2 = vld [vmem:[#allocation7 + $0x8] sm:$0xff] (!%p1751_p9)   ;;  %v2037_v3 = vld [vmem:[#allocation7 + $0x10] sm:$0xff] (!%p1751_p9)  }
  0x62   : > { %246 = sbr.rel (%p1751_p9) target bundleno = 572 (0x23c), region = 48  ;;  %685 = vmatprep.subr.bf16.mxu0 (!%p1751_p9), %v2281_v1  ;;  %1926 = vmatprep.subr.bf16.mxu1 (!%p1751_p9), %v2281_v1  ;;  %v2038_v4 = vld [vmem:[#allocation7 + $0x18] sm:$0xff] (!%p1751_p9)   ;;  %v2039_v5 = vld [vmem:[#allocation7 + $0x20] sm:$0xff] (!%p1751_p9)   ;;  %v2040_v7 = vld [vmem:[#allocation7 + $0x28] sm:$0xff] (!%p1751_p9)  }
  0x63   : > { %686 = vmatpush1.bf16.msra.mxu0 (!%p1751_p9), %v2035_v0  ;;  %1942 = vmatpush1.bf16.msra.mxu1 (!%p1751_p9), %v2035_v0  ;;  %v2053_v6 = vld [vmem:[#allocation4 + $0x4] ss:$8 sps:$4 sm:$0xff] (!%p1751_p9)   ;;  %v2041_v8 = vld [vmem:[#allocation7 + $0x30] sm:$0xff] (!%p1751_p9)   ;;  %v2042_v9 = vld [vmem:[#allocation7 + $0x38] sm:$0xff] (!%p1751_p9)  }
  0x64   : > { %687 = vmatprep.subr.bf16.mxu0 (!%p1751_p9), %v2281_v1  ;;  %1927 = vmatprep.subr.bf16.mxu1 (!%p1751_p9), %v2281_v1  ;;  %v2074_v10 = vld [vmem:[#allocation4 + $0xd4] ss:$8 sps:$4 sm:$0xff] (!%p1751_p9)   ;;  %v2043_v11 = vld [vmem:[#allocation7 + $0x40] sm:$0xff] (!%p1751_p9)   ;;  %v2044_v12 = vld [vmem:[#allocation7 + $0x48] sm:$0xff] (!%p1751_p9)  }
  0x65   : > { %717 = vmatprep.mubr.bf16.mxu0 (!%p1751_p9), %v2053_v6  ;;  %821 = vmatprep.mubr.bf16.mxu1 (!%p1751_p9), %v2074_v10  ;;  %v2045_v13 = vld [vmem:[#allocation7 + $0x50] sm:$0xff] (!%p1751_p9)   ;;  %v2046_v14 = vld [vmem:[#allocation7 + $0x58] sm:$0xff] (!%p1751_p9)   ;;  %v2047_v15 = vld [vmem:[#allocation7 + $0x60] sm:$0xff] (!%p1751_p9)  }
  0x66   : > { %v2048_v16 = vld [vmem:[#allocation7 + $0x68] sm:$0xff] (!%p1751_p9)   ;;  %v2049_v17 = vld [vmem:[#allocation7 + $0x70] sm:$0xff] (!%p1751_p9)   ;;  %v2050_v18 = vld [vmem:[#allocation7 + $0x78] sm:$0xff] (!%p1751_p9)  }
  0x67   : > { %688 = vmatpush1.bf16.msra.mxu0 (!%p1751_p9), %v2036_v2  ;;  %1943 = vmatpush1.bf16.msra.mxu1 (!%p1751_p9), %v2036_v2  ;;  %v2051_v19 = vld [vmem:[#allocation4] ss:$8 sps:$4 sm:$0xff] (!%p1751_p9)   ;;  %v2072_v20 = vld [vmem:[#allocation4 + $0xd0] ss:$8 sps:$4 sm:$0xff] (!%p1751_p9)   ;;  %v2054_v21 = vld [vmem:[#allocation4 + $0x14] ss:$8 sps:$4 sm:$0xff] (!%p1751_p9)  }
  0x68   : > { %689 = vmatprep.subr.bf16.mxu0 (!%p1751_p9), %v2281_v1  ;;  %1928 = vmatprep.subr.bf16.mxu1 (!%p1751_p9), %v2281_v1  ;;  %v2078_v22 = vld [vmem:[#allocation4 + $0xe4] ss:$8 sps:$4 sm:$0xff] (!%p1751_p9)   ;;  %v2056_v23 = vld [vmem:[#allocation4 + $0x10] ss:$8 sps:$4 sm:$0xff] (!%p1751_p9)   ;;  %v2080_v24 = vld [vmem:[#allocation4 + $0xe0] ss:$8 sps:$4 sm:$0xff] (!%p1751_p9)  }
  0x69   : > { %v2057_v25 = vld [vmem:[#allocation4 + $0x24] ss:$8 sps:$4 sm:$0xff]   ;;  %v2084_v26 = vld [vmem:[#allocation4 + $0xf4] ss:$8 sps:$4 sm:$0xff]   ;;  %v2059_v27 = vld [vmem:[#allocation4 + $0x20] ss:$8 sps:$4 sm:$0xff]  }
  0x6a   : > { %v2086_v28 = vld [vmem:[#allocation4 + $0xf0] ss:$8 sps:$4 sm:$0xff]   ;;  %v2060_v29 = vld [vmem:[#allocation4 + $0x34] ss:$8 sps:$4 sm:$0xff]   ;;  %v2090_v30 = vld [vmem:[#allocation4 + $0x104] ss:$8 sps:$4 sm:$0xff]  }
  0x6b   : > { %690 = vmatpush1.bf16.msra.mxu0 %v2037_v3  ;;  %1944 = vmatpush1.bf16.msra.mxu1 %v2037_v3  ;;  %v2062_v31 = vld [vmem:[#allocation4 + $0x30] ss:$8 sps:$4 sm:$0xff]   ;;  %v2092_v32 = vld [vmem:[#allocation4 + $0x100] ss:$8 sps:$4 sm:$0xff]   ;;  %v2063_v33 = vld [vmem:[#allocation4 + $0x44] ss:$8 sps:$4 sm:$0xff]  }
  0x6c   : > { %691 = vmatprep.subr.bf16.mxu0 %v2281_v1  ;;  %1929 = vmatprep.subr.bf16.mxu1 %v2281_v1  ;;  %v2096_v34 = vld [vmem:[#allocation4 + $0x114] ss:$8 sps:$4 sm:$0xff]   ;;  %v2065_v35 = vld [vmem:[#allocation4 + $0x40] ss:$8 sps:$4 sm:$0xff]   ;;  %v2098_v36 = vld [vmem:[#allocation4 + $0x110] ss:$8 sps:$4 sm:$0xff]  }
  0x6d   : > { %v2066_v37 = vld [vmem:[#allocation4 + $0x54] ss:$8 sps:$4 sm:$0xff]   ;;  %v2102_v38 = vld [vmem:[#allocation4 + $0x124] ss:$8 sps:$4 sm:$0xff]   ;;  %v2068_v39 = vld [vmem:[#allocation4 + $0x50] ss:$8 sps:$4 sm:$0xff]  }
  0x6e   : > { %v2104_v40 = vld [vmem:[#allocation4 + $0x120] ss:$8 sps:$4 sm:$0xff]   ;;  %v2069_v41 = vld [vmem:[#allocation4 + $0x64] ss:$8 sps:$4 sm:$0xff]   ;;  %v2108_v42 = vld [vmem:[#allocation4 + $0x134] ss:$8 sps:$4 sm:$0xff]  }
  0x6f   : > { %692 = vmatpush1.bf16.msra.mxu0 %v2038_v4  ;;  %1945 = vmatpush1.bf16.msra.mxu1 %v2038_v4  ;;  %v2071_v43 = vld [vmem:[#allocation4 + $0x60] ss:$8 sps:$4 sm:$0xff]   ;;  %v2110_v44 = vld [vmem:[#allocation4 + $0x130] ss:$8 sps:$4 sm:$0xff]   ;;  %v2075_v45 = vld [vmem:[#allocation4 + $0x74] ss:$8 sps:$4 sm:$0xff]  }
  0x70   : > { %693 = vmatprep.subr.bf16.mxu0 %v2281_v1  ;;  %1930 = vmatprep.subr.bf16.mxu1 %v2281_v1  ;;  %v2111_v46 = vld [vmem:[#allocation4 + $0x144] ss:$8 sps:$4 sm:$0xff]   ;;  %v2077_v47 = vld [vmem:[#allocation4 + $0x70] ss:$8 sps:$4 sm:$0xff]   ;;  %v2113_v48 = vld [vmem:[#allocation4 + $0x140] ss:$8 sps:$4 sm:$0xff]  }
  0x71   : > { %v2081_v49 = vld [vmem:[#allocation4 + $0x84] ss:$8 sps:$4 sm:$0xff]   ;;  %v2114_v50 = vld [vmem:[#allocation4 + $0x154] ss:$8 sps:$4 sm:$0xff]   ;;  %v2083_v51 = vld [vmem:[#allocation4 + $0x80] ss:$8 sps:$4 sm:$0xff]  }
  0x72   : > { %v2116_v52 = vld [vmem:[#allocation4 + $0x150] ss:$8 sps:$4 sm:$0xff]   ;;  %v2087_v53 = vld [vmem:[#allocation4 + $0x94] ss:$8 sps:$4 sm:$0xff]   ;;  %v2117_v54 = vld [vmem:[#allocation4 + $0x164] ss:$8 sps:$4 sm:$0xff]  }
  0x73   : > { %694 = vmatpush1.bf16.msra.mxu0 %v2039_v5  ;;  %1946 = vmatpush1.bf16.msra.mxu1 %v2039_v5  ;;  %v2089_v55 = vld [vmem:[#allocation4 + $0x90] ss:$8 sps:$4 sm:$0xff]   ;;  %v2119_v56 = vld [vmem:[#allocation4 + $0x160] ss:$8 sps:$4 sm:$0xff]   ;;  %v2093_v57 = vld [vmem:[#allocation4 + $0xa4] ss:$8 sps:$4 sm:$0xff]  }
  0x74   : > { %695 = vmatprep.subr.bf16.mxu0 %v2281_v1  ;;  %1931 = vmatprep.subr.bf16.mxu1 %v2281_v1  ;;  %v2120_v58 = vld [vmem:[#allocation4 + $0x174] ss:$8 sps:$4 sm:$0xff]   ;;  %v2095_v59 = vld [vmem:[#allocation4 + $0xa0] ss:$8 sps:$4 sm:$0xff]   ;;  %v2122_v60 = vld [vmem:[#allocation4 + $0x170] ss:$8 sps:$4 sm:$0xff]  }
  0x75   : > { %v2099_v61 = vld [vmem:[#allocation4 + $0xb4] ss:$8 sps:$4 sm:$0xff]   ;;  %v2123_v62 = vld [vmem:[#allocation4 + $0x184] ss:$8 sps:$4 sm:$0xff]   ;;  %v2101_v63 = vld [vmem:[#allocation4 + $0xb0] ss:$8 sps:$4 sm:$0xff]  }
  0x76   : > { %v2125_v0 = vld [vmem:[#allocation4 + $0x180] ss:$8 sps:$4 sm:$0xff]  }
  0x77   : > { %696 = vmatpush1.bf16.msra.mxu0 %v2040_v7  ;;  %1947 = vmatpush1.bf16.msra.mxu1 %v2040_v7  ;;  %v2107_v2 = vld [vmem:[#allocation4 + $0xc0] ss:$8 sps:$4 sm:$0xff]  }
  0x78   : > { %697 = vmatprep.subr.bf16.mxu0 %v2281_v1  ;;  %1932 = vmatprep.subr.bf16.mxu1 %v2281_v1  ;;  %v2458_v3 = vld [vmem:[#allocation9] ss:$0 sm:$0xff] }
  0x7b   : > { %698 = vmatpush1.bf16.msra.mxu0 %v2041_v8  ;;  %1948 = vmatpush1.bf16.msra.mxu1 %v2041_v8 }
  0x7c   : > { %699 = vmatprep.subr.bf16.mxu0 %v2281_v1  ;;  %1933 = vmatprep.subr.bf16.mxu1 %v2281_v1 }
  0x7f   : > { %700 = vmatpush1.bf16.msra.mxu0 %v2042_v9  ;;  %1949 = vmatpush1.bf16.msra.mxu1 %v2042_v9 }
  0x80   : > { %701 = vmatprep.subr.bf16.mxu0 %v2281_v1  ;;  %1934 = vmatprep.subr.bf16.mxu1 %v2281_v1 }
  0x83   : > { %702 = vmatpush1.bf16.msra.mxu0 %v2043_v11  ;;  %1950 = vmatpush1.bf16.msra.mxu1 %v2043_v11 }
  0x84   : > { %703 = vmatprep.subr.bf16.mxu0 %v2281_v1  ;;  %1935 = vmatprep.subr.bf16.mxu1 %v2281_v1 }
  0x87   : > { %704 = vmatpush1.bf16.msra.mxu0 %v2044_v12  ;;  %1951 = vmatpush1.bf16.msra.mxu1 %v2044_v12 }
  0x88   : > { %705 = vmatprep.subr.bf16.mxu0 %v2281_v1  ;;  %1936 = vmatprep.subr.bf16.mxu1 %v2281_v1 }
  0x8b   : > { %706 = vmatpush1.bf16.msra.mxu0 %v2045_v13  ;;  %1952 = vmatpush1.bf16.msra.mxu1 %v2045_v13 }
  0x8c   : > { %707 = vmatprep.subr.bf16.mxu0 %v2281_v1  ;;  %1937 = vmatprep.subr.bf16.mxu1 %v2281_v1 }
  0x8f   : > { %708 = vmatpush1.bf16.msra.mxu0 %v2046_v14  ;;  %1953 = vmatpush1.bf16.msra.mxu1 %v2046_v14 }
  0x90   : > { %709 = vmatprep.subr.bf16.mxu0 %v2281_v1  ;;  %1938 = vmatprep.subr.bf16.mxu1 %v2281_v1 }
  0x93   : > { %710 = vmatpush1.bf16.msra.mxu0 %v2047_v15  ;;  %1954 = vmatpush1.bf16.msra.mxu1 %v2047_v15 }
  0x94   : > { %711 = vmatprep.subr.bf16.mxu0 %v2281_v1  ;;  %1939 = vmatprep.subr.bf16.mxu1 %v2281_v1 }
  0x97   : > { %712 = vmatpush1.bf16.msra.mxu0 %v2048_v16  ;;  %1955 = vmatpush1.bf16.msra.mxu1 %v2048_v16 }
  0x98   : > { %713 = vmatprep.subr.bf16.mxu0 %v2281_v1  ;;  %1940 = vmatprep.subr.bf16.mxu1 %v2281_v1 }
  0x9b   : > { %714 = vmatpush1.bf16.msra.mxu0 %v2049_v17  ;;  %1956 = vmatpush1.bf16.msra.mxu1 %v2049_v17 }
  0x9c   : > { %715 = vmatprep.subr.bf16.mxu0 %v2281_v1  ;;  %1941 = vmatprep.subr.bf16.mxu1 %v2281_v1  ;;  %v2105_v1 = vld [vmem:[#allocation4 + $0xc4] ss:$8 sps:$4 sm:$0xff]  }
  0x9f   : > { %716 = vmatpush1.bf16.msra.mxu0 %v2050_v18  ;;  %1957 = vmatpush1.bf16.msra.mxu1 %v2050_v18 }
  0xa2   : > { %718 = vmatmul.mubr.bf16.vlgmr.msra.gmra.mrb[0].mxu0 %v2051_v19  ;;  %822 = vmatmul.mubr.bf16.vlgmr.msra.gmra.mrb[0].mxu1 %v2072_v20 }
  0xa3   : > { %725 = vmatprep.mubr.bf16.mxu0 %v2054_v21  ;;  %829 = vmatprep.mubr.bf16.mxu1 %v2078_v22 }
  0xaa   : > { %726 = vmatmul.mubr.bf16.gmra.mrb[4].mxu0 %v2056_v23  ;;  %830 = vmatmul.mubr.bf16.gmra.mrb[4].mxu1 %v2080_v24 }
  0xab   : > { %733 = vmatprep.mubr.bf16.mxu0 %v2057_v25  ;;  %837 = vmatprep.mubr.bf16.mxu1 %v2084_v26 }
  0xb2   : > { %734 = vmatmul.mubr.bf16.gmra.mrb[8].mxu0 %v2059_v27  ;;  %838 = vmatmul.mubr.bf16.gmra.mrb[8].mxu1 %v2086_v28 }
  0xb3   : > { %741 = vmatprep.mubr.bf16.mxu0 %v2060_v29  ;;  %845 = vmatprep.mubr.bf16.mxu1 %v2090_v30 }
  0xba   : > { %742 = vmatmul.mubr.bf16.gmra.mrb[12].mxu0 %v2062_v31  ;;  %846 = vmatmul.mubr.bf16.gmra.mrb[12].mxu1 %v2092_v32 }
  0xbb   : > { %749 = vmatprep.mubr.bf16.mxu0 %v2063_v33  ;;  %853 = vmatprep.mubr.bf16.mxu1 %v2096_v34 }
  0xc2   : > { %750 = vmatmul.mubr.bf16.gmra.mrb[16].mxu0 %v2065_v35  ;;  %854 = vmatmul.mubr.bf16.gmra.mrb[16].mxu1 %v2098_v36 }
  0xc3   : > { %757 = vmatprep.mubr.bf16.mxu0 %v2066_v37  ;;  %861 = vmatprep.mubr.bf16.mxu1 %v2102_v38 }
  0xca   : > { %758 = vmatmul.mubr.bf16.gmra.mrb[20].mxu0 %v2068_v39  ;;  %862 = vmatmul.mubr.bf16.gmra.mrb[20].mxu1 %v2104_v40 }
  0xcb   : > { %765 = vmatprep.mubr.bf16.mxu0 %v2069_v41  ;;  %869 = vmatprep.mubr.bf16.mxu1 %v2108_v42 }
  0xd2   : > { %766 = vmatmul.mubr.bf16.gmra.mrb[24].mxu0 %v2071_v43  ;;  %870 = vmatmul.mubr.bf16.gmra.mrb[24].mxu1 %v2110_v44 }
  0xd3   : > { %773 = vmatprep.mubr.bf16.mxu0 %v2075_v45  ;;  %877 = vmatprep.mubr.bf16.mxu1 %v2111_v46 }
  0xda   : > { %774 = vmatmul.mubr.bf16.gmra.mrb[28].mxu0 %v2077_v47  ;;  %878 = vmatmul.mubr.bf16.gmra.mrb[28].mxu1 %v2113_v48 }
  0xdb   : > { %781 = vmatprep.mubr.bf16.mxu0 %v2081_v49  ;;  %885 = vmatprep.mubr.bf16.mxu1 %v2114_v50 }
  0xe2   : > { %782 = vmatmul.mubr.bf16.gmra.mrb[32].mxu0 %v2083_v51  ;;  %886 = vmatmul.mubr.bf16.gmra.mrb[32].mxu1 %v2116_v52 }
  0xe3   : > { %789 = vmatprep.mubr.bf16.mxu0 %v2087_v53  ;;  %893 = vmatprep.mubr.bf16.mxu1 %v2117_v54 }
  0xea   : > { %790 = vmatmul.mubr.bf16.gmra.mrb[36].mxu0 %v2089_v55  ;;  %894 = vmatmul.mubr.bf16.gmra.mrb[36].mxu1 %v2119_v56  ;;  %v2282_v55 = vmov 0.0  }
  0xeb   : > { %797 = vmatprep.mubr.bf16.mxu0 %v2093_v57  ;;  %901 = vmatprep.mubr.bf16.mxu1 %v2120_v58  ;;  %251 = vst [vmem:[#allocation3] sm:$0xff] %v2282_v55 }
  0xf2   : > { %798 = vmatmul.mubr.bf16.gmra.mrb[40].mxu0 %v2095_v59  ;;  %902 = vmatmul.mubr.bf16.gmra.mrb[40].mxu1 %v2122_v60 }
  0xf3   : > { %805 = vmatprep.mubr.bf16.mxu0 %v2099_v61  ;;  %909 = vmatprep.mubr.bf16.mxu1 %v2123_v62 }
  0xfa   : > { %806 = vmatmul.mubr.bf16.gmra.mrb[44].mxu0 %v2101_v63  ;;  %910 = vmatmul.mubr.bf16.gmra.mrb[44].mxu1 %v2125_v0 }
  0xfb   : > { %813 = vmatprep.mubr.bf16.mxu0 %v2105_v1 }
 0x102   : > { %814 = vmatmul.mubr.bf16.gmra.mrb[48].mxu0 %v2107_v2 }
 0x175   : > { %v719_v4 = vpop.f32.mrb[0].mxu0  ;;  %v823_v5 = vpop.f32.mrb[0].mxu1 }
 0x176   : > { %v720_v6 = vadd.f32 %v2458_v3, %v719_v4  ;;  %v721_v7 = vpop.f32.mrb[1].mxu0  ;;  %v2462_v8 = vadd.f32 %v2458_v3, %v823_v5  ;;  %v825_v9 = vpop.f32.mrb[1].mxu1 }
 0x177   : > { %v722_v10 = vpop.f32.mrb[2].mxu0  ;;  %v826_v11 = vpop.f32.mrb[2].mxu1 }
 0x178   : > { %920 = vst [vmem:[#allocation2] sm:$0xff] %v720_v6  ;;  %v723_v12 = vadd.f32 %v2458_v3, %v722_v10  ;;  %v724_v13 = vpop.f32.mrb[3].mxu0  ;;  %946 = vst [vmem:[#allocation2 + $0xd0] sm:$0xff] %v2462_v8  ;;  %v2467_v14 = vadd.f32 %v2458_v3, %v826_v11  ;;  %v828_v15 = vpop.f32.mrb[3].mxu1  ;;  %v1029_v16 = vmul.f32 %v720_v6, %v720_v6 }
 0x17a   : > { %921 = vst [vmem:[#allocation2 + $0x8] sm:$0xff] %v723_v12  ;;  %v971_v17 = vadd.f32 %v723_v12, %v720_v6  ;;  %v1030_v18 = vmul.f32 %v723_v12, %v723_v12  ;;  %947 = vst [vmem:[#allocation2 + $0xd8] sm:$0xff] %v2467_v14 }
 0x17c   : > { %v1079_v19 = vadd.f32 %v1030_v18, %v1029_v16 }
 0x17d   : > { %v727_v20 = vpop.f32.mrb[4].mxu0  ;;  %v831_v21 = vpop.f32.mrb[4].mxu1 }
 0x17e   : > { %v728_v22 = vadd.f32 %v2458_v3, %v727_v20  ;;  %v729_v23 = vpop.f32.mrb[5].mxu0  ;;  %v2472_v24 = vadd.f32 %v2458_v3, %v831_v21  ;;  %v833_v25 = vpop.f32.mrb[5].mxu1 }
 0x17f   : > { %v730_v26 = vpop.f32.mrb[6].mxu0  ;;  %v834_v27 = vpop.f32.mrb[6].mxu1 }
 0x180   : > { %922 = vst [vmem:[#allocation2 + $0x10] sm:$0xff] %v728_v22  ;;  %v972_v28 = vadd.f32 %v971_v17, %v728_v22  ;;  %v1031_v29 = vmul.f32 %v728_v22, %v728_v22  ;;  %v731_v30 = vadd.f32 %v2458_v3, %v730_v26  ;;  %v732_v31 = vpop.f32.mrb[7].mxu0  ;;  %948 = vst [vmem:[#allocation2 + $0xe0] sm:$0xff] %v2472_v24  ;;  %v836_v32 = vpop.f32.mrb[7].mxu1 }
 0x181   : > { %v2477_v33 = vadd.f32 %v2458_v3, %v834_v27 }
 0x182   : > { %v1080_v34 = vadd.f32 %v1079_v19, %v1031_v29  ;;  %923 = vst [vmem:[#allocation2 + $0x18] sm:$0xff] %v731_v30  ;;  %v973_v35 = vadd.f32 %v972_v28, %v731_v30  ;;  %v1032_v36 = vmul.f32 %v731_v30, %v731_v30 }
 0x183   : > { %949 = vst [vmem:[#allocation2 + $0xe8] sm:$0xff] %v2477_v33 }
 0x184   : > { %v1081_v37 = vadd.f32 %v1080_v34, %v1032_v36 }
 0x185   : > { %v735_v38 = vpop.f32.mrb[8].mxu0  ;;  %v839_v39 = vpop.f32.mrb[8].mxu1 }
 0x186   : > { %v736_v40 = vadd.f32 %v2458_v3, %v735_v38  ;;  %v737_v41 = vpop.f32.mrb[9].mxu0  ;;  %v2482_v42 = vadd.f32 %v2458_v3, %v839_v39  ;;  %v841_v43 = vpop.f32.mrb[9].mxu1 }
 0x187   : > { %v738_v44 = vpop.f32.mrb[10].mxu0  ;;  %v842_v45 = vpop.f32.mrb[10].mxu1 }
 0x188   : > { %924 = vst [vmem:[#allocation2 + $0x20] sm:$0xff] %v736_v40  ;;  %v974_v46 = vadd.f32 %v973_v35, %v736_v40  ;;  %v1033_v47 = vmul.f32 %v736_v40, %v736_v40  ;;  %v739_v48 = vadd.f32 %v2458_v3, %v738_v44  ;;  %v740_v49 = vpop.f32.mrb[11].mxu0  ;;  %950 = vst [vmem:[#allocation2 + $0xf0] sm:$0xff] %v2482_v42  ;;  %v844_v50 = vpop.f32.mrb[11].mxu1 }
 0x189   : > { %v2487_v51 = vadd.f32 %v2458_v3, %v842_v45 }
 0x18a   : > { %v1082_v52 = vadd.f32 %v1081_v37, %v1033_v47  ;;  %925 = vst [vmem:[#allocation2 + $0x28] sm:$0xff] %v739_v48  ;;  %v975_v53 = vadd.f32 %v974_v46, %v739_v48  ;;  %v1034_v54 = vmul.f32 %v739_v48, %v739_v48 }
 0x18b   : > { %951 = vst [vmem:[#allocation2 + $0xf8] sm:$0xff] %v2487_v51 }
 0x18c   : > { %v1083_v56 = vadd.f32 %v1082_v52, %v1034_v54 }
 0x18d   : > { %v743_v57 = vpop.f32.mrb[12].mxu0  ;;  %v847_v58 = vpop.f32.mrb[12].mxu1 }
 0x18e   : > { %v744_v59 = vadd.f32 %v2458_v3, %v743_v57  ;;  %v745_v60 = vpop.f32.mrb[13].mxu0  ;;  %v2492_v61 = vadd.f32 %v2458_v3, %v847_v58  ;;  %v849_v62 = vpop.f32.mrb[13].mxu1 }
 0x18f   : > { %v746_v63 = vpop.f32.mrb[14].mxu0  ;;  %v850_v0 = vpop.f32.mrb[14].mxu1 }
 0x190   : > { %926 = vst [vmem:[#allocation2 + $0x30] sm:$0xff] %v744_v59  ;;  %v976_v1 = vadd.f32 %v975_v53, %v744_v59  ;;  %v1035_v2 = vmul.f32 %v744_v59, %v744_v59  ;;  %v747_v4 = vadd.f32 %v2458_v3, %v746_v63  ;;  %v748_v5 = vpop.f32.mrb[15].mxu0  ;;  %952 = vst [vmem:[#allocation2 + $0x100] sm:$0xff] %v2492_v61  ;;  %v852_v6 = vpop.f32.mrb[15].mxu1 }
 0x191   : > { %v2497_v7 = vadd.f32 %v2458_v3, %v850_v0 }
 0x192   : > { %v1084_v9 = vadd.f32 %v1083_v56, %v1035_v2  ;;  %927 = vst [vmem:[#allocation2 + $0x38] sm:$0xff] %v747_v4  ;;  %v977_v10 = vadd.f32 %v976_v1, %v747_v4  ;;  %v1036_v11 = vmul.f32 %v747_v4, %v747_v4 }
 0x193   : > { %953 = vst [vmem:[#allocation2 + $0x108] sm:$0xff] %v2497_v7 }
 0x194   : > { %v1085_v12 = vadd.f32 %v1084_v9, %v1036_v11 }
 0x195   : > { %v751_v13 = vpop.f32.mrb[16].mxu0  ;;  %v855_v15 = vpop.f32.mrb[16].mxu1 }
 0x196   : > { %v752_v16 = vadd.f32 %v2458_v3, %v751_v13  ;;  %v753_v17 = vpop.f32.mrb[17].mxu0  ;;  %v2502_v18 = vadd.f32 %v2458_v3, %v855_v15  ;;  %v857_v19 = vpop.f32.mrb[17].mxu1 }
 0x197   : > { %v754_v20 = vpop.f32.mrb[18].mxu0  ;;  %v858_v21 = vpop.f32.mrb[18].mxu1 }
 0x198   : > { %928 = vst [vmem:[#allocation2 + $0x40] sm:$0xff] %v752_v16  ;;  %v978_v22 = vadd.f32 %v977_v10, %v752_v16  ;;  %v1037_v23 = vmul.f32 %v752_v16, %v752_v16  ;;  %v755_v25 = vadd.f32 %v2458_v3, %v754_v20  ;;  %v756_v26 = vpop.f32.mrb[19].mxu0  ;;  %954 = vst [vmem:[#allocation2 + $0x110] sm:$0xff] %v2502_v18  ;;  %v860_v27 = vpop.f32.mrb[19].mxu1 }
 0x199   : > { %v2507_v28 = vadd.f32 %v2458_v3, %v858_v21 }
 0x19a   : > { %v1086_v29 = vadd.f32 %v1085_v12, %v1037_v23  ;;  %929 = vst [vmem:[#allocation2 + $0x48] sm:$0xff] %v755_v25  ;;  %v979_v30 = vadd.f32 %v978_v22, %v755_v25  ;;  %v1038_v31 = vmul.f32 %v755_v25, %v755_v25 }
 0x19b   : > { %955 = vst [vmem:[#allocation2 + $0x118] sm:$0xff] %v2507_v28 }
 0x19c   : > { %v1087_v32 = vadd.f32 %v1086_v29, %v1038_v31 }
 0x19d   : > { %v759_v34 = vpop.f32.mrb[20].mxu0  ;;  %v863_v35 = vpop.f32.mrb[20].mxu1 }
 0x19e   : > { %v760_v36 = vadd.f32 %v2458_v3, %v759_v34  ;;  %v761_v37 = vpop.f32.mrb[21].mxu0  ;;  %v2512_v38 = vadd.f32 %v2458_v3, %v863_v35  ;;  %v865_v39 = vpop.f32.mrb[21].mxu1 }
 0x19f   : > { %v762_v40 = vpop.f32.mrb[22].mxu0  ;;  %v866_v41 = vpop.f32.mrb[22].mxu1 }
 0x1a0   : > { %930 = vst [vmem:[#allocation2 + $0x50] sm:$0xff] %v760_v36  ;;  %v980_v43 = vadd.f32 %v979_v30, %v760_v36  ;;  %v1039_v44 = vmul.f32 %v760_v36, %v760_v36  ;;  %v763_v45 = vadd.f32 %v2458_v3, %v762_v40  ;;  %v764_v46 = vpop.f32.mrb[23].mxu0  ;;  %956 = vst [vmem:[#allocation2 + $0x120] sm:$0xff] %v2512_v38  ;;  %v868_v47 = vpop.f32.mrb[23].mxu1 }
 0x1a1   : > { %v2517_v48 = vadd.f32 %v2458_v3, %v866_v41 }
 0x1a2   : > { %v1088_v49 = vadd.f32 %v1087_v32, %v1039_v44  ;;  %931 = vst [vmem:[#allocation2 + $0x58] sm:$0xff] %v763_v45  ;;  %v981_v50 = vadd.f32 %v980_v43, %v763_v45  ;;  %v1040_v52 = vmul.f32 %v763_v45, %v763_v45 }
 0x1a3   : > { %957 = vst [vmem:[#allocation2 + $0x128] sm:$0xff] %v2517_v48 }
 0x1a4   : > { %v1089_v53 = vadd.f32 %v1088_v49, %v1040_v52 }
 0x1a5   : > { %v767_v54 = vpop.f32.mrb[24].mxu0  ;;  %v871_v55 = vpop.f32.mrb[24].mxu1 }
 0x1a6   : > { %v768_v56 = vadd.f32 %v2458_v3, %v767_v54  ;;  %v769_v57 = vpop.f32.mrb[25].mxu0  ;;  %v2522_v58 = vadd.f32 %v2458_v3, %v871_v55  ;;  %v873_v59 = vpop.f32.mrb[25].mxu1 }
 0x1a7   : > { %v770_v60 = vpop.f32.mrb[26].mxu0  ;;  %v874_v62 = vpop.f32.mrb[26].mxu1 }
 0x1a8   : > { %932 = vst [vmem:[#allocation2 + $0x60] sm:$0xff] %v768_v56  ;;  %v982_v63 = vadd.f32 %v981_v50, %v768_v56  ;;  %v1041_v0 = vmul.f32 %v768_v56, %v768_v56  ;;  %v771_v1 = vadd.f32 %v2458_v3, %v770_v60  ;;  %v772_v2 = vpop.f32.mrb[27].mxu0  ;;  %958 = vst [vmem:[#allocation2 + $0x130] sm:$0xff] %v2522_v58  ;;  %v876_v4 = vpop.f32.mrb[27].mxu1 }
 0x1a9   : > { %v2527_v5 = vadd.f32 %v2458_v3, %v874_v62 }
 0x1aa   : > { %v1090_v6 = vadd.f32 %v1089_v53, %v1041_v0  ;;  %933 = vst [vmem:[#allocation2 + $0x68] sm:$0xff] %v771_v1  ;;  %v983_v9 = vadd.f32 %v982_v63, %v771_v1  ;;  %v1042_v10 = vmul.f32 %v771_v1, %v771_v1 }
 0x1ab   : > { %959 = vst [vmem:[#allocation2 + $0x138] sm:$0xff] %v2527_v5 }
 0x1ac   : > { %v1091_v11 = vadd.f32 %v1090_v6, %v1042_v10 }
 0x1ad   : > { %v775_v12 = vpop.f32.mrb[28].mxu0  ;;  %v879_v13 = vpop.f32.mrb[28].mxu1 }
 0x1ae   : > { %v776_v15 = vadd.f32 %v2458_v3, %v775_v12  ;;  %v777_v16 = vpop.f32.mrb[29].mxu0  ;;  %v2532_v17 = vadd.f32 %v2458_v3, %v879_v13  ;;  %v881_v19 = vpop.f32.mrb[29].mxu1 }
 0x1af   : > { %v778_v20 = vpop.f32.mrb[30].mxu0  ;;  %v882_v21 = vpop.f32.mrb[30].mxu1 }
 0x1b0   : > { %934 = vst [vmem:[#allocation2 + $0x70] sm:$0xff] %v776_v15  ;;  %v984_v22 = vadd.f32 %v983_v9, %v776_v15  ;;  %v1043_v23 = vmul.f32 %v776_v15, %v776_v15  ;;  %v779_v25 = vadd.f32 %v2458_v3, %v778_v20  ;;  %v780_v26 = vpop.f32.mrb[31].mxu0  ;;  %960 = vst [vmem:[#allocation2 + $0x140] sm:$0xff] %v2532_v17  ;;  %v884_v27 = vpop.f32.mrb[31].mxu1 }
 0x1b1   : > { %v2537_v29 = vadd.f32 %v2458_v3, %v882_v21 }
 0x1b2   : > { %v1092_v30 = vadd.f32 %v1091_v11, %v1043_v23  ;;  %935 = vst [vmem:[#allocation2 + $0x78] sm:$0xff] %v779_v25  ;;  %v985_v31 = vadd.f32 %v984_v22, %v779_v25  ;;  %v1044_v32 = vmul.f32 %v779_v25, %v779_v25 }
 0x1b3   : > { %961 = vst [vmem:[#allocation2 + $0x148] sm:$0xff] %v2537_v29 }
 0x1b4   : > { %v1093_v34 = vadd.f32 %v1092_v30, %v1044_v32 }
 0x1b5   : > { %v783_v35 = vpop.f32.mrb[32].mxu0  ;;  %v887_v36 = vpop.f32.mrb[32].mxu1 }
 0x1b6   : > { %v784_v37 = vadd.f32 %v2458_v3, %v783_v35  ;;  %v785_v39 = vpop.f32.mrb[33].mxu0  ;;  %v2542_v40 = vadd.f32 %v2458_v3, %v887_v36  ;;  %v889_v41 = vpop.f32.mrb[33].mxu1 }
 0x1b7   : > { %v786_v43 = vpop.f32.mrb[34].mxu0  ;;  %v890_v44 = vpop.f32.mrb[34].mxu1 }
 0x1b8   : > { %936 = vst [vmem:[#allocation2 + $0x80] sm:$0xff] %v784_v37  ;;  %v986_v45 = vadd.f32 %v985_v31, %v784_v37  ;;  %v1045_v46 = vmul.f32 %v784_v37, %v784_v37  ;;  %v787_v47 = vadd.f32 %v2458_v3, %v786_v43  ;;  %v788_v49 = vpop.f32.mrb[35].mxu0  ;;  %962 = vst [vmem:[#allocation2 + $0x150] sm:$0xff] %v2542_v40  ;;  %v892_v50 = vpop.f32.mrb[35].mxu1 }
 0x1b9   : > { %v2547_v52 = vadd.f32 %v2458_v3, %v890_v44 }
 0x1ba   : > { %v1094_v53 = vadd.f32 %v1093_v34, %v1045_v46  ;;  %937 = vst [vmem:[#allocation2 + $0x88] sm:$0xff] %v787_v47  ;;  %v987_v54 = vadd.f32 %v986_v45, %v787_v47  ;;  %v1046_v55 = vmul.f32 %v787_v47, %v787_v47 }
 0x1bb   : > { %963 = vst [vmem:[#allocation2 + $0x158] sm:$0xff] %v2547_v52 }
 0x1bc   : > { %v1095_v56 = vadd.f32 %v1094_v53, %v1046_v55 }
 0x1bd   : > { %v791_v57 = vpop.f32.mrb[36].mxu0  ;;  %v895_v59 = vpop.f32.mrb[36].mxu1 }
 0x1be   : > { %v792_v60 = vadd.f32 %v2458_v3, %v791_v57  ;;  %v793_v62 = vpop.f32.mrb[37].mxu0  ;;  %v2552_v63 = vadd.f32 %v2458_v3, %v895_v59  ;;  %v897_v0 = vpop.f32.mrb[37].mxu1 }
 0x1bf   : > { %v794_v1 = vpop.f32.mrb[38].mxu0  ;;  %v898_v2 = vpop.f32.mrb[38].mxu1 }
 0x1c0   : > { %938 = vst [vmem:[#allocation2 + $0x90] sm:$0xff] %v792_v60  ;;  %v988_v4 = vadd.f32 %v987_v54, %v792_v60  ;;  %v1047_v6 = vmul.f32 %v792_v60, %v792_v60  ;;  %v795_v9 = vadd.f32 %v2458_v3, %v794_v1  ;;  %v796_v10 = vpop.f32.mrb[39].mxu0  ;;  %964 = vst [vmem:[#allocation2 + $0x160] sm:$0xff] %v2552_v63  ;;  %v900_v11 = vpop.f32.mrb[39].mxu1 }
 0x1c1   : > { %v2557_v12 = vadd.f32 %v2458_v3, %v898_v2 }
 0x1c2   : > { %v1096_v13 = vadd.f32 %v1095_v56, %v1047_v6  ;;  %939 = vst [vmem:[#allocation2 + $0x98] sm:$0xff] %v795_v9  ;;  %v989_v15 = vadd.f32 %v988_v4, %v795_v9  ;;  %v1048_v16 = vmul.f32 %v795_v9, %v795_v9 }
 0x1c3   : > { %965 = vst [vmem:[#allocation2 + $0x168] sm:$0xff] %v2557_v12 }
 0x1c4   : > { %v1097_v19 = vadd.f32 %v1096_v13, %v1048_v16 }
 0x1c5   : > { %v799_v20 = vpop.f32.mrb[40].mxu0  ;;  %v903_v21 = vpop.f32.mrb[40].mxu1 }
 0x1c6   : > { %v800_v22 = vadd.f32 %v2458_v3, %v799_v20  ;;  %v801_v23 = vpop.f32.mrb[41].mxu0  ;;  %v2562_v25 = vadd.f32 %v2458_v3, %v903_v21  ;;  %v905_v26 = vpop.f32.mrb[41].mxu1 }
 0x1c7   : > { %v802_v27 = vpop.f32.mrb[42].mxu0  ;;  %v906_v30 = vpop.f32.mrb[42].mxu1  ;;  %v1055_v26 = vmul.f32 %v2462_v8, %v2462_v8 }
 0x1c8   : > { %940 = vst [vmem:[#allocation2 + $0xa0] sm:$0xff] %v800_v22  ;;  %v990_v31 = vadd.f32 %v989_v15, %v800_v22  ;;  %v1049_v32 = vmul.f32 %v800_v22, %v800_v22  ;;  %v803_v34 = vadd.f32 %v2458_v3, %v802_v27  ;;  %v804_v35 = vpop.f32.mrb[43].mxu0  ;;  %966 = vst [vmem:[#allocation2 + $0x170] sm:$0xff] %v2562_v25  ;;  %v908_v36 = vpop.f32.mrb[43].mxu1 }
 0x1c9   : > { %v2567_v37 = vadd.f32 %v2458_v3, %v906_v30 }
 0x1ca   : > { %v1098_v39 = vadd.f32 %v1097_v19, %v1049_v32  ;;  %941 = vst [vmem:[#allocation2 + $0xa8] sm:$0xff] %v803_v34  ;;  %v991_v41 = vadd.f32 %v990_v31, %v803_v34  ;;  %v1050_v43 = vmul.f32 %v803_v34, %v803_v34  ;;  %v1056_v31 = vmul.f32 %v2467_v14, %v2467_v14 }
 0x1cb   : > { %967 = vst [vmem:[#allocation2 + $0x178] sm:$0xff] %v2567_v37 }
 0x1cc   : > { %v1099_v44 = vadd.f32 %v1098_v39, %v1050_v43  ;;  %v1058_v39 = vmul.f32 %v2477_v33, %v2477_v33 }
 0x1cd   : > { %v807_v45 = vpop.f32.mrb[44].mxu0  ;;  %v911_v46 = vpop.f32.mrb[44].mxu1 }
 0x1ce   : > { %v808_v47 = vadd.f32 %v2458_v3, %v807_v45  ;;  %v809_v49 = vpop.f32.mrb[45].mxu0  ;;  %v2572_v50 = vadd.f32 %v2458_v3, %v911_v46  ;;  %v913_v53 = vpop.f32.mrb[45].mxu1 }
 0x1cf   : > { %v810_v54 = vpop.f32.mrb[46].mxu0  ;;  %v914_v55 = vpop.f32.mrb[46].mxu1 }
 0x1d0   : > { %942 = vst [vmem:[#allocation2 + $0xb0] sm:$0xff] %v808_v47  ;;  %v992_v56 = vadd.f32 %v991_v41, %v808_v47  ;;  %v1051_v57 = vmul.f32 %v808_v47, %v808_v47  ;;  %v811_v59 = vadd.f32 %v2458_v3, %v810_v54  ;;  %v812_v60 = vpop.f32.mrb[47].mxu0  ;;  %968 = vst [vmem:[#allocation2 + $0x180] sm:$0xff] %v2572_v50  ;;  %v916_v62 = vpop.f32.mrb[47].mxu1 }
 0x1d1   : > { %v2577_v0 = vadd.f32 %v2458_v3, %v914_v55 }
 0x1d2   : > { %v1100_v1 = vadd.f32 %v1099_v44, %v1051_v57  ;;  %943 = vst [vmem:[#allocation2 + $0xb8] sm:$0xff] %v811_v59  ;;  %v993_v2 = vadd.f32 %v992_v56, %v811_v59  ;;  %v1052_v4 = vmul.f32 %v811_v59, %v811_v59 }
 0x1d3   : > { %969 = vst [vmem:[#allocation2 + $0x188] sm:$0xff] %v2577_v0 }
 0x1d4   : > { %v1101_v6 = vadd.f32 %v1100_v1, %v1052_v4 }
 0x1d5   : > { %v815_v9 = vpop.f32.mrb[48].mxu0 }
 0x1d6   : > { %v816_v10 = vadd.f32 %v2458_v3, %v815_v9  ;;  %v817_v11 = vpop.f32.mrb[49].mxu0 }
 0x1d7   : > { %v818_v13 = vpop.f32.mrb[50].mxu0  ;;  %v1068_v11 = vmul.f32 %v2527_v5, %v2527_v5 }
 0x1d8   : > { %944 = vst [vmem:[#allocation2 + $0xc0] sm:$0xff] %v816_v10  ;;  %v994_v15 = vadd.f32 %v993_v2, %v816_v10  ;;  %v1053_v16 = vmul.f32 %v816_v10, %v816_v10  ;;  %v819_v19 = vadd.f32 %v2458_v3, %v818_v13  ;;  %v820_v20 = vpop.f32.mrb[51].mxu0  ;;  %v1057_v3 = vmul.f32 %v2472_v24, %v2472_v24 }
 0x1da   : > { %v1102_v21 = vadd.f32 %v1101_v6, %v1053_v16  ;;  %945 = vst [vmem:[#allocation2 + $0xc8] sm:$0xff] %v819_v19  ;;  %v995_v22 = vadd.f32 %v994_v15, %v819_v19  ;;  %v1054_v23 = vmul.f32 %v819_v19, %v819_v19  ;;  %v1067_v6 = vmul.f32 %v2522_v58, %v2522_v58 }
 0x1db   : > { %v1069_v15 = vmul.f32 %v2532_v17, %v2532_v17  ;;  %v1070_v19 = vmul.f32 %v2537_v29, %v2537_v29 }
 0x1dc   : > { %v996_v27 = vadd.f32 %v995_v22, %v2462_v8  ;;  %v1103_v30 = vadd.f32 %v1102_v21, %v1054_v23  ;;  %v1059_v8 = vmul.f32 %v2482_v42, %v2482_v42  ;;  %v1071_v21 = vmul.f32 %v2542_v40, %v2542_v40 }
 0x1dd   : > { %v1072_v23 = vmul.f32 %v2547_v52, %v2547_v52 }
 0x1de   : > { %v997_v32 = vadd.f32 %v996_v27, %v2467_v14  ;;  %v1104_v34 = vadd.f32 %v1103_v30, %v1055_v26  ;;  %v1060_v14 = vmul.f32 %v2487_v51, %v2487_v51  ;;  %v1073_v27 = vmul.f32 %v2552_v63, %v2552_v63 }
 0x1e0   : > { %v998_v35 = vadd.f32 %v997_v32, %v2472_v24  ;;  %v1105_v36 = vadd.f32 %v1104_v34, %v1056_v31  ;;  %v1061_v24 = vmul.f32 %v2492_v61, %v2492_v61  ;;  %v1074_v31 = vmul.f32 %v2557_v12, %v2557_v12 }
 0x1e1   : > { %v1075_v34 = vmul.f32 %v2562_v25, %v2562_v25 }
 0x1e2   : > { %v999_v41 = vadd.f32 %v998_v35, %v2477_v33  ;;  %v1106_v43 = vadd.f32 %v1105_v36, %v1057_v3  ;;  %v1062_v33 = vmul.f32 %v2497_v7, %v2497_v7  ;;  %v1076_v35 = vmul.f32 %v2567_v37, %v2567_v37 }
 0x1e4   : > { %v1000_v44 = vadd.f32 %v999_v41, %v2482_v42  ;;  %v1107_v45 = vadd.f32 %v1106_v43, %v1058_v39  ;;  %v1063_v42 = vmul.f32 %v2502_v18, %v2502_v18  ;;  %v1078_v43 = vmul.f32 %v2577_v0, %v2577_v0 }
 0x1e6   : > { %v1001_v46 = vadd.f32 %v1000_v44, %v2487_v51  ;;  %v1108_v47 = vadd.f32 %v1107_v45, %v1059_v8  ;;  %v1064_v51 = vmul.f32 %v2507_v28, %v2507_v28 }
 0x1e8   : > { %v1109_v49 = vadd.f32 %v1108_v47, %v1060_v14  ;;  %v1002_v53 = vadd.f32 %v1001_v46, %v2492_v61  ;;  %v1065_v61 = vmul.f32 %v2512_v38, %v2512_v38 }
 0x1ea   : > { %v1003_v54 = vadd.f32 %v1002_v53, %v2497_v7  ;;  %v1110_v55 = vadd.f32 %v1109_v49, %v1061_v24  ;;  %v1066_v7 = vmul.f32 %v2517_v48, %v2517_v48  ;;  %v970_v53 = vld [vmem:[#allocation3] sm:$0x1] }
 0x1ec   : > { %v1004_v56 = vadd.f32 %v1003_v54, %v2502_v18  ;;  %v1111_v57 = vadd.f32 %v1110_v55, %v1062_v33 }
 0x1ee   : > { %v1005_v59 = vadd.f32 %v1004_v56, %v2507_v28  ;;  %v1112_v60 = vadd.f32 %v1111_v57, %v1063_v42 }
 0x1f0   : > { %v1006_v62 = vadd.f32 %v1005_v59, %v2512_v38  ;;  %v1113_v1 = vadd.f32 %v1112_v60, %v1064_v51 }
 0x1f2   : > { %v1007_v2 = vadd.f32 %v1006_v62, %v2517_v48  ;;  %v1114_v4 = vadd.f32 %v1113_v1, %v1065_v61  ;;  %v1145_v1 = vld [vmem:[#allocation9 + $0x1] sm:$0x1] }
 0x1f4   : > { %v1008_v18 = vadd.f32 %v1007_v2, %v2522_v58  ;;  %v1115_v9 = vadd.f32 %v1114_v4, %v1066_v7  ;;  %v1150_v4 = vld [vmem:[#allocation9 + $0x2] sm:$0x1] }
 0x1f6   : > { %v1116_v28 = vadd.f32 %v1115_v9, %v1067_v6  ;;  %v1009_v10 = vadd.f32 %v1008_v18, %v2527_v5 }
 0x1f8   : > { %v1117_v38 = vadd.f32 %v1116_v28, %v1068_v11  ;;  %v1010_v13 = vadd.f32 %v1009_v10, %v2532_v17 }
 0x1fa   : > { %v1118_v48 = vadd.f32 %v1117_v38, %v1069_v15  ;;  %v1011_v16 = vadd.f32 %v1010_v13, %v2537_v29 }
 0x1fc   : > { %v1119_v58 = vadd.f32 %v1118_v48, %v1070_v19  ;;  %v1012_v20 = vadd.f32 %v1011_v16, %v2542_v40 }
 0x1fe   : > { %v1120_v22 = vadd.f32 %v1119_v58, %v1071_v21  ;;  %v1013_v5 = vadd.f32 %v1012_v20, %v2547_v52 }
 0x200   : > { %v1121_v26 = vadd.f32 %v1120_v22, %v1072_v23  ;;  %v1014_v17 = vadd.f32 %v1013_v5, %v2552_v63  ;;  %v1077_v63 = vmul.f32 %v2572_v50, %v2572_v50 }
 0x202   : > { %v1122_v30 = vadd.f32 %v1121_v26, %v1073_v27  ;;  %v1015_v29 = vadd.f32 %v1014_v17, %v2557_v12 }
 0x204   : > { %v1123_v32 = vadd.f32 %v1122_v30, %v1074_v31  ;;  %v1016_v40 = vadd.f32 %v1015_v29, %v2562_v25 }
 0x206   : > { %v1124_v3 = vadd.f32 %v1123_v32, %v1075_v34  ;;  %v1017_v52 = vadd.f32 %v1016_v40, %v2567_v37 }
 0x208   : > { %v1125_v36 = vadd.f32 %v1124_v3, %v1076_v35  ;;  %v1018_v39 = vadd.f32 %v1017_v52, %v2572_v50  ;;  %v1028_v50 = vld [vmem:[#allocation3 + $0x1] sm:$0x1] }
 0x20a   : > { %v1126_v41 = vadd.f32 %v1125_v36, %v1077_v63  ;;  %v1019_v12 = vadd.f32 %v1018_v39, %v2577_v0 }
 0x20c   : > { %v1020_v8 = vrot.slane %v1019_v12, 4  ;;  %v1127_v25 = vadd.f32 %v1126_v41, %v1078_v43 }
 0x20e   : > { %v1021_v44 = vadd.f32 %v1020_v8, %v1019_v12  ;;  %v1128_v45 = vrot.slane %v1127_v25, 4 }
 0x210   : > { %v1022_v14 = vrot.slane %v1021_v44, 2  ;;  %v1129_v46 = vadd.f32 %v1128_v45, %v1127_v25 }
 0x212   : > { %v1023_v47 = vadd.f32 %v1022_v14, %v1021_v44  ;;  %v1130_v37 = vrot.slane %v1129_v46, 2 }
 0x214   : > { %v1024_v24 = vrot.slane %v1023_v47, 1  ;;  %v1131_v49 = vadd.f32 %v1130_v37, %v1129_v46 }
 0x216   : > { %v1025_v33 = vadd.f32 %v1024_v24, %v1023_v47  ;;  %v1132_v54 = vrot.slane %v1131_v49, 1 }
 0x218   : > { %v1026_v55 = vadd.f32 %v1025_v33, %v970_v53  ;;  %v1133_v42 = vadd.f32 %v1132_v54, %v1131_v49 }
 0x21a   : > { %1027 = vst [vmem:[#allocation3] sm:$0x1] %v1026_v55  ;;  %v1134_v56 = vadd.f32 %v1133_v42, %v1028_v50 }
 0x21c   : > { %1135 = vst [vmem:[#allocation3 + $0x1] sm:$0x1] %v1134_v56 }
 0x221   : > { %v1139_v0 = vld [vmem:[#allocation3] sm:$0x1] }
 0x222   : > { %v1140_v57 = vmul.f32 0.0025, %v1139_v0 }
 0x223   : > { %v1141_v51 = vld [vmem:[#allocation3 + $0x1] sm:$0x1] }
 0x224   : > { %v1142_v59 = vmul.f32 0.0025, %v1141_v51  ;;  %v1143_v60 = vmul.f32 %v1140_v57, %v1140_v57 }
 0x226   : > { %v1144_v61 = vsub.f32 %v1142_v59, %v1143_v60 }
 0x228   : > { %v1146_v62 = vadd.f32 1e-05, %v1144_v61 }
 0x22a   : > { %2126 = vrsqrt.f32 %v1146_v62 }
 0x234   : > { %v2127_v7 = vpop.eup %2126 }
 0x235   : > { %v1148_v2 = vmul.f32 %v2127_v7, %v1145_v1 }
 0x237   : > { %1149 = vst [vmem:[#allocation3 + $0x2] sm:$0x1] %v1148_v2  ;;  %v1151_v18 = vmul.f32 %v1148_v2, %v1140_v57 }
 0x239   : > { %v1152_v6 = vsub.f32 %v1150_v4, %v1151_v18 }
 0x23b   : > { %1153 = vst [vmem:[#allocation3 + $0x3] sm:$0x1] %v1152_v6 }
 0x23c PF: > { %p1819_p6 = scmp.ne.s32.totalorder %s2264_s12, 1 }
 0x23d   : > { %v1160_v9 = vld [vmem:[#allocation2] sm:$0xff] (!%p1819_p6)  ;;  %v1161_v38 = vld [vmem:[#allocation2 + $0x8] sm:$0xff] (!%p1819_p6)  ;;  %v1162_v13 = vld [vmem:[#allocation2 + $0x10] sm:$0xff] (!%p1819_p6)  ;;  %vm1570_vm0 = vcmask (!%p1819_p6), 257024  }
 0x23e   : > { %1157 = sbr.rel (%p1819_p6) target bundleno = 636 (0x27c), region = 60  ;;  %v2655_v28 = vld [vmem:[#allocation3 + $0x2] ss:$0 sm:$0xff] (!%p1819_p6)  ;;  %v1163_v15 = vld [vmem:[#allocation2 + $0x18] sm:$0xff] (!%p1819_p6)  ;;  %v1164_v58 = vld [vmem:[#allocation2 + $0x20] sm:$0xff] (!%p1819_p6) }
 0x23f   : > { %v1215_v11 = vmul.f32 (!%p1819_p6), %v2655_v28, %v1160_v9  ;;  %v1216_v48 = vmul.f32 (!%p1819_p6), %v2655_v28, %v1161_v38  ;;  %v1217_v16 = vmul.f32 (!%p1819_p6), %v2655_v28, %v1162_v13  ;;  %v1218_v19 = vmul.f32 (!%p1819_p6), %v2655_v28, %v1163_v15  ;;  %v1165_v20 = vld [vmem:[#allocation2 + $0x28] sm:$0xff] (!%p1819_p6)  ;;  %v1166_v21 = vld [vmem:[#allocation2 + $0x30] sm:$0xff] (!%p1819_p6)  ;;  %v1167_v17 = vld [vmem:[#allocation2 + $0x38] sm:$0xff] (!%p1819_p6) }
 0x240   : > { %v1219_v5 = vmul.f32 (!%p1819_p6), %v2655_v28, %v1164_v58  ;;  %v1220_v23 = vmul.f32 (!%p1819_p6), %v2655_v28, %v1165_v20  ;;  %v1221_v26 = vmul.f32 (!%p1819_p6), %v2655_v28, %v1166_v21  ;;  %v1222_v31 = vmul.f32 (!%p1819_p6), %v2655_v28, %v1167_v17  ;;  %v1168_v39 = vld [vmem:[#allocation2 + $0x40] sm:$0xff] (!%p1819_p6)  ;;  %v1169_v25 = vld [vmem:[#allocation2 + $0x48] sm:$0xff] (!%p1819_p6)  ;;  %v1170_v44 = vld [vmem:[#allocation2 + $0x50] sm:$0xff] (!%p1819_p6) }
 0x241   : > { %v1171_v45 = vld [vmem:[#allocation2 + $0x58] sm:$0xff] (!%p1819_p6)  ;;  %v1172_v24 = vld [vmem:[#allocation2 + $0x60] sm:$0xff] (!%p1819_p6)  ;;  %v1173_v49 = vld [vmem:[#allocation2 + $0x68] sm:$0xff] (!%p1819_p6)  ;;  %v1223_v55 = vmul.f32 (!%p1819_p6), %v2655_v28, %v1168_v39  ;;  %v1224_v0 = vmul.f32 (!%p1819_p6), %v2655_v28, %v1169_v25  ;;  %v1225_v57 = vmul.f32 (!%p1819_p6), %v2655_v28, %v1170_v44 }
 0x242   : > { %v2657_v10 = vld [vmem:[#allocation3 + $0x3] ss:$0 sm:$0xff] (!%p1819_p6)  ;;  %v1175_v42 = vld [vmem:[#allocation2 + $0x78] sm:$0xff] (!%p1819_p6)  ;;  %v1226_v51 = vmul.f32 (!%p1819_p6), %v2655_v28, %v1171_v45  ;;  %v1227_v60 = vmul.f32 (!%p1819_p6), %v2655_v28, %v1172_v24  ;;  %v1228_v61 = vmul.f32 (!%p1819_p6), %v2655_v28, %v1173_v49 }
 0x243   : > { %v1270_v22 = vadd.f32 (!%p1819_p6), %v2657_v10, %v1215_v11  ;;  %v1271_v27 = vadd.f32 (!%p1819_p6), %v2657_v10, %v1216_v48  ;;  %v1272_v30 = vadd.f32 (!%p1819_p6), %v2657_v10, %v1217_v16  ;;  %v1273_v29 = vadd.f32 (!%p1819_p6), %v2657_v10, %v1218_v19  ;;  %v1174_v53 = vld [vmem:[#allocation2 + $0x70] sm:$0xff] (!%p1819_p6)  ;;  %v1176_v16 = vld [vmem:[#allocation2 + $0x80] sm:$0xff] (!%p1819_p6) }
 0x244   : > { %v1274_v40 = vadd.f32 (!%p1819_p6), %v2657_v10, %v1219_v5  ;;  %v1275_v34 = vadd.f32 (!%p1819_p6), %v2657_v10, %v1220_v23  ;;  %v1276_v3 = vadd.f32 (!%p1819_p6), %v2657_v10, %v1221_v26  ;;  %v1277_v36 = vadd.f32 (!%p1819_p6), %v2657_v10, %v1222_v31  ;;  %v1178_v5 = vld [vmem:[#allocation2 + $0x90] sm:$0xff] (!%p1819_p6)  ;;  %v1179_v23 = vld [vmem:[#allocation2 + $0x98] sm:$0xff] (!%p1819_p6)  ;;  %v1181_v31 = vld [vmem:[#allocation2 + $0xa8] sm:$0xff] (!%p1819_p6) }
 0x245   : > { %v1320_v32 = vmax.f32 %v1270_v22, 0.0  ;;  %v1321_v52 = vmax.f32 %v1271_v27, 0.0  ;;  %v1322_v35 = vmax.f32 %v1272_v30, 0.0  ;;  %v1323_v63 = vmax.f32 %v1273_v29, 0.0  ;;  %v1177_v22 = vld [vmem:[#allocation2 + $0x88] sm:$0xff]  ;;  %v1180_v29 = vld [vmem:[#allocation2 + $0xa0] sm:$0xff] }
 0x246   : > { %v1324_v12 = vmax.f32 %v1274_v40, 0.0  ;;  %v1325_v43 = vmax.f32 %v1275_v34, 0.0  ;;  %v1326_v8 = vmax.f32 %v1276_v3, 0.0  ;;  %v1327_v37 = vmax.f32 %v1277_v36, 0.0 }
 0x247   : > { %v1876_v41 = vpack.c.bf16 %v1320_v32, %v1320_v32  ;;  %v1877_v14 = vpack.c.bf16 %v1321_v52, %v1321_v52  ;;  %v1878_v46 = vpack.c.bf16 %v1322_v35, %v1322_v35  ;;  %v1879_v47 = vpack.c.bf16 %v1323_v63, %v1323_v63  ;;  %v1182_v32 = vld [vmem:[#allocation2 + $0xb0] sm:$0xff]  ;;  %v1183_v35 = vld [vmem:[#allocation2 + $0xb8] sm:$0xff] }
 0x248   : > { %v1880_v33 = vpack.c.bf16 %v1324_v12, %v1324_v12  ;;  %v1881_v54 = vpack.c.bf16 %v1325_v43, %v1325_v43  ;;  %v1882_v50 = vpack.c.bf16 %v1326_v8, %v1326_v8  ;;  %v1883_v56 = vpack.c.bf16 %v1327_v37, %v1327_v37 }
 0x249   : > { %1571 = vst.msk [vmem:[#allocation10] sm:$0xf] %vm1570_vm0, %v1876_v41  ;;  %1572 = vst.msk [vmem:[#allocation10 + $0x4] sm:$0xf] %vm1570_vm0, %v1877_v14  ;;  %v1278_v59 = vadd.f32 %v2657_v10, %v1223_v55  ;;  %v1229_v62 = vmul.f32 %v2655_v28, %v1174_v53  ;;  %v1279_v1 = vadd.f32 %v2657_v10, %v1224_v0  ;;  %v1184_v55 = vld [vmem:[#allocation2 + $0xc0] sm:$0xff] }
 0x24a   : > { %1573 = vst.msk [vmem:[#allocation10 + $0x8] sm:$0xf] %vm1570_vm0, %v1878_v46  ;;  %1574 = vst.msk [vmem:[#allocation10 + $0xc] sm:$0xf] %vm1570_vm0, %v1879_v47  ;;  %v1280_v7 = vadd.f32 %v2657_v10, %v1225_v57  ;;  %v1281_v2 = vadd.f32 %v2657_v10, %v1226_v51  ;;  %v1230_v4 = vmul.f32 %v2655_v28, %v1175_v42  ;;  %v1185_v51 = vld [vmem:[#allocation2 + $0xc8] sm:$0xff] }
 0x24b   : > { %1575 = vst.msk [vmem:[#allocation10 + $0x10] sm:$0xf] %vm1570_vm0, %v1880_v33  ;;  %1576 = vst.msk [vmem:[#allocation10 + $0x14] sm:$0xf] %vm1570_vm0, %v1881_v54  ;;  %v1328_v18 = vmax.f32 %v1278_v59, 0.0  ;;  %v1282_v6 = vadd.f32 %v2657_v10, %v1227_v60  ;;  %v1283_v9 = vadd.f32 %v2657_v10, %v1228_v61  ;;  %v1284_v11 = vadd.f32 %v2657_v10, %v1229_v62  ;;  %v1186_v59 = vld [vmem:[#allocation2 + $0xd0] sm:$0xff] }
 0x24c   : > { %1577 = vst.msk [vmem:[#allocation10 + $0x18] sm:$0xf] %vm1570_vm0, %v1882_v50  ;;  %1578 = vst.msk [vmem:[#allocation10 + $0x1c] sm:$0xf] %vm1570_vm0, %v1883_v56  ;;  %v1329_v38 = vmax.f32 %v1279_v1, 0.0  ;;  %v1330_v13 = vmax.f32 %v1280_v7, 0.0  ;;  %v1285_v48 = vadd.f32 %v2657_v10, %v1230_v4  ;;  %v1231_v52 = vmul.f32 %v2655_v28, %v1176_v16 }
 0x24d   : > { %v1331_v15 = vmax.f32 %v1281_v2, 0.0  ;;  %v1884_v19 = vpack.c.bf16 %v1328_v18, %v1328_v18  ;;  %v1332_v58 = vmax.f32 %v1282_v6, 0.0  ;;  %v1333_v20 = vmax.f32 %v1283_v9, 0.0  ;;  %v1187_v60 = vld [vmem:[#allocation2 + $0xd8] sm:$0xff]  ;;  %v1188_v2 = vld [vmem:[#allocation2 + $0xe0] sm:$0xff]  ;;  %v1189_v4 = vld [vmem:[#allocation2 + $0xe8] sm:$0xff] }
 0x24e   : > { %v1334_v21 = vmax.f32 %v1284_v11, 0.0  ;;  %v1885_v26 = vpack.c.bf16 %v1329_v38, %v1329_v38  ;;  %v1886_v17 = vpack.c.bf16 %v1330_v13, %v1330_v13  ;;  %v1335_v30 = vmax.f32 %v1285_v48, 0.0  ;;  %v1190_v18 = vld [vmem:[#allocation2 + $0xf0] sm:$0xff]  ;;  %v1191_v13 = vld [vmem:[#allocation2 + $0xf8] sm:$0xff] }
 0x24f   : > { %v1887_v27 = vpack.c.bf16 %v1331_v15, %v1331_v15  ;;  %1579 = vst.msk [vmem:[#allocation10 + $0x20] sm:$0xf] %vm1570_vm0, %v1884_v19  ;;  %v1888_v40 = vpack.c.bf16 %v1332_v58, %v1332_v58  ;;  %v1889_v34 = vpack.c.bf16 %v1333_v20, %v1333_v20  ;;  %v1232_v36 = vmul.f32 %v2655_v28, %v1177_v22 }
 0x250   : > { %v1890_v3 = vpack.c.bf16 %v1334_v21, %v1334_v21  ;;  %1580 = vst.msk [vmem:[#allocation10 + $0x24] sm:$0xf] %vm1570_vm0, %v1885_v26  ;;  %1581 = vst.msk [vmem:[#allocation10 + $0x28] sm:$0xf] %vm1570_vm0, %v1886_v17  ;;  %v1891_v63 = vpack.c.bf16 %v1335_v30, %v1335_v30  ;;  %v1233_v39 = vmul.f32 %v2655_v28, %v1178_v5 }
 0x251   : > { %1582 = vst.msk [vmem:[#allocation10 + $0x2c] sm:$0xf] %vm1570_vm0, %v1887_v27  ;;  %v1234_v41 = vmul.f32 %v2655_v28, %v1179_v23  ;;  %1583 = vst.msk [vmem:[#allocation10 + $0x30] sm:$0xf] %vm1570_vm0, %v1888_v40  ;;  %v1286_v12 = vadd.f32 %v2657_v10, %v1231_v52  ;;  %v1235_v43 = vmul.f32 %v2655_v28, %v1180_v29  ;;  %v1192_v52 = vld [vmem:[#allocation2 + $0x100] sm:$0xff] }
 0x252   : > { %1584 = vst.msk [vmem:[#allocation10 + $0x34] sm:$0xf] %vm1570_vm0, %v1889_v34  ;;  %1585 = vst.msk [vmem:[#allocation10 + $0x38] sm:$0xf] %vm1570_vm0, %v1890_v3  ;;  %v1236_v8 = vmul.f32 %v2655_v28, %v1181_v31  ;;  %v1237_v25 = vmul.f32 %v2655_v28, %v1182_v32  ;;  %v1287_v44 = vadd.f32 %v2657_v10, %v1232_v36 }
 0x253   : > { %1586 = vst.msk [vmem:[#allocation10 + $0x3c] sm:$0xf] %vm1570_vm0, %v1891_v63  ;;  %v1288_v45 = vadd.f32 %v2657_v10, %v1233_v39  ;;  %v1289_v14 = vadd.f32 %v2657_v10, %v1234_v41  ;;  %v1238_v46 = vmul.f32 %v2655_v28, %v1183_v35  ;;  %v1336_v47 = vmax.f32 %v1286_v12, 0.0  ;;  %v1193_v41 = vld [vmem:[#allocation2 + $0x108] sm:$0xff]  ;;  %v1194_v12 = vld [vmem:[#allocation2 + $0x110] sm:$0xff] }
 0x254   : > { %v1290_v37 = vadd.f32 %v2657_v10, %v1235_v43  ;;  %v1291_v24 = vadd.f32 %v2657_v10, %v1236_v8  ;;  %v1292_v49 = vadd.f32 %v2657_v10, %v1237_v25  ;;  %v1337_v53 = vmax.f32 %v1287_v44, 0.0  ;;  %v1195_v43 = vld [vmem:[#allocation2 + $0x118] sm:$0xff] }
 0x255   : > { %v1338_v33 = vmax.f32 %v1288_v45, 0.0  ;;  %v1339_v54 = vmax.f32 %v1289_v14, 0.0  ;;  %v1293_v50 = vadd.f32 %v2657_v10, %v1238_v46  ;;  %v1892_v42 = vpack.c.bf16 %v1336_v47, %v1336_v47  ;;  %v1196_v14 = vld [vmem:[#allocation2 + $0x120] sm:$0xff]  ;;  %v1197_v46 = vld [vmem:[#allocation2 + $0x128] sm:$0xff]  ;;  %v1198_v47 = vld [vmem:[#allocation2 + $0x130] sm:$0xff] }
 0x256   : > { %v1340_v56 = vmax.f32 %v1290_v37, 0.0  ;;  %v1341_v0 = vmax.f32 %v1291_v24, 0.0  ;;  %v1342_v57 = vmax.f32 %v1292_v49, 0.0  ;;  %v1893_v61 = vpack.c.bf16 %v1337_v53, %v1337_v53 }
 0x257   : > { %v1894_v62 = vpack.c.bf16 %v1338_v33, %v1338_v33  ;;  %v1895_v1 = vpack.c.bf16 %v1339_v54, %v1339_v54  ;;  %v1343_v7 = vmax.f32 %v1293_v50, 0.0  ;;  %1587 = vst.msk [vmem:[#allocation10 + $0x40] sm:$0xf] %vm1570_vm0, %v1892_v42  ;;  %v1239_v38 = vmul.f32 %v2655_v28, %v1184_v55  ;;  %v1199_v33 = vld [vmem:[#allocation2 + $0x138] sm:$0xff] }
 0x258   : > { %v1896_v6 = vpack.c.bf16 %v1340_v56, %v1340_v56  ;;  %v1897_v9 = vpack.c.bf16 %v1341_v0, %v1341_v0  ;;  %v1898_v11 = vpack.c.bf16 %v1342_v57, %v1342_v57  ;;  %1588 = vst.msk [vmem:[#allocation10 + $0x44] sm:$0xf] %vm1570_vm0, %v1893_v61  ;;  %v1240_v48 = vmul.f32 %v2655_v28, %v1185_v51 }
 0x259   : > { %1589 = vst.msk [vmem:[#allocation10 + $0x48] sm:$0xf] %vm1570_vm0, %v1894_v62  ;;  %1590 = vst.msk [vmem:[#allocation10 + $0x4c] sm:$0xf] %vm1570_vm0, %v1895_v1  ;;  %v1899_v15 = vpack.c.bf16 %v1343_v7, %v1343_v7  ;;  %v1241_v16 = vmul.f32 %v2655_v28, %v1186_v59  ;;  %v1242_v19 = vmul.f32 %v2655_v28, %v1187_v60 }
 0x25a   : > { %1591 = vst.msk [vmem:[#allocation10 + $0x50] sm:$0xf] %vm1570_vm0, %v1896_v6  ;;  %1592 = vst.msk [vmem:[#allocation10 + $0x54] sm:$0xf] %vm1570_vm0, %v1897_v9  ;;  %v1294_v58 = vadd.f32 %v2657_v10, %v1239_v38  ;;  %v1243_v20 = vmul.f32 %v2655_v28, %v1188_v2  ;;  %v1244_v21 = vmul.f32 %v2655_v28, %v1189_v4  ;;  %v1200_v38 = vld [vmem:[#allocation2 + $0x140] sm:$0xff] }
 0x25b   : > { %1593 = vst.msk [vmem:[#allocation10 + $0x58] sm:$0xf] %vm1570_vm0, %v1898_v11  ;;  %v1245_v22 = vmul.f32 %v2655_v28, %v1190_v18  ;;  %1594 = vst.msk [vmem:[#allocation10 + $0x5c] sm:$0xf] %vm1570_vm0, %v1899_v15  ;;  %v1295_v5 = vadd.f32 %v2657_v10, %v1240_v48  ;;  %v1296_v23 = vadd.f32 %v2657_v10, %v1241_v16 }
 0x25c   : > { %v1297_v26 = vadd.f32 %v2657_v10, %v1242_v19  ;;  %v1246_v17 = vmul.f32 %v2655_v28, %v1191_v13  ;;  %v1344_v27 = vmax.f32 %v1294_v58, 0.0  ;;  %v1298_v30 = vadd.f32 %v2657_v10, %v1243_v20  ;;  %v1201_v19 = vld [vmem:[#allocation2 + $0x148] sm:$0xff]  ;;  %v1202_v58 = vld [vmem:[#allocation2 + $0x150] sm:$0xff]  ;;  %v1203_v20 = vld [vmem:[#allocation2 + $0x158] sm:$0xff] }
 0x25d   : > { %v1299_v29 = vadd.f32 %v2657_v10, %v1244_v21  ;;  %v1300_v31 = vadd.f32 %v2657_v10, %v1245_v22  ;;  %v1345_v32 = vmax.f32 %v1295_v5, 0.0  ;;  %v1346_v40 = vmax.f32 %v1296_v23, 0.0 }
 0x25e   : > { %v1347_v34 = vmax.f32 %v1297_v26, 0.0  ;;  %v1301_v3 = vadd.f32 %v2657_v10, %v1246_v17  ;;  %v1900_v35 = vpack.c.bf16 %v1344_v27, %v1344_v27  ;;  %v1348_v63 = vmax.f32 %v1298_v30, 0.0  ;;  %v1204_v26 = vld [vmem:[#allocation2 + $0x160] sm:$0xff]  ;;  %v1205_v17 = vld [vmem:[#allocation2 + $0x168] sm:$0xff]  ;;  %v1206_v27 = vld [vmem:[#allocation2 + $0x170] sm:$0xff] }
 0x25f   : > { %v1349_v36 = vmax.f32 %v1299_v29, 0.0  ;;  %v1350_v39 = vmax.f32 %v1300_v31, 0.0  ;;  %v1901_v8 = vpack.c.bf16 %v1345_v32, %v1345_v32  ;;  %v1902_v25 = vpack.c.bf16 %v1346_v40, %v1346_v40  ;;  %v1207_v40 = vld [vmem:[#allocation2 + $0x178] sm:$0xff] }
 0x260   : > { %v1903_v44 = vpack.c.bf16 %v1347_v34, %v1347_v34  ;;  %v1351_v45 = vmax.f32 %v1301_v3, 0.0  ;;  %1595 = vst.msk [vmem:[#allocation10 + $0x60] sm:$0xf] %vm1570_vm0, %v1900_v35  ;;  %v1904_v37 = vpack.c.bf16 %v1348_v63, %v1348_v63  ;;  %v1247_v53 = vmul.f32 %v2655_v28, %v1192_v52 }
 0x261   : > { %v1905_v24 = vpack.c.bf16 %v1349_v36, %v1349_v36  ;;  %v1906_v49 = vpack.c.bf16 %v1350_v39, %v1350_v39  ;;  %1596 = vst.msk [vmem:[#allocation10 + $0x64] sm:$0xf] %vm1570_vm0, %v1901_v8  ;;  %1597 = vst.msk [vmem:[#allocation10 + $0x68] sm:$0xf] %vm1570_vm0, %v1902_v25  ;;  %v1248_v50 = vmul.f32 %v2655_v28, %v1193_v41 }
 0x262   : > { %1598 = vst.msk [vmem:[#allocation10 + $0x6c] sm:$0xf] %vm1570_vm0, %v1903_v44  ;;  %v1907_v54 = vpack.c.bf16 %v1351_v45, %v1351_v45  ;;  %v1249_v55 = vmul.f32 %v2655_v28, %v1194_v12  ;;  %v1250_v42 = vmul.f32 %v2655_v28, %v1195_v43  ;;  %1599 = vst.msk [vmem:[#allocation10 + $0x70] sm:$0xf] %vm1570_vm0, %v1904_v37 }
 0x263   : > { %1600 = vst.msk [vmem:[#allocation10 + $0x74] sm:$0xf] %vm1570_vm0, %v1905_v24  ;;  %1601 = vst.msk [vmem:[#allocation10 + $0x78] sm:$0xf] %vm1570_vm0, %v1906_v49  ;;  %v1302_v56 = vadd.f32 %v2657_v10, %v1247_v53  ;;  %v1251_v0 = vmul.f32 %v2655_v28, %v1196_v14  ;;  %v1252_v57 = vmul.f32 %v2655_v28, %v1197_v46  ;;  %v1208_v53 = vld [vmem:[#allocation2 + $0x180] sm:$0xff] }
 0x264   : > { %v1253_v51 = vmul.f32 %v2655_v28, %v1198_v47  ;;  %1602 = vst.msk [vmem:[#allocation10 + $0x7c] sm:$0xf] %vm1570_vm0, %v1907_v54  ;;  %v1303_v59 = vadd.f32 %v2657_v10, %v1248_v50  ;;  %v1304_v60 = vadd.f32 %v2657_v10, %v1249_v55  ;;  %v1305_v61 = vadd.f32 %v2657_v10, %v1250_v42  ;;  %v1209_v42 = vld [vmem:[#allocation2 + $0x188] sm:$0xff] }
 0x265   : > { %v1254_v62 = vmul.f32 %v2655_v28, %v1199_v33  ;;  %v1352_v1 = vmax.f32 %v1302_v56, 0.0  ;;  %v1306_v7 = vadd.f32 %v2657_v10, %v1251_v0  ;;  %v1307_v2 = vadd.f32 %v2657_v10, %v1252_v57 }
 0x266   : > { %v1308_v4 = vadd.f32 %v2657_v10, %v1253_v51  ;;  %v1353_v18 = vmax.f32 %v1303_v59, 0.0  ;;  %v1354_v6 = vmax.f32 %v1304_v60, 0.0  ;;  %v1355_v9 = vmax.f32 %v1305_v61, 0.0 }
 0x267   : > { %v1309_v11 = vadd.f32 %v2657_v10, %v1254_v62  ;;  %v1908_v13 = vpack.c.bf16 %v1352_v1, %v1352_v1  ;;  %v1356_v15 = vmax.f32 %v1306_v7, 0.0  ;;  %v1357_v48 = vmax.f32 %v1307_v2, 0.0 }
 0x268   : > { %v1358_v16 = vmax.f32 %v1308_v4, 0.0  ;;  %v1909_v21 = vpack.c.bf16 %v1353_v18, %v1353_v18  ;;  %v1910_v22 = vpack.c.bf16 %v1354_v6, %v1354_v6  ;;  %v1911_v5 = vpack.c.bf16 %v1355_v9, %v1355_v9 }
 0x269   : > { %v1359_v23 = vmax.f32 %v1309_v11, 0.0  ;;  %1603 = vst.msk [vmem:[#allocation10 + $0x80] sm:$0xf] %vm1570_vm0, %v1908_v13  ;;  %v1912_v30 = vpack.c.bf16 %v1356_v15, %v1356_v15  ;;  %v1913_v29 = vpack.c.bf16 %v1357_v48, %v1357_v48  ;;  %v1255_v32 = vmul.f32 %v2655_v28, %v1200_v38 }
 0x26a   : > { %v1914_v31 = vpack.c.bf16 %v1358_v16, %v1358_v16  ;;  %1604 = vst.msk [vmem:[#allocation10 + $0x84] sm:$0xf] %vm1570_vm0, %v1909_v21  ;;  %1605 = vst.msk [vmem:[#allocation10 + $0x88] sm:$0xf] %vm1570_vm0, %v1910_v22  ;;  %v1256_v3 = vmul.f32 %v2655_v28, %v1201_v19  ;;  %v1257_v52 = vmul.f32 %v2655_v28, %v1202_v58 }
 0x26b   : > { %1606 = vst.msk [vmem:[#allocation10 + $0x8c] sm:$0xf] %vm1570_vm0, %v1911_v5  ;;  %v1915_v34 = vpack.c.bf16 %v1359_v23, %v1359_v23  ;;  %v1258_v35 = vmul.f32 %v2655_v28, %v1203_v20  ;;  %1607 = vst.msk [vmem:[#allocation10 + $0x90] sm:$0xf] %vm1570_vm0, %v1912_v30  ;;  %v1310_v63 = vadd.f32 %v2657_v10, %v1255_v32 }
 0x26c   : > { %1608 = vst.msk [vmem:[#allocation10 + $0x94] sm:$0xf] %vm1570_vm0, %v1913_v29  ;;  %1609 = vst.msk [vmem:[#allocation10 + $0x98] sm:$0xf] %vm1570_vm0, %v1914_v31  ;;  %v1259_v36 = vmul.f32 %v2655_v28, %v1204_v26  ;;  %v1260_v39 = vmul.f32 %v2655_v28, %v1205_v17  ;;  %v1261_v41 = vmul.f32 %v2655_v28, %v1206_v27 }
 0x26d   : > { %1610 = vst.msk [vmem:[#allocation10 + $0x9c] sm:$0xf] %vm1570_vm0, %v1915_v34  ;;  %v1311_v12 = vadd.f32 %v2657_v10, %v1256_v3  ;;  %v1312_v43 = vadd.f32 %v2657_v10, %v1257_v52  ;;  %v1313_v8 = vadd.f32 %v2657_v10, %v1258_v35  ;;  %v1262_v25 = vmul.f32 %v2655_v28, %v1207_v40 }
 0x26e   : > { %v1360_v44 = vmax.f32 %v1310_v63, 0.0  ;;  %v1314_v45 = vadd.f32 %v2657_v10, %v1259_v36  ;;  %v1315_v14 = vadd.f32 %v2657_v10, %v1260_v39  ;;  %v1316_v46 = vadd.f32 %v2657_v10, %v1261_v41 }
 0x26f   : > { %v1361_v47 = vmax.f32 %v1311_v12, 0.0  ;;  %v1362_v37 = vmax.f32 %v1312_v43, 0.0  ;;  %v1363_v24 = vmax.f32 %v1313_v8, 0.0  ;;  %v1317_v49 = vadd.f32 %v2657_v10, %v1262_v25 }
 0x270   : > { %v1916_v33 = vpack.c.bf16 %v1360_v44, %v1360_v44  ;;  %v1364_v54 = vmax.f32 %v1314_v45, 0.0  ;;  %v1365_v50 = vmax.f32 %v1315_v14, 0.0  ;;  %v1366_v55 = vmax.f32 %v1316_v46, 0.0 }
 0x271   : > { %v1917_v56 = vpack.c.bf16 %v1361_v47, %v1361_v47  ;;  %v1918_v0 = vpack.c.bf16 %v1362_v37, %v1362_v37  ;;  %v1919_v57 = vpack.c.bf16 %v1363_v24, %v1363_v24  ;;  %v1367_v51 = vmax.f32 %v1317_v49, 0.0 }
 0x272   : > { %1611 = vst.msk [vmem:[#allocation10 + $0xa0] sm:$0xf] %vm1570_vm0, %v1916_v33  ;;  %v1920_v59 = vpack.c.bf16 %v1364_v54, %v1364_v54  ;;  %v1921_v60 = vpack.c.bf16 %v1365_v50, %v1365_v50  ;;  %v1922_v61 = vpack.c.bf16 %v1366_v55, %v1366_v55  ;;  %v1263_v62 = vmul.f32 %v2655_v28, %v1208_v53 }
 0x273   : > { %1612 = vst.msk [vmem:[#allocation10 + $0xa4] sm:$0xf] %vm1570_vm0, %v1917_v56  ;;  %1613 = vst.msk [vmem:[#allocation10 + $0xa8] sm:$0xf] %vm1570_vm0, %v1918_v0  ;;  %v1923_v1 = vpack.c.bf16 %v1367_v51, %v1367_v51  ;;  %v1264_v7 = vmul.f32 %v2655_v28, %v1209_v42 }
 0x274   : > { %1614 = vst.msk [vmem:[#allocation10 + $0xac] sm:$0xf] %vm1570_vm0, %v1919_v57  ;;  %1615 = vst.msk [vmem:[#allocation10 + $0xb0] sm:$0xf] %vm1570_vm0, %v1920_v59  ;;  %v1318_v2 = vadd.f32 %v2657_v10, %v1263_v62 }
 0x275   : > { %1616 = vst.msk [vmem:[#allocation10 + $0xb4] sm:$0xf] %vm1570_vm0, %v1921_v60  ;;  %1617 = vst.msk [vmem:[#allocation10 + $0xb8] sm:$0xf] %vm1570_vm0, %v1922_v61  ;;  %v1319_v4 = vadd.f32 %v2657_v10, %v1264_v7 }
 0x276   : > { %1618 = vst.msk [vmem:[#allocation10 + $0xbc] sm:$0xf] %vm1570_vm0, %v1923_v1  ;;  %v1368_v18 = vmax.f32 %v1318_v2, 0.0 }
 0x277   : > { %v1369_v6 = vmax.f32 %v1319_v4, 0.0 }
 0x278   : > { %v1924_v9 = vpack.c.bf16 %v1368_v18, %v1368_v18 }
 0x279   : > { %v1925_v11 = vpack.c.bf16 %v1369_v6, %v1369_v6 }
 0x27a   : > { %1619 = vst.msk [vmem:[#allocation10 + $0xc0] sm:$0xf] %vm1570_vm0, %v1924_v9 }
 0x27b   : > { %1620 = vst.msk [vmem:[#allocation10 + $0xc4] sm:$0xf] %vm1570_vm0, %v1925_v11 }
 0x27c PF: > { %p2811_p8 = scmp.eq.s32.totalorder %s1740_s15, 1  ;;  %s2283_s18 = smov [#allocation10]  }
 0x27d   : > { %s1636_s19 = sshll.u32 %s2283_s18, 4  ;;  %s1637_s19 = int_to_ptr.vmem [resolvable:$true] %s1636_s19 }
 0x27e   : > { %s2212_s21 = scalar_lea.vmem %s1637_s19, 3200  ;;  %s2218_s28 = scalar_lea.vmem %s1637_s19, 6400 }
 0x27f   : > { %p2213_p11 = scmp.ne.s32.totalorder %s1637_s19, %s2212_s21  ;;  %p2219_p0 = scmp.lt.s32.totalorder %s1637_s19, %s1637_s19 }
 0x280   : > { %p2220_p1 = scmp.lt.s32.totalorder %s2218_s28, %s2212_s21 }
 0x281   : > { %p2214_p12 = pnand %p2213_p11, %p2811_p8 }
 0x282   : > { %p2221_p2 = por %p2220_p1, %p2219_p0 }
 0x283   : > { %p2215_p13 = pneg %p2214_p12 }
 0x285   : > { %p2222_p5 = pnand %p2221_p2, %p2215_p13 }
 0x287   : > { %2225 = shalt.err (!%p2222_p5)
}
 0x288   : > { %s2226_s30 = scalar_lea.hbm %s2849_s3, 3200 }
 0x289   : > { %p2227_p3 = scmp.ne.s32.totalorder %s2849_s3, %s2226_s30  ;;  %p2232_p7 = scmp.lt.u32.totalorder %s2226_s30, %s2849_s3 }
 0x28b   : > { %p2228_p4 = pnand %p2227_p3, %p2811_p8 }
 0x28d   : > { %p2229_p10 = pneg %p2228_p4 }
 0x28f   : > { %p2234_p9 = pnand %p2232_p7, %p2229_p10 }
 0x291   : > { %2237 = shalt.err (!%p2234_p9)
}
 0x292   : > { %s2284_s22 = smov 64   ;;  %s2285_s8 = smov 4  }
 0x293   : > { %1971 = dma.vmem_to_hbm [thread:$0]  (%p2811_p8), %s1637_s19, 3200, %s2849_s3, [#allocation6], %s2284_s22, %s2284_s22, %s2285_s8  }
 0x294 PF: > { %p1998_p6 = scmp.eq.s32.totalorder %s1741_s16, 1  ;;  %p2862_p11 = scmp.ge.s32.totalorder %s2272_s14, 2 }
 0x296   : > { %p1986_p12 = pnand %p1998_p6, %p2862_p11 }
 0x298   : > { %2259 = dma.done.wait (!%p1986_p12), [#allocation6], 3200  }
 0x299   : > { %2261 = vsyncadd (!%p1986_p12), [#allocation6], 4294964096  ;;  %s20_s14 = sadd.s32 1, %s2272_s14   ;;  %s2863_s12 = smov %s2268_s13 }
 0x29a   : > { %p17_p13 = scmp.ge.s32.totalorder %s20_s14, 4   ;;  %s2864_s13 = smov %s2866_s17 }
 0x29c   :  { %19 = sbr.rel (!%p17_p13) target bundleno = 6 (0x6), region = 103 }
 0x2a3   :  { %1657 = vsyncpa [#allocation5], 1 }
 0x2a4   :  { %1659 = vsyncpa [#allocation5 + $0x1], 1 }
 0x2a5   :  { %1660 = vsyncpa [#allocation8], 1 }
 0x2a6   :  { %1661 = vsyncpa [#allocation6], 1 }
 0x2a7   :  { %1663 = vsyncpa [#allocation6 + $0x1], 1 }

// kernel: dqn_forward.5
= control target key start
LH: loop header
LB: loop body
LE: loop exit
PB: predicated region body
PF: predicated region fallthrough
CT: control target
= control target key end

     0   :  { %8 = vsyncpa [#allocation5], 0  ;;  %s1666_s0 = inlined_call_operand.hbm [shape: bf16[64,512], index: 0, kind: input, shape index: {}]   ;;  %s1667_s1 = inlined_call_operand.hbm [shape: bf16[512,128], index: 1, kind: input, shape index: {}]   ;;  %s1668_s2 = inlined_call_operand.hbm [shape: f32[8,128], index: 2, kind: input, shape index: {}]   ;;  %s1669_s3 = inlined_call_operand.hbm [shape: bf16[64,64], index: 3, kind: output, shape index: {}]  }
   0x1   :  { %10 = vsyncpa [#allocation5 + $0x1], 0 }
   0x2   :  { %11 = vsyncpa [#allocation8], 0 }
   0x3   :  { %12 = vsyncpa [#allocation6], 0 }
   0x4   :  { %14 = vsyncpa [#allocation6 + $0x1], 0  ;;  %s1490_s12 = smov 0   ;;  %s1492_s13 = smov 0  }
   0x5   :  { %s1494_s14 = smov 0  }
   0x6 LB: > { %s1015_s15 = sadd.s32 4294967295, %s1457_s14   ;;  %s1016_s16 = sadd.s32 4294967294, %s1457_s14   ;;  %s1457_s14 = sphi %s1494_s14, %s20_s14   ;;  %s1453_s13 = sphi %s1492_s13, %s1684_s13   ;;  %s1449_s12 = sphi %s1490_s12, %s1683_s12  }
   0x7   : > { %s32_s17 = sadd.s32 1, %s1453_s13  ;;  %p1017_p0 = scmp.ge.s32.totalorder %s1457_s14, 1 }
   0x8   : > { %p34_p1 = scmp.ge.s32.totalorder %s32_s17, 2  ;;  %p137_p2 = scmp.lt.s32.totalorder %s1457_s14, 3 }
   0x9   : > { %p1512_p3 = scmp.eq.s32.totalorder %s1015_s15, 0  ;;  %s1459_s20 = smov [#allocation7]  }
   0xa   : > { %s1686_s17 = smov (%p34_p1, %s32_s17), 0  ;;  %p1518_p4 = pnand %p1017_p0, %p137_p2 }
   0xb   : > { %s1673_s18 = scalar_select %p1512_p3, 1, 0 }
   0xc   : > { %s1674_s19 = scalar_select %p1518_p4, 1, 0 }
   0xd   : > { %s149_s21 = sshll.u32 %s1459_s20, 4  ;;  %p1195_p5 = pneg %p1518_p4  ;;  %s150_s21 = int_to_ptr.vmem [resolvable:$true] %s149_s21 }
   0xe   : > { %s1460_s23 = smov [#allocation9]   ;;  %s1313_s27 = scalar_lea.hbm %s1667_s1, 4096 }
   0xf   : > { %p1527_p7 = pnand %p1512_p3, %p1195_p5  ;;  %s163_s24 = sshll.u32 %s1460_s23, 4  ;;  %s164_s24 = int_to_ptr.vmem [resolvable:$true] %s163_s24 }
  0x10   : > { %p1314_p9 = scmp.ne.s32.totalorder %s1667_s1, %s1313_s27  ;;  %p1320_p13 = scmp.lt.u32.totalorder %s1313_s27, %s1667_s1 }
  0x11   : > { %p1315_p10 = pneg %p1527_p7 }
  0x13   : > { %p1316_p11 = pnand %p1315_p10, %p1314_p9 }
  0x15   : > { %p1317_p12 = pneg %p1316_p11 }
  0x17   : > { %p1322_p0 = pnand %p1320_p13, %p1317_p12 }
  0x19   : > { %1325 = shalt.err (!%p1322_p0)
}
  0x1a   : > { %s1326_s5 = scalar_lea.vmem %s150_s21, 4096  ;;  %p1334_p6 = scmp.lt.s32.totalorder %s150_s21, %s150_s21 }
  0x1b   : > { %p1327_p1 = scmp.ne.s32.totalorder %s150_s21, %s1326_s5  ;;  %p1335_p8 = scmp.lt.s32.totalorder %s1326_s5, %s1326_s5 }
  0x1d   : > { %p1329_p2 = pnand %p1327_p1, %p1315_p10  ;;  %p1336_p3 = por %p1335_p8, %p1334_p6 }
  0x1f   : > { %p1330_p5 = pneg %p1329_p2 }
  0x21   : > { %p1337_p4 = pnand %p1336_p3, %p1330_p5 }
  0x23   : > { %1340 = shalt.err (!%p1337_p4)
}
  0x24   : > { %s1461_s6 = smov 64   ;;  %s1462_s7 = smov 4  }
  0x25   : > { %1198 = dma.hbm_to_vmem [thread:$0]  (!%p1527_p7), %s1667_s1, 4096, %s150_s21, [#allocation8], %s1461_s6, %s1461_s6, %s1462_s7  }
  0x26   : > { %s1341_s20 = scalar_lea.hbm %s1668_s2, 128 }
  0x27   : > { %p1342_p3 = scmp.ne.s32.totalorder %s1668_s2, %s1341_s20  ;;  %p1348_p8 = scmp.lt.u32.totalorder %s1341_s20, %s1668_s2 }
  0x29   : > { %p1344_p4 = pnand %p1342_p3, %p1315_p10 }
  0x2b   : > { %p1345_p6 = pneg %p1344_p4 }
  0x2d   : > { %p1350_p11 = pnand %p1348_p8, %p1345_p6 }
  0x2f   : > { %1353 = shalt.err (!%p1350_p11)
}
  0x30   : > { %s1354_s21 = scalar_lea.vmem %s164_s24, 128  ;;  %p1362_p1 = scmp.lt.s32.totalorder %s164_s24, %s164_s24 }
  0x31   : > { %p1355_p12 = scmp.ne.s32.totalorder %s164_s24, %s1354_s21  ;;  %p1363_p2 = scmp.lt.s32.totalorder %s1354_s21, %s1354_s21 }
  0x33   : > { %p1357_p13 = pnand %p1355_p12, %p1315_p10  ;;  %p1364_p5 = por %p1363_p2, %p1362_p1 }
  0x35   : > { %p1358_p0 = pneg %p1357_p13 }
  0x37   : > { %p1365_p9 = pnand %p1364_p5, %p1358_p0 }
  0x39   : > { %1368 = shalt.err (!%p1365_p9)
}
  0x3a   : > { %1201 = dma.hbm_to_vmem [thread:$0]  (!%p1527_p7), %s1668_s2, 128, %s164_s24, [#allocation8]  }
  0x3b   : > { %p1676_p3 = scmp.lt.s32.totalorder %s1457_s14, 2  ;;  %p1677_p4 = scmp.eq.s32.totalorder %s1457_s14, 0 }
  0x3c   : > { %s1463_s4 = smov [#allocation4]   ;;  %s1369_s22 = scalar_lea.hbm %s1666_s0, 2048 }
  0x3d   : > { %p1579_p6 = pnand %p1677_p4, %p1676_p3  ;;  %s188_s5 = sshll.u32 %s1463_s4, 4  ;;  %s189_s5 = int_to_ptr.vmem [resolvable:$true] %s188_s5 }
  0x3e   : > { %p1370_p10 = scmp.ne.s32.totalorder %s1666_s0, %s1369_s22  ;;  %p1376_p11 = scmp.lt.u32.totalorder %s1369_s22, %s1666_s0 }
  0x3f   : > { %p1371_p7 = pneg %p1579_p6 }
  0x41   : > { %p1372_p9 = pnand %p1371_p7, %p1370_p10 }
  0x43   : > { %p1373_p8 = pneg %p1372_p9 }
  0x45   : > { %p1378_p12 = pnand %p1376_p11, %p1373_p8 }
  0x47   : > { %1381 = shalt.err (!%p1378_p12)
}
  0x48   : > { %s1382_s11 = scalar_lea.vmem %s189_s5, 2048  ;;  %s1389_s20 = scalar_lea.vmem %s189_s5, 4096 }
  0x49   : > { %p1383_p13 = scmp.ne.s32.totalorder %s189_s5, %s1382_s11  ;;  %p1390_p2 = scmp.lt.s32.totalorder %s189_s5, %s189_s5 }
  0x4a   : > { %p1391_p5 = scmp.lt.s32.totalorder %s1389_s20, %s1382_s11 }
  0x4b   : > { %p1385_p0 = pnand %p1383_p13, %p1371_p7 }
  0x4c   : > { %p1392_p3 = por %p1391_p5, %p1390_p2 }
  0x4d   : > { %p1386_p1 = pneg %p1385_p0 }
  0x4f   : > { %p1393_p4 = pnand %p1392_p3, %p1386_p1 }
  0x51   : > { %1396 = shalt.err (!%p1393_p4)
}
  0x52   : > { %s1464_s23 = smov 256   ;;  %s1465_s25 = smov 16  }
  0x53   : > { %1205 = dma.hbm_to_vmem [thread:$0]  (!%p1579_p6), %s1666_s0, 2048, %s189_s5, [#allocation5], %s1464_s23, %s1464_s23, %s1465_s25  }
  0x54   : > { %p1679_p10 = scmp.ne.s32.totalorder %s1674_s19, 0 }
  0x55   : > { %p1680_p7 = scmp.ne.s32.totalorder (!%p1679_p10), %s1673_s18, 0 }
  0x56   : > { %200 = sbr.rel (%p1679_p10) target bundleno = 467 (0x1d3), region = 32 }
  0x5d   : > { %1436 = dma.done.wait (%p1680_p7), [#allocation5], 2048  }
  0x5e   : > { %1438 = vsyncadd (%p1680_p7), [#allocation5], 4294965248 }
  0x5f   : > { %1440 = dma.done.wait (%p1680_p7), [#allocation8], 4224  }
  0x60   : > { %1442 = vsyncadd (%p1680_p7), [#allocation8], 4294963072  ;;  %p1026_p9 = scmp.ne.s32.totalorder %s1449_s12, 0 }
  0x61   : > { %v1255_v0 = vld [vmem:[#allocation7 + $0x40] sm:$0xff] (!%p1026_p9)   ;;  %v1259_v4 = vld [vmem:[#allocation7 + $0x48] sm:$0xff] (!%p1026_p9)   ;;  %v1263_v8 = vld [vmem:[#allocation7 + $0x50] sm:$0xff] (!%p1026_p9)   ;;  %v1466_v48 = vmov (!%p1026_p9), 0.0  }
  0x62   : > { %246 = sbr.rel (%p1026_p9) target bundleno = 426 (0x1aa), region = 48  ;;  %v1256_v1 = vld [vmem:[#allocation7 + $0xc0] sm:$0xff] (!%p1026_p9)   ;;  %1099 = vmatprep.subr.bf16.mxu0 (!%p1026_p9), %v1255_v0  ;;  %v1260_v5 = vld [vmem:[#allocation7 + $0xc8] sm:$0xff] (!%p1026_p9)   ;;  %v1264_v9 = vld [vmem:[#allocation7 + $0xd0] sm:$0xff] (!%p1026_p9)   ;;  %251 = vst [vmem:[#allocation3] sm:$0xff] (!%p1026_p9), %v1466_v48 }
  0x63   : > { %v1257_v2 = vld [vmem:[#allocation7] sm:$0xff] (!%p1026_p9)   ;;  %1139 = vmatprep.subr.bf16.mxu1 (!%p1026_p9), %v1256_v1  ;;  %v1261_v6 = vld [vmem:[#allocation7 + $0x8] sm:$0xff] (!%p1026_p9)   ;;  %v1265_v10 = vld [vmem:[#allocation7 + $0x10] sm:$0xff] (!%p1026_p9)  }
  0x64   : > { %v1258_v3 = vld [vmem:[#allocation7 + $0x80] sm:$0xff] (!%p1026_p9)   ;;  %1100 = vmatpush3.bf16.msra.mxu0 (!%p1026_p9), %v1257_v2  ;;  %v1262_v7 = vld [vmem:[#allocation7 + $0x88] sm:$0xff] (!%p1026_p9)   ;;  %v1266_v11 = vld [vmem:[#allocation7 + $0x90] sm:$0xff] (!%p1026_p9)  }
  0x65   : > { %1140 = vmatpush3.bf16.msra.mxu1 (!%p1026_p9), %v1258_v3  ;;  %1101 = vmatprep.subr.bf16.mxu0 (!%p1026_p9), %v1259_v4  ;;  %v1267_v12 = vld [vmem:[#allocation7 + $0x58] sm:$0xff] (!%p1026_p9)   ;;  %v1271_v16 = vld [vmem:[#allocation7 + $0x60] sm:$0xff] (!%p1026_p9)   ;;  %v1275_v20 = vld [vmem:[#allocation7 + $0x68] sm:$0xff] (!%p1026_p9)  }
  0x66   : > { %1141 = vmatprep.subr.bf16.mxu1 (!%p1026_p9), %v1260_v5  ;;  %v1268_v13 = vld [vmem:[#allocation7 + $0xd8] sm:$0xff] (!%p1026_p9)   ;;  %v1272_v17 = vld [vmem:[#allocation7 + $0xe0] sm:$0xff] (!%p1026_p9)   ;;  %v1276_v21 = vld [vmem:[#allocation7 + $0xe8] sm:$0xff] (!%p1026_p9)  }
  0x67   : > { %v1269_v14 = vld [vmem:[#allocation7 + $0x18] sm:$0xff] (!%p1026_p9)   ;;  %v1273_v18 = vld [vmem:[#allocation7 + $0x20] sm:$0xff] (!%p1026_p9)   ;;  %v1277_v22 = vld [vmem:[#allocation7 + $0x28] sm:$0xff] (!%p1026_p9)  }
  0x68   : > { %1102 = vmatpush3.bf16.msra.mxu0 (!%p1026_p9), %v1261_v6  ;;  %v1270_v15 = vld [vmem:[#allocation7 + $0x98] sm:$0xff] (!%p1026_p9)   ;;  %v1274_v19 = vld [vmem:[#allocation7 + $0xa0] sm:$0xff] (!%p1026_p9)   ;;  %v1278_v23 = vld [vmem:[#allocation7 + $0xa8] sm:$0xff] (!%p1026_p9)  }
  0x69   : > { %1142 = vmatpush3.bf16.msra.mxu1 %v1262_v7  ;;  %1103 = vmatprep.subr.bf16.mxu0 %v1263_v8  ;;  %v1279_v24 = vld [vmem:[#allocation7 + $0x70] sm:$0xff]   ;;  %v1283_v28 = vld [vmem:[#allocation7 + $0x78] sm:$0xff]   ;;  %v1610_v51 = vld [vmem:[#allocation9] ss:$0 sm:$0xff] }
  0x6a   : > { %1143 = vmatprep.subr.bf16.mxu1 %v1264_v9  ;;  %v1280_v25 = vld [vmem:[#allocation7 + $0xf0] sm:$0xff]   ;;  %v1284_v29 = vld [vmem:[#allocation7 + $0xf8] sm:$0xff]  }
  0x6b   : > { %v1281_v26 = vld [vmem:[#allocation7 + $0x30] sm:$0xff]   ;;  %v1285_v30 = vld [vmem:[#allocation7 + $0x38] sm:$0xff]  }
  0x6c   : > { %1104 = vmatpush3.bf16.msra.mxu0 %v1265_v10  ;;  %v1282_v27 = vld [vmem:[#allocation7 + $0xb0] sm:$0xff]   ;;  %v1286_v31 = vld [vmem:[#allocation7 + $0xb8] sm:$0xff]  }
  0x6d   : > { %1144 = vmatpush3.bf16.msra.mxu1 %v1266_v11  ;;  %1105 = vmatprep.subr.bf16.mxu0 %v1267_v12  ;;  %v1287_v32 = vld [vmem:[#allocation4] ss:$16 sps:$4 sm:$0xff]   ;;  %v1289_v33 = vld [vmem:[#allocation4 + $0x4] ss:$16 sps:$4 sm:$0xff]   ;;  %v1290_v34 = vld [vmem:[#allocation4 + $0x8] ss:$16 sps:$4 sm:$0xff]  }
  0x6e   : > { %1145 = vmatprep.subr.bf16.mxu1 %v1268_v13  ;;  %v1292_v35 = vld [vmem:[#allocation4 + $0xc] ss:$16 sps:$4 sm:$0xff]   ;;  %641 = vmatprep.mubr.bf16.mxu0 %v1289_v33  ;;  %v1293_v36 = vld [vmem:[#allocation4 + $0x24] ss:$16 sps:$4 sm:$0xff]   ;;  %v1297_v38 = vld [vmem:[#allocation4 + $0x20] ss:$16 sps:$4 sm:$0xff]  }
  0x6f   : > { %706 = vmatprep.mubr.bf16.mxu1 %v1292_v35  ;;  %v1295_v37 = vld [vmem:[#allocation4 + $0x2c] ss:$16 sps:$4 sm:$0xff]   ;;  %v1298_v39 = vld [vmem:[#allocation4 + $0x28] ss:$16 sps:$4 sm:$0xff]   ;;  %v1299_v40 = vld [vmem:[#allocation4 + $0x44] ss:$16 sps:$4 sm:$0xff]  }
  0x70   : > { %1106 = vmatpush3.bf16.msra.mxu0 %v1269_v14  ;;  %v1301_v41 = vld [vmem:[#allocation4 + $0x4c] ss:$16 sps:$4 sm:$0xff]   ;;  %v1303_v42 = vld [vmem:[#allocation4 + $0x40] ss:$16 sps:$4 sm:$0xff]   ;;  %v1304_v43 = vld [vmem:[#allocation4 + $0x48] ss:$16 sps:$4 sm:$0xff]  }
  0x71   : > { %1146 = vmatpush3.bf16.msra.mxu1 %v1270_v15  ;;  %1107 = vmatprep.subr.bf16.mxu0 %v1271_v16  ;;  %v1305_v44 = vld [vmem:[#allocation4 + $0x64] ss:$16 sps:$4 sm:$0xff]   ;;  %v1307_v45 = vld [vmem:[#allocation4 + $0x6c] ss:$16 sps:$4 sm:$0xff]   ;;  %v1309_v46 = vld [vmem:[#allocation4 + $0x60] ss:$16 sps:$4 sm:$0xff]  }
  0x72   : > { %1147 = vmatprep.subr.bf16.mxu1 %v1272_v17  ;;  %v1310_v47 = vld [vmem:[#allocation4 + $0x68] ss:$16 sps:$4 sm:$0xff]  }
  0x74   : > { %1108 = vmatpush3.bf16.msra.mxu0 %v1273_v18 }
  0x75   : > { %1148 = vmatpush3.bf16.msra.mxu1 %v1274_v19  ;;  %1109 = vmatprep.subr.bf16.mxu0 %v1275_v20 }
  0x76   : > { %1149 = vmatprep.subr.bf16.mxu1 %v1276_v21 }
  0x78   : > { %1110 = vmatpush3.bf16.msra.mxu0 %v1277_v22 }
  0x79   : > { %1150 = vmatpush3.bf16.msra.mxu1 %v1278_v23  ;;  %1111 = vmatprep.subr.bf16.mxu0 %v1279_v24 }
  0x7a   : > { %1151 = vmatprep.subr.bf16.mxu1 %v1280_v25 }
  0x7c   : > { %1112 = vmatpush3.bf16.msra.mxu0 %v1281_v26 }
  0x7d   : > { %1152 = vmatpush3.bf16.msra.mxu1 %v1282_v27  ;;  %1113 = vmatprep.subr.bf16.mxu0 %v1283_v28 }
  0x7e   : > { %1153 = vmatprep.subr.bf16.mxu1 %v1284_v29 }
  0x80   : > { %1114 = vmatpush3.bf16.msra.mxu0 %v1285_v30 }
  0x81   : > { %1154 = vmatpush3.bf16.msra.mxu1 %v1286_v31 }
  0x83   : > { %642 = vmatmul.mubr.bf16.vlgmr.msra.gmra.mrb[0].mxu0 %v1287_v32 }
  0x84   : > { %707 = vmatmul.mubr.bf16.vlgmr.msra.gmra.mrb[0].mxu1 %v1290_v34  ;;  %649 = vmatprep.mubr.bf16.mxu0 %v1293_v36 }
  0x85   : > { %714 = vmatprep.mubr.bf16.mxu1 %v1295_v37 }
  0x8b   : > { %650 = vmatmul.mubr.bf16.gmra.mrb[4].mxu0 %v1297_v38 }
  0x8c   : > { %715 = vmatmul.mubr.bf16.gmra.mrb[4].mxu1 %v1298_v39  ;;  %657 = vmatprep.mubr.bf16.mxu0 %v1299_v40 }
  0x8d   : > { %722 = vmatprep.mubr.bf16.mxu1 %v1301_v41 }
  0x93   : > { %658 = vmatmul.mubr.bf16.gmra.mrb[8].mxu0 %v1303_v42 }
  0x94   : > { %723 = vmatmul.mubr.bf16.gmra.mrb[8].mxu1 %v1304_v43  ;;  %665 = vmatprep.mubr.bf16.mxu0 %v1305_v44 }
  0x95   : > { %730 = vmatprep.mubr.bf16.mxu1 %v1307_v45 }
  0x9b   : > { %666 = vmatmul.mubr.bf16.gmra.mrb[12].mxu0 %v1309_v46 }
  0x9c   : > { %731 = vmatmul.mubr.bf16.gmra.mrb[12].mxu1 %v1310_v47 }
 0x156   : > { %v1115_v49 = vpop.f32.mrb[0].mxu0 }
 0x157   : > { %v1155_v50 = vpop.f32.mrb[0].mxu1  ;;  %v1116_v52 = vpop.f32.mrb[1].mxu0 }
 0x158   : > { %v1117_v53 = vadd.f32 %v1116_v52, %v1115_v49  ;;  %v1156_v54 = vpop.f32.mrb[1].mxu1  ;;  %v1118_v55 = vpop.f32.mrb[2].mxu0 }
 0x159   : > { %v1157_v56 = vadd.f32 %v1156_v54, %v1155_v50  ;;  %v1158_v57 = vpop.f32.mrb[2].mxu1  ;;  %v1119_v58 = vpop.f32.mrb[3].mxu0 }
 0x15a   : > { %v644_v59 = vadd.f32 %v1117_v53, %v1610_v51  ;;  %v1120_v60 = vadd.f32 %v1119_v58, %v1118_v55  ;;  %v1159_v61 = vpop.f32.mrb[3].mxu1 }
 0x15b   : > { %v1160_v62 = vadd.f32 %v1159_v61, %v1158_v57 }
 0x15c   : > { %v709_v63 = vadd.f32 %v1157_v56, %v644_v59  ;;  %v647_v0 = vadd.f32 %v1120_v60, %v1610_v51 }
 0x15e   : > { %741 = vst [vmem:[#allocation2] sm:$0xff] %v709_v63  ;;  %v712_v1 = vadd.f32 %v1160_v62, %v647_v0  ;;  %v1121_v2 = vpop.f32.mrb[4].mxu0  ;;  %v766_v5 = vmul.f32 %v709_v63, %v709_v63 }
 0x15f   : > { %v1161_v3 = vpop.f32.mrb[4].mxu1  ;;  %v1122_v4 = vpop.f32.mrb[5].mxu0 }
 0x160   : > { %742 = vst [vmem:[#allocation2 + $0x8] sm:$0xff] %v712_v1  ;;  %v750_v6 = vadd.f32 %v712_v1, %v709_v63  ;;  %v767_v7 = vmul.f32 %v712_v1, %v712_v1  ;;  %v1123_v8 = vadd.f32 %v1122_v4, %v1121_v2  ;;  %v1162_v9 = vpop.f32.mrb[5].mxu1  ;;  %v1124_v10 = vpop.f32.mrb[6].mxu0 }
 0x161   : > { %v1163_v11 = vadd.f32 %v1162_v9, %v1161_v3  ;;  %v1164_v12 = vpop.f32.mrb[6].mxu1  ;;  %v1125_v13 = vpop.f32.mrb[7].mxu0 }
 0x162   : > { %v774_v14 = vadd.f32 %v767_v7, %v766_v5  ;;  %v652_v15 = vadd.f32 %v1123_v8, %v1610_v51  ;;  %v1126_v16 = vadd.f32 %v1125_v13, %v1124_v10  ;;  %v1165_v17 = vpop.f32.mrb[7].mxu1 }
 0x163   : > { %v1166_v18 = vadd.f32 %v1165_v17, %v1164_v12 }
 0x164   : > { %v717_v19 = vadd.f32 %v1163_v11, %v652_v15  ;;  %v655_v20 = vadd.f32 %v1126_v16, %v1610_v51 }
 0x166   : > { %743 = vst [vmem:[#allocation2 + $0x10] sm:$0xff] %v717_v19  ;;  %v751_v21 = vadd.f32 %v750_v6, %v717_v19  ;;  %v768_v22 = vmul.f32 %v717_v19, %v717_v19  ;;  %v720_v23 = vadd.f32 %v1166_v18, %v655_v20  ;;  %v1127_v24 = vpop.f32.mrb[8].mxu0  ;;  %v749_v18 = vld [vmem:[#allocation3] sm:$0x1]  ;;  %v765_v20 = vld [vmem:[#allocation3 + $0x1] sm:$0x1] }
 0x167   : > { %v1167_v25 = vpop.f32.mrb[8].mxu1  ;;  %v1128_v26 = vpop.f32.mrb[9].mxu0 }
 0x168   : > { %v775_v27 = vadd.f32 %v774_v14, %v768_v22  ;;  %744 = vst [vmem:[#allocation2 + $0x18] sm:$0xff] %v720_v23  ;;  %v752_v28 = vadd.f32 %v751_v21, %v720_v23  ;;  %v769_v29 = vmul.f32 %v720_v23, %v720_v23  ;;  %v1129_v30 = vadd.f32 %v1128_v26, %v1127_v24  ;;  %v1168_v31 = vpop.f32.mrb[9].mxu1  ;;  %v1130_v32 = vpop.f32.mrb[10].mxu0 }
 0x169   : > { %v1169_v33 = vadd.f32 %v1168_v31, %v1167_v25  ;;  %v1170_v34 = vpop.f32.mrb[10].mxu1  ;;  %v1131_v35 = vpop.f32.mrb[11].mxu0  ;;  %v798_v31 = vld [vmem:[#allocation9 + $0x1] sm:$0x1] }
 0x16a   : > { %v776_v36 = vadd.f32 %v775_v27, %v769_v29  ;;  %v660_v37 = vadd.f32 %v1129_v30, %v1610_v51  ;;  %v1132_v38 = vadd.f32 %v1131_v35, %v1130_v32  ;;  %v1171_v39 = vpop.f32.mrb[11].mxu1 }
 0x16b   : > { %v1172_v40 = vadd.f32 %v1171_v39, %v1170_v34  ;;  %v803_v34 = vld [vmem:[#allocation9 + $0x2] sm:$0x1] }
 0x16c   : > { %v725_v41 = vadd.f32 %v1169_v33, %v660_v37  ;;  %v663_v42 = vadd.f32 %v1132_v38, %v1610_v51 }
 0x16e   : > { %745 = vst [vmem:[#allocation2 + $0x20] sm:$0xff] %v725_v41  ;;  %v753_v43 = vadd.f32 %v752_v28, %v725_v41  ;;  %v770_v44 = vmul.f32 %v725_v41, %v725_v41  ;;  %v728_v45 = vadd.f32 %v1172_v40, %v663_v42  ;;  %v1133_v46 = vpop.f32.mrb[12].mxu0 }
 0x16f   : > { %v1173_v47 = vpop.f32.mrb[12].mxu1  ;;  %v1134_v48 = vpop.f32.mrb[13].mxu0 }
 0x170   : > { %v777_v49 = vadd.f32 %v776_v36, %v770_v44  ;;  %746 = vst [vmem:[#allocation2 + $0x28] sm:$0xff] %v728_v45  ;;  %v754_v50 = vadd.f32 %v753_v43, %v728_v45  ;;  %v771_v52 = vmul.f32 %v728_v45, %v728_v45  ;;  %v1135_v53 = vadd.f32 %v1134_v48, %v1133_v46  ;;  %v1174_v54 = vpop.f32.mrb[13].mxu1  ;;  %v1136_v55 = vpop.f32.mrb[14].mxu0 }
 0x171   : > { %v1175_v56 = vadd.f32 %v1174_v54, %v1173_v47  ;;  %v1176_v57 = vpop.f32.mrb[14].mxu1  ;;  %v1137_v58 = vpop.f32.mrb[15].mxu0 }
 0x172   : > { %v778_v59 = vadd.f32 %v777_v49, %v771_v52  ;;  %v668_v60 = vadd.f32 %v1135_v53, %v1610_v51  ;;  %v1138_v61 = vadd.f32 %v1137_v58, %v1136_v55  ;;  %v1177_v62 = vpop.f32.mrb[15].mxu1 }
 0x173   : > { %v1178_v63 = vadd.f32 %v1177_v62, %v1176_v57 }
 0x174   : > { %v733_v0 = vadd.f32 %v1175_v56, %v668_v60  ;;  %v671_v1 = vadd.f32 %v1138_v61, %v1610_v51 }
 0x176   : > { %747 = vst [vmem:[#allocation2 + $0x30] sm:$0xff] %v733_v0  ;;  %v755_v2 = vadd.f32 %v754_v50, %v733_v0  ;;  %v772_v3 = vmul.f32 %v733_v0, %v733_v0  ;;  %v736_v4 = vadd.f32 %v1178_v63, %v671_v1 }
 0x178   : > { %v779_v5 = vadd.f32 %v778_v59, %v772_v3  ;;  %748 = vst [vmem:[#allocation2 + $0x38] sm:$0xff] %v736_v4  ;;  %v756_v6 = vadd.f32 %v755_v2, %v736_v4  ;;  %v773_v7 = vmul.f32 %v736_v4, %v736_v4 }
 0x17a   : > { %v757_v8 = vrot.slane %v756_v6, 4  ;;  %v780_v9 = vadd.f32 %v779_v5, %v773_v7 }
 0x17c   : > { %v758_v10 = vadd.f32 %v757_v8, %v756_v6  ;;  %v781_v11 = vrot.slane %v780_v9, 4 }
 0x17e   : > { %v759_v12 = vrot.slane %v758_v10, 2  ;;  %v782_v13 = vadd.f32 %v781_v11, %v780_v9 }
 0x180   : > { %v760_v14 = vadd.f32 %v759_v12, %v758_v10  ;;  %v783_v15 = vrot.slane %v782_v13, 2 }
 0x182   : > { %v761_v16 = vrot.slane %v760_v14, 1  ;;  %v784_v17 = vadd.f32 %v783_v15, %v782_v13 }
 0x184   : > { %v762_v51 = vadd.f32 %v761_v16, %v760_v14  ;;  %v785_v19 = vrot.slane %v784_v17, 1 }
 0x186   : > { %v763_v21 = vadd.f32 %v762_v51, %v749_v18  ;;  %v786_v22 = vadd.f32 %v785_v19, %v784_v17 }
 0x188   : > { %764 = vst [vmem:[#allocation3] sm:$0x1] %v763_v21  ;;  %v787_v23 = vadd.f32 %v786_v22, %v765_v20 }
 0x18a   : > { %788 = vst [vmem:[#allocation3 + $0x1] sm:$0x1] %v787_v23 }
 0x18f   : > { %v792_v24 = vld [vmem:[#allocation3] sm:$0x1] }
 0x190   : > { %v793_v25 = vmul.f32 0.015625, %v792_v24 }
 0x191   : > { %v794_v26 = vld [vmem:[#allocation3 + $0x1] sm:$0x1] }
 0x192   : > { %v795_v27 = vmul.f32 0.015625, %v794_v26  ;;  %v796_v28 = vmul.f32 %v793_v25, %v793_v25 }
 0x194   : > { %v797_v29 = vsub.f32 %v795_v27, %v796_v28 }
 0x196   : > { %v799_v30 = vadd.f32 1e-05, %v797_v29 }
 0x198   : > { %1311 = vrsqrt.f32 %v799_v30 }
 0x1a2   : > { %v1312_v32 = vpop.eup %1311 }
 0x1a3   : > { %v801_v33 = vmul.f32 %v1312_v32, %v798_v31 }
 0x1a5   : > { %802 = vst [vmem:[#allocation3 + $0x2] sm:$0x1] %v801_v33  ;;  %v804_v35 = vmul.f32 %v801_v33, %v793_v25 }
 0x1a7   : > { %v805_v36 = vsub.f32 %v803_v34, %v804_v35 }
 0x1a9   : > { %806 = vst [vmem:[#allocation3 + $0x3] sm:$0x1] %v805_v36 }
 0x1aa PF: > { %p1076_p6 = scmp.ne.s32.totalorder %s1449_s12, 1 }
 0x1ab   : > { %v813_v37 = vld [vmem:[#allocation2] sm:$0xff] (!%p1076_p6)  ;;  %v814_v41 = vld [vmem:[#allocation2 + $0x8] sm:$0xff] (!%p1076_p6)  ;;  %v815_v42 = vld [vmem:[#allocation2 + $0x10] sm:$0xff] (!%p1076_p6)  ;;  %vm887_vm0 = vcmask (!%p1076_p6), 519168  }
 0x1ac   : > { %810 = sbr.rel (%p1076_p6) target bundleno = 443 (0x1bb), region = 60  ;;  %v1077_v38 = vld [vmem:[#allocation3 + $0x2] ss:$0 sm:$0xff] (!%p1076_p6)  ;;  %v816_v43 = vld [vmem:[#allocation2 + $0x18] sm:$0xff] (!%p1076_p6)  ;;  %v818_v48 = vld [vmem:[#allocation2 + $0x28] sm:$0xff] (!%p1076_p6) }
 0x1ad   : > { %v826_v40 = vmul.f32 (!%p1076_p6), %v1077_v38, %v813_v37  ;;  %v827_v44 = vmul.f32 (!%p1076_p6), %v1077_v38, %v814_v41  ;;  %v828_v45 = vmul.f32 (!%p1076_p6), %v1077_v38, %v815_v42  ;;  %v829_v46 = vmul.f32 (!%p1076_p6), %v1077_v38, %v816_v43  ;;  %v817_v47 = vld [vmem:[#allocation2 + $0x20] sm:$0xff] (!%p1076_p6)  ;;  %v819_v49 = vld [vmem:[#allocation2 + $0x30] sm:$0xff] (!%p1076_p6)  ;;  %v820_v55 = vld [vmem:[#allocation2 + $0x38] sm:$0xff] (!%p1076_p6) }
 0x1ae   : > { %v830_v52 = vmul.f32 (!%p1076_p6), %v1077_v38, %v817_v47  ;;  %v831_v53 = vmul.f32 (!%p1076_p6), %v1077_v38, %v818_v48  ;;  %v832_v54 = vmul.f32 (!%p1076_p6), %v1077_v38, %v819_v49  ;;  %v833_v59 = vmul.f32 (!%p1076_p6), %v1077_v38, %v820_v55 }
 0x1b0   : > { %v1078_v39 = vld [vmem:[#allocation3 + $0x3] ss:$0 sm:$0xff] (!%p1076_p6) }
 0x1b1   : > { %v839_v50 = vadd.f32 (!%p1076_p6), %v1078_v39, %v826_v40  ;;  %v840_v56 = vadd.f32 (!%p1076_p6), %v1078_v39, %v827_v44  ;;  %v841_v57 = vadd.f32 (!%p1076_p6), %v1078_v39, %v828_v45  ;;  %v842_v58 = vadd.f32 (!%p1076_p6), %v1078_v39, %v829_v46 }
 0x1b2   : > { %v843_v61 = vadd.f32 (!%p1076_p6), %v1078_v39, %v830_v52  ;;  %v844_v62 = vadd.f32 (!%p1076_p6), %v1078_v39, %v831_v53  ;;  %v845_v63 = vadd.f32 (!%p1076_p6), %v1078_v39, %v832_v54  ;;  %v846_v3 = vadd.f32 (!%p1076_p6), %v1078_v39, %v833_v59 }
 0x1b3   : > { %v847_v60 = vmax.f32 %v839_v50, 0.0  ;;  %v848_v0 = vmax.f32 %v840_v56, 0.0  ;;  %v849_v1 = vmax.f32 %v841_v57, 0.0  ;;  %v850_v2 = vmax.f32 %v842_v58, 0.0 }
 0x1b4   : > { %v851_v5 = vmax.f32 %v843_v61, 0.0  ;;  %v852_v6 = vmax.f32 %v844_v62, 0.0  ;;  %v853_v7 = vmax.f32 %v845_v63, 0.0  ;;  %v854_v11 = vmax.f32 %v846_v3, 0.0 }
 0x1b5   : > { %v1091_v4 = vpack.c.bf16 %v847_v60, %v847_v60  ;;  %v1092_v8 = vpack.c.bf16 %v848_v0, %v848_v0  ;;  %v1093_v9 = vpack.c.bf16 %v849_v1, %v849_v1  ;;  %v1094_v10 = vpack.c.bf16 %v850_v2, %v850_v2 }
 0x1b6   : > { %v1095_v12 = vpack.c.bf16 %v851_v5, %v851_v5  ;;  %v1096_v13 = vpack.c.bf16 %v852_v6, %v852_v6  ;;  %v1097_v14 = vpack.c.bf16 %v853_v7, %v853_v7  ;;  %v1098_v15 = vpack.c.bf16 %v854_v11, %v854_v11 }
 0x1b7   : > { %888 = vst.msk [vmem:[#allocation10] sm:$0xf] %vm887_vm0, %v1091_v4  ;;  %889 = vst.msk [vmem:[#allocation10 + $0x4] sm:$0xf] %vm887_vm0, %v1092_v8 }
 0x1b8   : > { %890 = vst.msk [vmem:[#allocation10 + $0x8] sm:$0xf] %vm887_vm0, %v1093_v9  ;;  %891 = vst.msk [vmem:[#allocation10 + $0xc] sm:$0xf] %vm887_vm0, %v1094_v10 }
 0x1b9   : > { %892 = vst.msk [vmem:[#allocation10 + $0x10] sm:$0xf] %vm887_vm0, %v1095_v12  ;;  %893 = vst.msk [vmem:[#allocation10 + $0x14] sm:$0xf] %vm887_vm0, %v1096_v13 }
 0x1ba   : > { %894 = vst.msk [vmem:[#allocation10 + $0x18] sm:$0xf] %vm887_vm0, %v1097_v14  ;;  %895 = vst.msk [vmem:[#allocation10 + $0x1c] sm:$0xf] %vm887_vm0, %v1098_v15 }
 0x1bb PF: > { %p1631_p8 = scmp.eq.s32.totalorder %s1015_s15, 1  ;;  %s1467_s18 = smov [#allocation10]  }
 0x1bc   : > { %s911_s19 = sshll.u32 %s1467_s18, 4  ;;  %s912_s19 = int_to_ptr.vmem [resolvable:$true] %s911_s19 }
 0x1bd   : > { %s1397_s21 = scalar_lea.vmem %s912_s19, 512  ;;  %s1403_s28 = scalar_lea.vmem %s912_s19, 1024 }
 0x1be   : > { %p1398_p11 = scmp.ne.s32.totalorder %s912_s19, %s1397_s21  ;;  %p1404_p0 = scmp.lt.s32.totalorder %s912_s19, %s912_s19 }
 0x1bf   : > { %p1405_p1 = scmp.lt.s32.totalorder %s1403_s28, %s1397_s21 }
 0x1c0   : > { %p1399_p12 = pnand %p1398_p11, %p1631_p8 }
 0x1c1   : > { %p1406_p2 = por %p1405_p1, %p1404_p0 }
 0x1c2   : > { %p1400_p13 = pneg %p1399_p12 }
 0x1c4   : > { %p1407_p5 = pnand %p1406_p2, %p1400_p13 }
 0x1c6   : > { %1410 = shalt.err (!%p1407_p5)
}
 0x1c7   : > { %s1411_s30 = scalar_lea.hbm %s1669_s3, 512 }
 0x1c8   : > { %p1412_p3 = scmp.ne.s32.totalorder %s1669_s3, %s1411_s30  ;;  %p1417_p7 = scmp.lt.u32.totalorder %s1411_s30, %s1669_s3 }
 0x1ca   : > { %p1413_p4 = pnand %p1412_p3, %p1631_p8 }
 0x1cc   : > { %p1414_p10 = pneg %p1413_p4 }
 0x1ce   : > { %p1419_p9 = pnand %p1417_p7, %p1414_p10 }
 0x1d0   : > { %1422 = shalt.err (!%p1419_p9)
}
 0x1d1   : > { %s1468_s22 = smov 64   ;;  %s1469_s8 = smov 4  }
 0x1d2   : > { %1192 = dma.vmem_to_hbm [thread:$0]  (%p1631_p8), %s912_s19, 512, %s1669_s3, [#allocation6], %s1468_s22, %s1468_s22, %s1469_s8  }
 0x1d3 PF: > { %p1219_p6 = scmp.eq.s32.totalorder %s1016_s16, 1  ;;  %p1682_p11 = scmp.ge.s32.totalorder %s1457_s14, 2 }
 0x1d5   : > { %p1207_p12 = pnand %p1219_p6, %p1682_p11 }
 0x1d7   : > { %1444 = dma.done.wait (!%p1207_p12), [#allocation6], 512  }
 0x1d8   : > { %1446 = vsyncadd (!%p1207_p12), [#allocation6], 4294966784  ;;  %s20_s14 = sadd.s32 1, %s1457_s14   ;;  %s1683_s12 = smov %s1453_s13 }
 0x1d9   : > { %p17_p13 = scmp.ge.s32.totalorder %s20_s14, 4   ;;  %s1684_s13 = smov %s1686_s17 }
 0x1db   :  { %19 = sbr.rel (!%p17_p13) target bundleno = 6 (0x6), region = 103 }
 0x1e2   :  { %932 = vsyncpa [#allocation5], 1 }
 0x1e3   :  { %934 = vsyncpa [#allocation5 + $0x1], 1 }
 0x1e4   :  { %935 = vsyncpa [#allocation8], 1 }
 0x1e5   :  { %936 = vsyncpa [#allocation6], 1 }
 0x1e6   :  { %938 = vsyncpa [#allocation6 + $0x1], 1 }

// kernel: dqn_forward.6
= control target key start
LH: loop header
LB: loop body
LE: loop exit
PB: predicated region body
PF: predicated region fallthrough
CT: control target
= control target key end

     0   :  { %8 = vsyncpa [#allocation5], 0  ;;  %s1492_s0 = inlined_call_operand.hbm [shape: bf16[16,576], index: 0, kind: input, shape index: {}]   ;;  %s1493_s1 = inlined_call_operand.hbm [shape: bf16[576,128], index: 1, kind: input, shape index: {}]   ;;  %s1494_s2 = inlined_call_operand.hbm [shape: f32[8,128], index: 2, kind: input, shape index: {}]   ;;  %s1495_s3 = inlined_call_operand.hbm [shape: bf16[16,64], index: 3, kind: output, shape index: {}]  }
   0x1   :  { %10 = vsyncpa [#allocation5 + $0x1], 0 }
   0x2   :  { %11 = vsyncpa [#allocation8], 0 }
   0x3   :  { %12 = vsyncpa [#allocation6], 0 }
   0x4   :  { %14 = vsyncpa [#allocation6 + $0x1], 0  ;;  %s1328_s12 = smov 0   ;;  %s1330_s13 = smov 0  }
   0x5   :  { %s1332_s14 = smov 0  }
   0x6 LB: > { %s901_s15 = sadd.s32 4294967295, %s1294_s14   ;;  %s902_s16 = sadd.s32 4294967294, %s1294_s14   ;;  %s1294_s14 = sphi %s1332_s14, %s20_s14   ;;  %s1290_s13 = sphi %s1330_s13, %s1510_s13   ;;  %s1286_s12 = sphi %s1328_s12, %s1509_s12  }
   0x7   : > { %s32_s17 = sadd.s32 1, %s1290_s13  ;;  %p903_p0 = scmp.ge.s32.totalorder %s1294_s14, 1 }
   0x8   : > { %p34_p1 = scmp.ge.s32.totalorder %s32_s17, 2  ;;  %p137_p2 = scmp.lt.s32.totalorder %s1294_s14, 3 }
   0x9   : > { %p1350_p3 = scmp.eq.s32.totalorder %s901_s15, 0  ;;  %s1296_s20 = smov [#allocation7]  }
   0xa   : > { %s1512_s17 = smov (%p34_p1, %s32_s17), 0  ;;  %p1356_p4 = pnand %p903_p0, %p137_p2 }
   0xb   : > { %s1499_s18 = scalar_select %p1350_p3, 1, 0 }
   0xc   : > { %s1500_s19 = scalar_select %p1356_p4, 1, 0 }
   0xd   : > { %s149_s21 = sshll.u32 %s1296_s20, 4  ;;  %p1044_p5 = pneg %p1356_p4  ;;  %s150_s21 = int_to_ptr.vmem [resolvable:$true] %s149_s21 }
   0xe   : > { %s1297_s23 = smov [#allocation9]   ;;  %s1150_s27 = scalar_lea.hbm %s1493_s1, 4608 }
   0xf   : > { %p1365_p7 = pnand %p1350_p3, %p1044_p5  ;;  %s163_s24 = sshll.u32 %s1297_s23, 4  ;;  %s164_s24 = int_to_ptr.vmem [resolvable:$true] %s163_s24 }
  0x10   : > { %p1151_p9 = scmp.ne.s32.totalorder %s1493_s1, %s1150_s27  ;;  %p1157_p13 = scmp.lt.u32.totalorder %s1150_s27, %s1493_s1 }
  0x11   : > { %p1152_p10 = pneg %p1365_p7 }
  0x13   : > { %p1153_p11 = pnand %p1152_p10, %p1151_p9 }
  0x15   : > { %p1154_p12 = pneg %p1153_p11 }
  0x17   : > { %p1159_p0 = pnand %p1157_p13, %p1154_p12 }
  0x19   : > { %1162 = shalt.err (!%p1159_p0)
}
  0x1a   : > { %s1163_s5 = scalar_lea.vmem %s150_s21, 4608  ;;  %p1171_p6 = scmp.lt.s32.totalorder %s150_s21, %s150_s21 }
  0x1b   : > { %p1164_p1 = scmp.ne.s32.totalorder %s150_s21, %s1163_s5  ;;  %p1172_p8 = scmp.lt.s32.totalorder %s1163_s5, %s1163_s5 }
  0x1d   : > { %p1166_p2 = pnand %p1164_p1, %p1152_p10  ;;  %p1173_p3 = por %p1172_p8, %p1171_p6 }
  0x1f   : > { %p1167_p5 = pneg %p1166_p2 }
  0x21   : > { %p1174_p4 = pnand %p1173_p3, %p1167_p5 }
  0x23   : > { %1177 = shalt.err (!%p1174_p4)
}
  0x24   : > { %s1298_s6 = smov 64   ;;  %s1299_s7 = smov 4  }
  0x25   : > { %1047 = dma.hbm_to_vmem [thread:$0]  (!%p1365_p7), %s1493_s1, 4608, %s150_s21, [#allocation8], %s1298_s6, %s1298_s6, %s1299_s7  }
  0x26   : > { %s1178_s20 = scalar_lea.hbm %s1494_s2, 128 }
  0x27   : > { %p1179_p3 = scmp.ne.s32.totalorder %s1494_s2, %s1178_s20  ;;  %p1185_p8 = scmp.lt.u32.totalorder %s1178_s20, %s1494_s2 }
  0x29   : > { %p1181_p4 = pnand %p1179_p3, %p1152_p10 }
  0x2b   : > { %p1182_p6 = pneg %p1181_p4 }
  0x2d   : > { %p1187_p11 = pnand %p1185_p8, %p1182_p6 }
  0x2f   : > { %1190 = shalt.err (!%p1187_p11)
}
  0x30   : > { %s1191_s21 = scalar_lea.vmem %s164_s24, 128  ;;  %p1199_p1 = scmp.lt.s32.totalorder %s164_s24, %s164_s24 }
  0x31   : > { %p1192_p12 = scmp.ne.s32.totalorder %s164_s24, %s1191_s21  ;;  %p1200_p2 = scmp.lt.s32.totalorder %s1191_s21, %s1191_s21 }
  0x33   : > { %p1194_p13 = pnand %p1192_p12, %p1152_p10  ;;  %p1201_p5 = por %p1200_p2, %p1199_p1 }
  0x35   : > { %p1195_p0 = pneg %p1194_p13 }
  0x37   : > { %p1202_p9 = pnand %p1201_p5, %p1195_p0 }
  0x39   : > { %1205 = shalt.err (!%p1202_p9)
}
  0x3a   : > { %1050 = dma.hbm_to_vmem [thread:$0]  (!%p1365_p7), %s1494_s2, 128, %s164_s24, [#allocation8]  }
  0x3b   : > { %p1502_p3 = scmp.lt.s32.totalorder %s1294_s14, 2  ;;  %p1503_p4 = scmp.eq.s32.totalorder %s1294_s14, 0 }
  0x3c   : > { %s1300_s4 = smov [#allocation4]   ;;  %s1206_s22 = scalar_lea.hbm %s1492_s0, 640 }
  0x3d   : > { %p1417_p6 = pnand %p1503_p4, %p1502_p3  ;;  %s188_s5 = sshll.u32 %s1300_s4, 4  ;;  %s189_s5 = int_to_ptr.vmem [resolvable:$true] %s188_s5 }
  0x3e   : > { %p1207_p10 = scmp.ne.s32.totalorder %s1492_s0, %s1206_s22  ;;  %p1213_p11 = scmp.lt.u32.totalorder %s1206_s22, %s1492_s0 }
  0x3f   : > { %p1208_p7 = pneg %p1417_p6 }
  0x41   : > { %p1209_p9 = pnand %p1208_p7, %p1207_p10 }
  0x43   : > { %p1210_p8 = pneg %p1209_p9 }
  0x45   : > { %p1215_p12 = pnand %p1213_p11, %p1210_p8 }
  0x47   : > { %1218 = shalt.err (!%p1215_p12)
}
  0x48   : > { %s1219_s11 = scalar_lea.vmem %s189_s5, 640  ;;  %s1226_s20 = scalar_lea.vmem %s189_s5, 1280 }
  0x49   : > { %p1220_p13 = scmp.ne.s32.totalorder %s189_s5, %s1219_s11  ;;  %p1227_p2 = scmp.lt.s32.totalorder %s189_s5, %s189_s5 }
  0x4a   : > { %p1228_p5 = scmp.lt.s32.totalorder %s1226_s20, %s1219_s11 }
  0x4b   : > { %p1222_p0 = pnand %p1220_p13, %p1208_p7 }
  0x4c   : > { %p1229_p3 = por %p1228_p5, %p1227_p2 }
  0x4d   : > { %p1223_p1 = pneg %p1222_p0 }
  0x4f   : > { %p1230_p4 = pnand %p1229_p3, %p1223_p1 }
  0x51   : > { %1233 = shalt.err (!%p1230_p4)
}
  0x52   : > { %s1301_s23 = smov 320   ;;  %s1302_s25 = smov 20  }
  0x53   : > { %1054 = dma.hbm_to_vmem [thread:$0]  (!%p1417_p6), %s1492_s0, 640, %s189_s5, [#allocation5], %s1301_s23, %s1301_s23, %s1302_s25  }
  0x54   : > { %p1505_p10 = scmp.ne.s32.totalorder %s1500_s19, 0 }
  0x55   : > { %p1506_p7 = scmp.ne.s32.totalorder (!%p1505_p10), %s1499_s18, 0 }
  0x56   : > { %200 = sbr.rel (%p1505_p10) target bundleno = 450 (0x1c2), region = 32 }
  0x5d   : > { %1273 = dma.done.wait (%p1506_p7), [#allocation5], 640  }
  0x5e   : > { %1275 = vsyncadd (%p1506_p7), [#allocation5], 4294966656 }
  0x5f   : > { %1277 = dma.done.wait (%p1506_p7), [#allocation8], 4736  }
  0x60   : > { %1279 = vsyncadd (%p1506_p7), [#allocation8], 4294962560  ;;  %p912_p9 = scmp.ne.s32.totalorder %s1286_s12, 0 }
  0x61   : > { %v1105_v0 = vld [vmem:[#allocation7 + $0x40] sm:$0xff] (!%p912_p9)   ;;  %v1303_v2 = vmov (!%p912_p9), 0.0   ;;  %v1109_v5 = vld [vmem:[#allocation7 + $0x48] sm:$0xff] (!%p912_p9)   ;;  %v1113_v9 = vld [vmem:[#allocation7 + $0x50] sm:$0xff] (!%p912_p9)   ;;  %vm1304_vm0 = vmmov (!%p912_p9), 0   ;;  %vm576_vm1 = vcmask (!%p912_p9), 523264  }
  0x62   : > { %246 = sbr.rel (%p912_p9) target bundleno = 412 (0x19c), region = 48  ;;  %v1106_v1 = vld [vmem:[#allocation7] sm:$0xff] (!%p912_p9)   ;;  %251 = vst [vmem:[#allocation3] sm:$0xff] (!%p912_p9), %v1303_v2  ;;  %967 = vmatprep.subr.bf16.mxu0 (!%p912_p9), %v1105_v0  ;;  %v1110_v6 = vld [vmem:[#allocation7 + $0x8] sm:$0xff] (!%p912_p9)   ;;  %v1114_v10 = vld [vmem:[#allocation7 + $0x10] sm:$0xff] (!%p912_p9)  }
  0x63   : > { %v1107_v3 = vld [vmem:[#allocation7 + $0xc0] sm:$0xff] (!%p912_p9)   ;;  %968 = vmatpush3.bf16.msra.mxu0 (!%p912_p9), %v1106_v1  ;;  %v1111_v7 = vld [vmem:[#allocation7 + $0xc8] sm:$0xff] (!%p912_p9)   ;;  %v1115_v11 = vld [vmem:[#allocation7 + $0xd0] sm:$0xff] (!%p912_p9)  }
  0x64   : > { %v1108_v4 = vld [vmem:[#allocation7 + $0x80] sm:$0xff] (!%p912_p9)   ;;  %989 = vmatprep.subr.bf16.mxu1 (!%p912_p9), %v1107_v3  ;;  %969 = vmatprep.subr.bf16.mxu0 (!%p912_p9), %v1109_v5  ;;  %v1112_v8 = vld [vmem:[#allocation7 + $0x88] sm:$0xff] (!%p912_p9)   ;;  %v1116_v12 = vld [vmem:[#allocation7 + $0x90] sm:$0xff] (!%p912_p9)  }
  0x65   : > { %990 = vmatpush3.bf16.msra.mxu1 (!%p912_p9), %v1108_v4  ;;  %v1117_v13 = vld [vmem:[#allocation7 + $0x58] sm:$0xff] (!%p912_p9)   ;;  %v1121_v17 = vld [vmem:[#allocation7 + $0x60] sm:$0xff] (!%p912_p9)   ;;  %v1125_v21 = vld [vmem:[#allocation7 + $0x68] sm:$0xff] (!%p912_p9)  }
  0x66   : > { %991 = vmatprep.subr.bf16.mxu1 (!%p912_p9), %v1111_v7  ;;  %v1118_v14 = vld [vmem:[#allocation7 + $0x18] sm:$0xff] (!%p912_p9)   ;;  %v1122_v18 = vld [vmem:[#allocation7 + $0x20] sm:$0xff] (!%p912_p9)   ;;  %v1126_v22 = vld [vmem:[#allocation7 + $0x28] sm:$0xff] (!%p912_p9)  }
  0x67   : > { %970 = vmatpush3.bf16.msra.mxu0 (!%p912_p9), %v1110_v6  ;;  %v1119_v15 = vld [vmem:[#allocation7 + $0xd8] sm:$0xff] (!%p912_p9)   ;;  %v1123_v19 = vld [vmem:[#allocation7 + $0xe0] sm:$0xff] (!%p912_p9)   ;;  %v1127_v23 = vld [vmem:[#allocation7 + $0xe8] sm:$0xff] (!%p912_p9)  }
  0x68   : > { %971 = vmatprep.subr.bf16.mxu0 (!%p912_p9), %v1113_v9  ;;  %v1120_v16 = vld [vmem:[#allocation7 + $0x98] sm:$0xff] (!%p912_p9)   ;;  %v1124_v20 = vld [vmem:[#allocation7 + $0xa0] sm:$0xff] (!%p912_p9)   ;;  %v1128_v24 = vld [vmem:[#allocation7 + $0xa8] sm:$0xff] (!%p912_p9)  }
  0x69   : > { %992 = vmatpush3.bf16.msra.mxu1 %v1112_v8  ;;  %v1129_v25 = vld [vmem:[#allocation7 + $0x70] sm:$0xff]   ;;  %v1133_v29 = vld [vmem:[#allocation7 + $0x78] sm:$0xff]   ;;  %v1143_v37 = vld [vmem:[#allocation7 + $0x100] sm:$0xff]  }
  0x6a   : > { %993 = vmatprep.subr.bf16.mxu1 %v1115_v11  ;;  %v1130_v26 = vld [vmem:[#allocation7 + $0x30] sm:$0xff]   ;;  %v1134_v30 = vld [vmem:[#allocation7 + $0x38] sm:$0xff]   ;;  %v1144_v38 = vld [vmem:[#allocation7 + $0x108] sm:$0xff]  }
  0x6b   : > { %972 = vmatpush3.bf16.msra.mxu0 %v1114_v10  ;;  %v1131_v27 = vld [vmem:[#allocation7 + $0xf0] sm:$0xff]   ;;  %v1135_v31 = vld [vmem:[#allocation7 + $0xf8] sm:$0xff]   ;;  %v913_v43 = vld [vmem:[#allocation9] ss:$0 sm:$0xff] }
  0x6c   : > { %973 = vmatprep.subr.bf16.mxu0 %v1117_v13  ;;  %v1132_v28 = vld [vmem:[#allocation7 + $0xb0] sm:$0xff]   ;;  %v1139_v34 = vld [vmem:[#allocation7 + $0xb8] sm:$0xff]  }
  0x6d   : > { %994 = vmatpush3.bf16.msra.mxu1 %v1116_v12  ;;  %v1136_v32 = vld [vmem:[#allocation4] ss:$20 sps:$4 sm:$0xff]   ;;  %v1138_v33 = vld [vmem:[#allocation4 + $0x4] ss:$20 sps:$4 sm:$0xff]   ;;  %v1140_v35 = vld [vmem:[#allocation4 + $0x8] ss:$20 sps:$4 sm:$0xff]  }
  0x6e   : > { %995 = vmatprep.subr.bf16.mxu1 %v1119_v15  ;;  %612 = vmatprep.mubr.bf16.mxu0 %v1138_v33  ;;  %v1142_v36 = vld [vmem:[#allocation4 + $0xc] ss:$20 sps:$4 sm:$0xff]   ;;  %v1147_v41 = vld [vmem:[#allocation4 + $0x10] ss:$20 sps:$4 sm:$0xff]  }
  0x6f   : > { %974 = vmatpush3.bf16.msra.mxu0 %v1118_v14  ;;  %653 = vmatprep.mubr.bf16.mxu1 %v1142_v36  ;;  %v1145_v39 = vld [vmem:[#allocation7 + $0x110] sm:$0xff]   ;;  %v1146_v40 = vld [vmem:[#allocation7 + $0x118] sm:$0xff]   ;;  %v707_v14 = vld [vmem:[#allocation3] sm:$0x1] }
  0x70   : > { %975 = vmatprep.subr.bf16.mxu0 %v1121_v17  ;;  %v717_v17 = vld [vmem:[#allocation3 + $0x1] sm:$0x1] }
  0x71   : > { %996 = vmatpush3.bf16.msra.mxu1 %v1120_v16 }
  0x72   : > { %997 = vmatprep.subr.bf16.mxu1 %v1123_v19 }
  0x73   : > { %976 = vmatpush3.bf16.msra.mxu0 %v1122_v18 }
  0x74   : > { %977 = vmatprep.subr.bf16.mxu0 %v1125_v21 }
  0x75   : > { %998 = vmatpush3.bf16.msra.mxu1 %v1124_v20 }
  0x76   : > { %999 = vmatprep.subr.bf16.mxu1 %v1127_v23 }
  0x77   : > { %978 = vmatpush3.bf16.msra.mxu0 %v1126_v22 }
  0x78   : > { %979 = vmatprep.subr.bf16.mxu0 %v1129_v25 }
  0x79   : > { %1000 = vmatpush3.bf16.msra.mxu1 %v1128_v24 }
  0x7a   : > { %1001 = vmatprep.subr.bf16.mxu1 %v1131_v27 }
  0x7b   : > { %980 = vmatpush3.bf16.msra.mxu0 %v1130_v26 }
  0x7c   : > { %981 = vmatprep.subr.bf16.mxu0 %v1133_v29 }
  0x7d   : > { %1002 = vmatpush3.bf16.msra.mxu1 %v1132_v28  ;;  %v738_v28 = vld [vmem:[#allocation9 + $0x1] sm:$0x1] }
  0x7e   : > { %1003 = vmatprep.subr.bf16.mxu1 %v1135_v31  ;;  %v743_v31 = vld [vmem:[#allocation9 + $0x2] sm:$0x1] }
  0x7f   : > { %982 = vmatpush3.bf16.msra.mxu0 %v1134_v30 }
  0x80   : > { %1016 = vmatprep.subr.bf16.mxu0 %v1303_v2 }
  0x81   : > { %1004 = vmatpush3.bf16.msra.mxu1 %v1139_v34 }
  0x82   : > { %613 = vmatmul.mubr.bf16.vlgmr.msra.gmra.mrb[0].mxu0 %v1136_v32 }
  0x83   : > { %1024 = vmatprep.mubr.msk.bf16.mxu0 %vm1304_vm0, %v1303_v2  ;;  %1017 = vmatpush3.bf16.msra.mxu0 %v1143_v37 }
  0x84   : > { %654 = vmatmul.mubr.bf16.vlgmr.msra.gmra.mrb[0].mxu1 %v1140_v35  ;;  %1018 = vmatprep.subr.bf16.mxu0 %v1303_v2 }
  0x87   : > { %1019 = vmatpush3.bf16.msra.mxu0 %v1144_v38 }
  0x88   : > { %1020 = vmatprep.subr.bf16.mxu0 %v1303_v2 }
  0x8b   : > { %1021 = vmatpush3.bf16.msra.mxu0 %v1145_v39 }
  0x8c   : > { %1022 = vmatprep.subr.bf16.mxu0 %v1303_v2 }
  0x8f   : > { %1023 = vmatpush3.bf16.msra.mxu0 %v1146_v40 }
  0x92   : > { %1025 = vmatmul.mubr.msk.bf16.vlgmr.msra.gmra.mrb[4].mxu0 %vm576_vm1, %v1147_v41 }
 0x155   : > { %v983_v42 = vpop.f32.mrb[0].mxu0 }
 0x156   : > { %v984_v44 = vpop.f32.mrb[1].mxu0 }
 0x157   : > { %v985_v45 = vadd.f32 %v984_v44, %v983_v42  ;;  %v986_v46 = vpop.f32.mrb[2].mxu0  ;;  %v1005_v47 = vpop.f32.mrb[0].mxu1 }
 0x158   : > { %v987_v48 = vpop.f32.mrb[3].mxu0  ;;  %v1006_v51 = vpop.f32.mrb[1].mxu1 }
 0x159   : > { %v615_v49 = vadd.f32 %v985_v45, %v913_v43  ;;  %v988_v50 = vadd.f32 %v987_v48, %v986_v46  ;;  %v1007_v52 = vadd.f32 %v1006_v51, %v1005_v47  ;;  %v1008_v53 = vpop.f32.mrb[2].mxu1 }
 0x15a   : > { %v1009_v55 = vpop.f32.mrb[3].mxu1 }
 0x15b   : > { %v618_v54 = vadd.f32 %v988_v50, %v913_v43  ;;  %v1010_v56 = vadd.f32 %v1009_v55, %v1008_v53  ;;  %v656_v57 = vadd.f32 %v1007_v52, %v615_v49 }
 0x15d   : > { %v659_v58 = vadd.f32 %v1010_v56, %v618_v54 }
 0x165   : > { %v696_v59 = vpop.f32.mrb[4].mxu0 }
 0x166   : > { %v697_v60 = vadd.f32 %v696_v59, %v656_v57  ;;  %v1026_v61 = vpop.f32.mrb[5].mxu0 }
 0x167   : > { %v699_v62 = vpop.f32.mrb[6].mxu0 }
 0x168   : > { %705 = vst [vmem:[#allocation2] sm:$0xff] %v697_v60  ;;  %v700_v63 = vadd.f32 %v699_v62, %v659_v58  ;;  %v1027_v0 = vpop.f32.mrb[7].mxu0  ;;  %v718_v1 = vmul.f32 %v697_v60, %v697_v60 }
 0x16a   : > { %706 = vst [vmem:[#allocation2 + $0x8] sm:$0xff] %v700_v63  ;;  %v708_v2 = vadd.f32 %v700_v63, %v697_v60  ;;  %v719_v3 = vmul.f32 %v700_v63, %v700_v63 }
 0x16c   : > { %v709_v4 = vrot.slane %v708_v2, 4  ;;  %v720_v5 = vadd.f32 %v719_v3, %v718_v1 }
 0x16e   : > { %v710_v6 = vadd.f32 %v709_v4, %v708_v2  ;;  %v721_v7 = vrot.slane %v720_v5, 4 }
 0x170   : > { %v711_v8 = vrot.slane %v710_v6, 2  ;;  %v722_v9 = vadd.f32 %v721_v7, %v720_v5 }
 0x172   : > { %v712_v10 = vadd.f32 %v711_v8, %v710_v6  ;;  %v723_v11 = vrot.slane %v722_v9, 2 }
 0x174   : > { %v713_v12 = vrot.slane %v712_v10, 1  ;;  %v724_v13 = vadd.f32 %v723_v11, %v722_v9 }
 0x176   : > { %v714_v15 = vadd.f32 %v713_v12, %v712_v10  ;;  %v725_v16 = vrot.slane %v724_v13, 1 }
 0x178   : > { %v715_v18 = vadd.f32 %v714_v15, %v707_v14  ;;  %v726_v19 = vadd.f32 %v725_v16, %v724_v13 }
 0x17a   : > { %716 = vst [vmem:[#allocation3] sm:$0x1] %v715_v18  ;;  %v727_v20 = vadd.f32 %v726_v19, %v717_v17 }
 0x17c   : > { %728 = vst [vmem:[#allocation3 + $0x1] sm:$0x1] %v727_v20 }
 0x181   : > { %v732_v21 = vld [vmem:[#allocation3] sm:$0x1] }
 0x182   : > { %v733_v22 = vmul.f32 0.0625, %v732_v21 }
 0x183   : > { %v734_v23 = vld [vmem:[#allocation3 + $0x1] sm:$0x1] }
 0x184   : > { %v735_v24 = vmul.f32 0.0625, %v734_v23  ;;  %v736_v25 = vmul.f32 %v733_v22, %v733_v22 }
 0x186   : > { %v737_v26 = vsub.f32 %v735_v24, %v736_v25 }
 0x188   : > { %v739_v27 = vadd.f32 1e-05, %v737_v26 }
 0x18a   : > { %1148 = vrsqrt.f32 %v739_v27 }
 0x194   : > { %v1149_v29 = vpop.eup %1148 }
 0x195   : > { %v741_v30 = vmul.f32 %v1149_v29, %v738_v28 }
 0x197   : > { %742 = vst [vmem:[#allocation3 + $0x2] sm:$0x1] %v741_v30  ;;  %v744_v32 = vmul.f32 %v741_v30, %v733_v22 }
 0x199   : > { %v745_v33 = vsub.f32 %v743_v31, %v744_v32 }
 0x19b   : > { %746 = vst [vmem:[#allocation3 + $0x3] sm:$0x1] %v745_v33 }
 0x19c PF: > { %p956_p6 = scmp.ne.s32.totalorder %s1286_s12, 1 }
 0x19d   : > { %v753_v34 = vld [vmem:[#allocation2] sm:$0xff] (!%p956_p6)  ;;  %v754_v38 = vld [vmem:[#allocation2 + $0x8] sm:$0xff] (!%p956_p6)  ;;  %vm779_vm2 = vcmask (!%p956_p6), 519168  }
 0x19e   : > { %750 = sbr.rel (%p956_p6) target bundleno = 426 (0x1aa), region = 60  ;;  %v957_v35 = vld [vmem:[#allocation3 + $0x2] ss:$0 sm:$0xff] (!%p956_p6) }
 0x19f   : > { %v760_v37 = vmul.f32 (!%p956_p6), %v957_v35, %v753_v34  ;;  %v761_v39 = vmul.f32 (!%p956_p6), %v957_v35, %v754_v38 }
 0x1a2   : > { %v958_v36 = vld [vmem:[#allocation3 + $0x3] ss:$0 sm:$0xff] (!%p956_p6) }
 0x1a3   : > { %v767_v40 = vadd.f32 (!%p956_p6), %v958_v36, %v760_v37  ;;  %v768_v41 = vadd.f32 (!%p956_p6), %v958_v36, %v761_v39 }
 0x1a5   : > { %v769_v42 = vmax.f32 %v767_v40, 0.0  ;;  %v770_v43 = vmax.f32 %v768_v41, 0.0 }
 0x1a7   : > { %v965_v44 = vpack.c.bf16 %v769_v42, %v769_v42  ;;  %v966_v45 = vpack.c.bf16 %v770_v43, %v770_v43 }
 0x1a9   : > { %780 = vst.msk [vmem:[#allocation10] sm:$0xf] %vm779_vm2, %v965_v44  ;;  %781 = vst.msk [vmem:[#allocation10 + $0x4] sm:$0xf] %vm779_vm2, %v966_v45 }
 0x1aa PF: > { %p1457_p8 = scmp.eq.s32.totalorder %s901_s15, 1  ;;  %s1305_s18 = smov [#allocation10]  }
 0x1ab   : > { %s797_s19 = sshll.u32 %s1305_s18, 4  ;;  %s798_s19 = int_to_ptr.vmem [resolvable:$true] %s797_s19 }
 0x1ac   : > { %s1234_s21 = scalar_lea.vmem %s798_s19, 128  ;;  %s1240_s28 = scalar_lea.vmem %s798_s19, 256 }
 0x1ad   : > { %p1235_p11 = scmp.ne.s32.totalorder %s798_s19, %s1234_s21  ;;  %p1241_p0 = scmp.lt.s32.totalorder %s798_s19, %s798_s19 }
 0x1ae   : > { %p1242_p1 = scmp.lt.s32.totalorder %s1240_s28, %s1234_s21 }
 0x1af   : > { %p1236_p12 = pnand %p1235_p11, %p1457_p8 }
 0x1b0   : > { %p1243_p2 = por %p1242_p1, %p1241_p0 }
 0x1b1   : > { %p1237_p13 = pneg %p1236_p12 }
 0x1b3   : > { %p1244_p5 = pnand %p1243_p2, %p1237_p13 }
 0x1b5   : > { %1247 = shalt.err (!%p1244_p5)
}
 0x1b6   : > { %s1248_s30 = scalar_lea.hbm %s1495_s3, 128 }
 0x1b7   : > { %p1249_p3 = scmp.ne.s32.totalorder %s1495_s3, %s1248_s30  ;;  %p1254_p7 = scmp.lt.u32.totalorder %s1248_s30, %s1495_s3 }
 0x1b9   : > { %p1250_p4 = pnand %p1249_p3, %p1457_p8 }
 0x1bb   : > { %p1251_p10 = pneg %p1250_p4 }
 0x1bd   : > { %p1256_p9 = pnand %p1254_p7, %p1251_p10 }
 0x1bf   : > { %1259 = shalt.err (!%p1256_p9)
}
 0x1c0   : > { %s1306_s22 = smov 64   ;;  %s1307_s8 = smov 4  }
 0x1c1   : > { %1041 = dma.vmem_to_hbm [thread:$0]  (%p1457_p8), %s798_s19, 128, %s1495_s3, [#allocation6], %s1306_s22, %s1306_s22, %s1307_s8  }
 0x1c2 PF: > { %p1068_p6 = scmp.eq.s32.totalorder %s902_s16, 1  ;;  %p1508_p11 = scmp.ge.s32.totalorder %s1294_s14, 2 }
 0x1c4   : > { %p1056_p12 = pnand %p1068_p6, %p1508_p11 }
 0x1c6   : > { %1281 = dma.done.wait (!%p1056_p12), [#allocation6], 128  }
 0x1c7   : > { %1283 = vsyncadd (!%p1056_p12), [#allocation6], 4294967168  ;;  %s20_s14 = sadd.s32 1, %s1294_s14   ;;  %s1509_s12 = smov %s1290_s13 }
 0x1c8   : > { %p17_p13 = scmp.ge.s32.totalorder %s20_s14, 4   ;;  %s1510_s13 = smov %s1512_s17 }
 0x1ca   :  { %19 = sbr.rel (!%p17_p13) target bundleno = 6 (0x6), region = 103 }
 0x1d1   :  { %818 = vsyncpa [#allocation5], 1 }
 0x1d2   :  { %820 = vsyncpa [#allocation5 + $0x1], 1 }
 0x1d3   :  { %821 = vsyncpa [#allocation8], 1 }
 0x1d4   :  { %822 = vsyncpa [#allocation6], 1 }
 0x1d5   :  { %824 = vsyncpa [#allocation6 + $0x1], 1 }

// kernel: dqn_forward.7
= control target key start
LH: loop header
LB: loop body
LE: loop exit
PB: predicated region body
PF: predicated region fallthrough
CT: control target
= control target key end

     0   :  { %10 = vsyncpa [#allocation3], 0  ;;  %s1482_s0 = inlined_call_operand.hbm [shape: bf16[8,256], index: 0, kind: input, shape index: {}]   ;;  %s1483_s1 = inlined_call_operand.hbm [shape: bf16[256,512], index: 1, kind: input, shape index: {}]   ;;  %s1484_s2 = inlined_call_operand.hbm [shape: f32[8,512], index: 2, kind: input, shape index: {}]   ;;  %s1485_s3 = inlined_call_operand.hbm [shape: bf16[512,128], index: 3, kind: input, shape index: {}]   ;;  %s1486_s4 = inlined_call_operand.hbm [shape: f32[8,128], index: 4, kind: input, shape index: {}]   ;;  %s1487_s5 = inlined_call_operand.hbm [shape: f32[8,128], index: 5, kind: output, shape index: {}]  }
   0x1   :  { %11 = vsyncpa [#allocation6], 0 }
   0x2   :  { %12 = vsyncpa [#allocation9], 0 }
   0x3   :  { %13 = vsyncpa [#allocation4], 0  ;;  %s1370_s18 = smov [#allocation5]   ;;  %s1230_s22 = scalar_lea.hbm %s1483_s1, 8192 }
   0x4   :  { %s29_s19 = sshll.u32 %s1370_s18, 4  ;;  %p1231_p0 = scmp.ne.s32.totalorder %s1483_s1, %s1230_s22  ;;  %s30_s19 = int_to_ptr.vmem [resolvable:$true] %s29_s19 }
   0x5   :  { %p1234_p1 = scmp.lt.u32.totalorder %s1230_s22, %s1483_s1 }
   0x7   :  { %p1236_p2 = pnand %p1234_p1, %p1231_p0 }
   0x9   :  { %1239 = shalt.err (!%p1236_p2)
}
   0xa   :  { %s1240_s27 = scalar_lea.vmem %s30_s19, 8192  ;;  %p1245_p4 = scmp.lt.s32.totalorder %s30_s19, %s30_s19 }
   0xb   :  { %p1241_p3 = scmp.ne.s32.totalorder %s30_s19, %s1240_s27  ;;  %p1246_p5 = scmp.lt.s32.totalorder %s1240_s27, %s1240_s27 }
   0xd   :  { %p1247_p6 = por %p1246_p5, %p1245_p4 }
   0xf   :  { %p1248_p7 = pnand %p1247_p6, %p1241_p3 }
  0x11   :  { %1251 = shalt.err (!%p1248_p7)
}
  0x12   :  { %s1371_s28 = smov 256   ;;  %s1372_s29 = smov 16  }
  0x13   :  { %35 = dma.hbm_to_vmem [thread:$0]  %s1483_s1, 8192, %s30_s19, [#allocation6], %s1371_s28, %s1371_s28, %s1372_s29  }
  0x14   :  { %s1373_s7 = smov [#allocation8]   ;;  %s1252_s11 = scalar_lea.hbm %s1485_s3, 4096 }
  0x15   :  { %s51_s8 = sshll.u32 %s1373_s7, 4  ;;  %p1253_p8 = scmp.ne.s32.totalorder %s1485_s3, %s1252_s11  ;;  %s52_s8 = int_to_ptr.vmem [resolvable:$true] %s51_s8 }
  0x16   :  { %p1256_p9 = scmp.lt.u32.totalorder %s1252_s11, %s1485_s3 }
  0x18   :  { %p1258_p10 = pnand %p1256_p9, %p1253_p8 }
  0x1a   :  { %1261 = shalt.err (!%p1258_p10)
}
  0x1b   :  { %s1262_s16 = scalar_lea.vmem %s52_s8, 4096  ;;  %p1267_p12 = scmp.lt.s32.totalorder %s52_s8, %s52_s8 }
  0x1c   :  { %p1263_p11 = scmp.ne.s32.totalorder %s52_s8, %s1262_s16  ;;  %p1268_p13 = scmp.lt.s32.totalorder %s1262_s16, %s1262_s16 }
  0x1e   :  { %p1269_p0 = por %p1268_p13, %p1267_p12 }
  0x20   :  { %p1270_p1 = pnand %p1269_p0, %p1263_p11 }
  0x22   :  { %1273 = shalt.err (!%p1270_p1)
}
  0x23   :  { %s1374_s1 = smov 64   ;;  %s1375_s17 = smov 4  }
  0x24   :  { %57 = dma.hbm_to_vmem [thread:$0]  %s1485_s3, 4096, %s52_s8, [#allocation9], %s1374_s1, %s1374_s1, %s1375_s17  }
  0x25   :  { %s1376_s20 = smov [#allocation2]   ;;  %s1377_s22 = smov [#allocation7]  }
  0x26   :  { %s20_s21 = sshll.u32 %s1376_s20, 4  ;;  %s42_s23 = sshll.u32 %s1377_s22, 4  ;;  %s21_s21 = int_to_ptr.vmem [resolvable:$true] %s20_s21  ;;  %s43_s23 = int_to_ptr.vmem [resolvable:$true] %s42_s23 }
  0x27   :  { %s1274_s26 = scalar_lea.hbm %s1482_s0, 128 }
  0x28   :  { %p1275_p2 = scmp.ne.s32.totalorder %s1482_s0, %s1274_s26  ;;  %p1278_p3 = scmp.lt.u32.totalorder %s1274_s26, %s1482_s0 }
  0x2a   :  { %p1280_p4 = pnand %p1278_p3, %p1275_p2 }
  0x2c   :  { %1283 = shalt.err (!%p1280_p4)
}
  0x2d   :  { %s1284_s3 = scalar_lea.vmem %s21_s21, 128  ;;  %p1289_p6 = scmp.lt.s32.totalorder %s21_s21, %s21_s21 }
  0x2e   :  { %p1285_p5 = scmp.ne.s32.totalorder %s21_s21, %s1284_s3  ;;  %p1290_p7 = scmp.lt.s32.totalorder %s1284_s3, %s1284_s3 }
  0x30   :  { %p1291_p8 = por %p1290_p7, %p1289_p6 }
  0x32   :  { %p1292_p9 = pnand %p1291_p8, %p1285_p5 }
  0x34   :  { %1295 = shalt.err (!%p1292_p9)
}
  0x35   :  { %23 = dma.hbm_to_vmem [thread:$0]  %s1482_s0, 128, %s21_s21, [#allocation3]  }
  0x36   :  { %s1296_s10 = scalar_lea.hbm %s1484_s2, 512 }
  0x37   :  { %p1297_p10 = scmp.ne.s32.totalorder %s1484_s2, %s1296_s10  ;;  %p1300_p11 = scmp.lt.u32.totalorder %s1296_s10, %s1484_s2 }
  0x39   :  { %p1302_p12 = pnand %p1300_p11, %p1297_p10 }
  0x3b   :  { %1305 = shalt.err (!%p1302_p12)
}
  0x3c   :  { %s1306_s15 = scalar_lea.vmem %s43_s23, 512  ;;  %p1311_p0 = scmp.lt.s32.totalorder %s43_s23, %s43_s23 }
  0x3d   :  { %p1307_p13 = scmp.ne.s32.totalorder %s43_s23, %s1306_s15  ;;  %p1312_p1 = scmp.lt.s32.totalorder %s1306_s15, %s1306_s15 }
  0x3f   :  { %p1313_p2 = por %p1312_p1, %p1311_p0 }
  0x41   :  { %p1314_p3 = pnand %p1313_p2, %p1307_p13 }
  0x43   :  { %1317 = shalt.err (!%p1314_p3)
}
  0x44   :  { %45 = dma.hbm_to_vmem [thread:$0]  %s1484_s2, 512, %s43_s23, [#allocation6]  }
  0x45   :  { %s1378_s1 = smov [#allocation10]   ;;  %s1318_s20 = scalar_lea.hbm %s1486_s4, 128 }
  0x46   :  { %s64_s17 = sshll.u32 %s1378_s1, 4  ;;  %p1319_p4 = scmp.ne.s32.totalorder %s1486_s4, %s1318_s20  ;;  %s65_s17 = int_to_ptr.vmem [resolvable:$true] %s64_s17 }
  0x47   :  { %p1322_p5 = scmp.lt.u32.totalorder %s1318_s20, %s1486_s4 }
  0x49   :  { %p1324_p6 = pnand %p1322_p5, %p1319_p4 }
  0x4b   :  { %1327 = shalt.err (!%p1324_p6)
}
  0x4c   :  { %s1328_s26 = scalar_lea.vmem %s65_s17, 128  ;;  %p1333_p8 = scmp.lt.s32.totalorder %s65_s17, %s65_s17 }
  0x4d   :  { %p1329_p7 = scmp.ne.s32.totalorder %s65_s17, %s1328_s26  ;;  %p1334_p9 = scmp.lt.s32.totalorder %s1328_s26, %s1328_s26 }
  0x4f   :  { %p1335_p10 = por %p1334_p9, %p1333_p8 }
  0x51   :  { %p1336_p11 = pnand %p1335_p10, %p1329_p7 }
  0x53   :  { %1339 = shalt.err (!%p1336_p11)
}
  0x54   :  { %67 = dma.hbm_to_vmem [thread:$0]  %s1486_s4, 128, %s65_s17, [#allocation9]  }
  0x55   :  { %1362 = dma.done.wait [#allocation3], 128  }
  0x56   :  { %1363 = vsyncadd [#allocation3], 4294967168 }
  0x57   :  { %1364 = dma.done.wait [#allocation6], 8704  }
  0x58   :  { %1365 = vsyncadd [#allocation6], 4294958592 }
  0x59   :  { %1366 = dma.done.wait [#allocation9], 4224  }
  0x5a   :  { %1367 = vsyncadd [#allocation9], 4294963072  ;;  %v1100_v0 = vld [vmem:[#allocation5 + $0x4] ss:$16 sps:$4 sm:$0xff]   ;;  %v1102_v1 = vld [vmem:[#allocation5 + $0xc] ss:$16 sps:$4 sm:$0xff]  }
  0x5b   :  { %498 = vmatprep.subr.bf16.mxu0 %v1100_v0  ;;  %v1104_v2 = vld [vmem:[#allocation5] ss:$16 sps:$4 sm:$0xff]   ;;  %v1105_v3 = vld [vmem:[#allocation5 + $0x8] ss:$16 sps:$4 sm:$0xff]   ;;  %539 = vmatprep.subr.bf16.mxu1 %v1102_v1  ;;  %v1106_v4 = vld [vmem:[#allocation5 + $0x24] ss:$16 sps:$4 sm:$0xff]  }
  0x5c   :  { %499 = vmatpush1.bf16.msra.mxu0 %v1104_v2  ;;  %540 = vmatpush1.bf16.msra.mxu1 %v1105_v3  ;;  %v1108_v5 = vld [vmem:[#allocation5 + $0x2c] ss:$16 sps:$4 sm:$0xff]   ;;  %v1110_v6 = vld [vmem:[#allocation5 + $0x20] ss:$16 sps:$4 sm:$0xff]   ;;  %v1111_v7 = vld [vmem:[#allocation5 + $0x28] ss:$16 sps:$4 sm:$0xff]  }
  0x5d   :  { %500 = vmatprep.subr.bf16.mxu0 %v1106_v4  ;;  %541 = vmatprep.subr.bf16.mxu1 %v1108_v5  ;;  %v1112_v8 = vld [vmem:[#allocation5 + $0x44] ss:$16 sps:$4 sm:$0xff]   ;;  %v1114_v9 = vld [vmem:[#allocation5 + $0x4c] ss:$16 sps:$4 sm:$0xff]   ;;  %v1116_v10 = vld [vmem:[#allocation5 + $0x40] ss:$16 sps:$4 sm:$0xff]  }
  0x5e   :  { %v1117_v11 = vld [vmem:[#allocation5 + $0x48] ss:$16 sps:$4 sm:$0xff]   ;;  %v1118_v12 = vld [vmem:[#allocation5 + $0x64] ss:$16 sps:$4 sm:$0xff]   ;;  %v1120_v13 = vld [vmem:[#allocation5 + $0x6c] ss:$16 sps:$4 sm:$0xff]  }
  0x5f   :  { %v1122_v14 = vld [vmem:[#allocation5 + $0x60] ss:$16 sps:$4 sm:$0xff]   ;;  %v1123_v15 = vld [vmem:[#allocation5 + $0x68] ss:$16 sps:$4 sm:$0xff]   ;;  %v1124_v16 = vld [vmem:[#allocation5 + $0x84] ss:$16 sps:$4 sm:$0xff]  }
  0x60   :  { %501 = vmatpush1.bf16.msra.mxu0 %v1110_v6  ;;  %542 = vmatpush1.bf16.msra.mxu1 %v1111_v7  ;;  %v1126_v17 = vld [vmem:[#allocation5 + $0x8c] ss:$16 sps:$4 sm:$0xff]   ;;  %v1128_v18 = vld [vmem:[#allocation5 + $0x80] ss:$16 sps:$4 sm:$0xff]   ;;  %v1129_v19 = vld [vmem:[#allocation5 + $0x88] ss:$16 sps:$4 sm:$0xff]  }
  0x61   :  { %502 = vmatprep.subr.bf16.mxu0 %v1112_v8  ;;  %543 = vmatprep.subr.bf16.mxu1 %v1114_v9  ;;  %v1130_v20 = vld [vmem:[#allocation5 + $0xa4] ss:$16 sps:$4 sm:$0xff]   ;;  %v1132_v21 = vld [vmem:[#allocation5 + $0xac] ss:$16 sps:$4 sm:$0xff]   ;;  %v1134_v22 = vld [vmem:[#allocation5 + $0xa0] ss:$16 sps:$4 sm:$0xff]  }
  0x62   :  { %v1135_v23 = vld [vmem:[#allocation5 + $0xa8] ss:$16 sps:$4 sm:$0xff]   ;;  %v1136_v24 = vld [vmem:[#allocation5 + $0xc4] ss:$16 sps:$4 sm:$0xff]   ;;  %v1138_v25 = vld [vmem:[#allocation5 + $0xcc] ss:$16 sps:$4 sm:$0xff]  }
  0x63   :  { %v1140_v26 = vld [vmem:[#allocation5 + $0xc0] ss:$16 sps:$4 sm:$0xff]   ;;  %v1141_v27 = vld [vmem:[#allocation5 + $0xc8] ss:$16 sps:$4 sm:$0xff]   ;;  %v1142_v28 = vld [vmem:[#allocation5 + $0xe4] ss:$16 sps:$4 sm:$0xff]  }
  0x64   :  { %503 = vmatpush1.bf16.msra.mxu0 %v1116_v10  ;;  %544 = vmatpush1.bf16.msra.mxu1 %v1117_v11  ;;  %v1144_v29 = vld [vmem:[#allocation5 + $0xec] ss:$16 sps:$4 sm:$0xff]   ;;  %v1146_v30 = vld [vmem:[#allocation5 + $0xe0] ss:$16 sps:$4 sm:$0xff]   ;;  %v1147_v31 = vld [vmem:[#allocation5 + $0xe8] ss:$16 sps:$4 sm:$0xff]  }
  0x65   :  { %504 = vmatprep.subr.bf16.mxu0 %v1118_v12  ;;  %545 = vmatprep.subr.bf16.mxu1 %v1120_v13  ;;  %v1148_v32 = vld [vmem:[#allocation5 + $0x104] ss:$16 sps:$4 sm:$0xff]   ;;  %v1150_v33 = vld [vmem:[#allocation5 + $0x10c] ss:$16 sps:$4 sm:$0xff]   ;;  %v1152_v34 = vld [vmem:[#allocation5 + $0x100] ss:$16 sps:$4 sm:$0xff]  }
  0x66   :  { %v1153_v35 = vld [vmem:[#allocation5 + $0x108] ss:$16 sps:$4 sm:$0xff]   ;;  %v1154_v36 = vld [vmem:[#allocation5 + $0x124] ss:$16 sps:$4 sm:$0xff]   ;;  %v1156_v37 = vld [vmem:[#allocation5 + $0x12c] ss:$16 sps:$4 sm:$0xff]  }
  0x67   :  { %v1158_v38 = vld [vmem:[#allocation5 + $0x120] ss:$16 sps:$4 sm:$0xff]   ;;  %v1159_v39 = vld [vmem:[#allocation5 + $0x128] ss:$16 sps:$4 sm:$0xff]   ;;  %v1160_v40 = vld [vmem:[#allocation5 + $0x144] ss:$16 sps:$4 sm:$0xff]  }
  0x68   :  { %505 = vmatpush1.bf16.msra.mxu0 %v1122_v14  ;;  %546 = vmatpush1.bf16.msra.mxu1 %v1123_v15  ;;  %v1162_v41 = vld [vmem:[#allocation5 + $0x14c] ss:$16 sps:$4 sm:$0xff]   ;;  %v1164_v42 = vld [vmem:[#allocation5 + $0x140] ss:$16 sps:$4 sm:$0xff]   ;;  %v1165_v43 = vld [vmem:[#allocation5 + $0x148] ss:$16 sps:$4 sm:$0xff]  }
  0x69   :  { %506 = vmatprep.subr.bf16.mxu0 %v1124_v16  ;;  %547 = vmatprep.subr.bf16.mxu1 %v1126_v17  ;;  %v1166_v44 = vld [vmem:[#allocation5 + $0x164] ss:$16 sps:$4 sm:$0xff]   ;;  %v1168_v45 = vld [vmem:[#allocation5 + $0x16c] ss:$16 sps:$4 sm:$0xff]   ;;  %v1170_v46 = vld [vmem:[#allocation5 + $0x160] ss:$16 sps:$4 sm:$0xff]  }
  0x6a   :  { %v84_v47 = vld [vmem:[#allocation2] sm:$0xff]  ;;  %v1172_v50 = vld [vmem:[#allocation5 + $0x184] ss:$16 sps:$4 sm:$0xff]   ;;  %v1176_v52 = vld [vmem:[#allocation5 + $0x180] ss:$16 sps:$4 sm:$0xff]   ;;  %s1379_s4 = smov [#allocation11]  }
  0x6b   :  { %v1171_v48 = vld [vmem:[#allocation5 + $0x168] ss:$16 sps:$4 sm:$0xff]   ;;  %v948_v49 = vcombine.high %v84_v47, %v84_v47  ;;  %v1174_v51 = vld [vmem:[#allocation5 + $0x18c] ss:$16 sps:$4 sm:$0xff]   ;;  %v1178_v54 = vld [vmem:[#allocation5 + $0x1a4] ss:$16 sps:$4 sm:$0xff]   ;;  %v947_v5 = vcombine.low %v84_v47, %v84_v47 }
  0x6c   :  { %507 = vmatpush1.bf16.msra.mxu0 %v1128_v18  ;;  %548 = vmatpush1.bf16.msra.mxu1 %v1129_v19  ;;  %v1177_v53 = vld [vmem:[#allocation5 + $0x188] ss:$16 sps:$4 sm:$0xff]   ;;  %v1180_v55 = vld [vmem:[#allocation5 + $0x1ac] ss:$16 sps:$4 sm:$0xff]   ;;  %v1182_v56 = vld [vmem:[#allocation5 + $0x1a0] ss:$16 sps:$4 sm:$0xff]  }
  0x6d   :  { %508 = vmatprep.subr.bf16.mxu0 %v1130_v20  ;;  %549 = vmatprep.subr.bf16.mxu1 %v1132_v21  ;;  %v1183_v57 = vld [vmem:[#allocation5 + $0x1a8] ss:$16 sps:$4 sm:$0xff]   ;;  %v1184_v58 = vld [vmem:[#allocation5 + $0x1c4] ss:$16 sps:$4 sm:$0xff]   ;;  %v1186_v59 = vld [vmem:[#allocation5 + $0x1cc] ss:$16 sps:$4 sm:$0xff]  }
  0x6e   :  { %530 = vmatprep.mubr.bf16.mxu0 %v948_v49  ;;  %571 = vmatprep.mubr.bf16.mxu1 %v948_v49  ;;  %v1188_v60 = vld [vmem:[#allocation5 + $0x1c0] ss:$16 sps:$4 sm:$0xff]   ;;  %v1189_v61 = vld [vmem:[#allocation5 + $0x1c8] ss:$16 sps:$4 sm:$0xff]   ;;  %v1190_v62 = vld [vmem:[#allocation5 + $0x1e4] ss:$16 sps:$4 sm:$0xff]  }
  0x6f   :  { %v1192_v63 = vld [vmem:[#allocation5 + $0x1ec] ss:$16 sps:$4 sm:$0xff]   ;;  %v1194_v0 = vld [vmem:[#allocation5 + $0x1e0] ss:$16 sps:$4 sm:$0xff]   ;;  %v1195_v1 = vld [vmem:[#allocation5 + $0x1e8] ss:$16 sps:$4 sm:$0xff]  }
  0x70   :  { %509 = vmatpush1.bf16.msra.mxu0 %v1134_v22  ;;  %550 = vmatpush1.bf16.msra.mxu1 %v1135_v23  ;;  %v1198_v2 = vld [vmem:[#allocation8 + $0x40] sm:$0xff]   ;;  %v1202_v7 = vld [vmem:[#allocation8 + $0x48] sm:$0xff]   ;;  %v1206_v11 = vld [vmem:[#allocation8 + $0x50] sm:$0xff]   ;;  %s936_s27 = sshll.u32 %s1379_s4, 4  ;;  %s937_s27 = int_to_ptr.vmem [resolvable:$true] %s936_s27 }
  0x71   :  { %510 = vmatprep.subr.bf16.mxu0 %v1136_v24  ;;  %551 = vmatprep.subr.bf16.mxu1 %v1138_v25  ;;  %v1199_v3 = vld [vmem:[#allocation8 + $0xc0] sm:$0xff]   ;;  %v1203_v8 = vld [vmem:[#allocation8 + $0xc8] sm:$0xff]   ;;  %v1207_v12 = vld [vmem:[#allocation8 + $0xd0] sm:$0xff]   ;;  %s1340_s28 = scalar_lea.vmem %s937_s27, 128  ;;  %p1345_p13 = scmp.lt.s32.totalorder %s937_s27, %s937_s27 }
  0x72   :  { %v1200_v4 = vld [vmem:[#allocation8] sm:$0xff]   ;;  %v1204_v9 = vld [vmem:[#allocation8 + $0x8] sm:$0xff]   ;;  %v1208_v13 = vld [vmem:[#allocation8 + $0x10] sm:$0xff]   ;;  %p1341_p12 = scmp.ne.s32.totalorder %s937_s27, %s1340_s28  ;;  %p1346_p0 = scmp.lt.s32.totalorder %s1340_s28, %s1340_s28 }
  0x73   :  { %v1201_v6 = vld [vmem:[#allocation8 + $0x80] sm:$0xff]   ;;  %v1205_v10 = vld [vmem:[#allocation8 + $0x88] sm:$0xff]   ;;  %v1209_v14 = vld [vmem:[#allocation8 + $0x90] sm:$0xff]  }
  0x74   :  { %511 = vmatpush1.bf16.msra.mxu0 %v1140_v26  ;;  %552 = vmatpush1.bf16.msra.mxu1 %v1141_v27  ;;  %v1210_v15 = vld [vmem:[#allocation8 + $0x58] sm:$0xff]   ;;  %v1214_v19 = vld [vmem:[#allocation8 + $0x60] sm:$0xff]   ;;  %v1218_v23 = vld [vmem:[#allocation8 + $0x68] sm:$0xff]   ;;  %p1347_p1 = por %p1346_p0, %p1345_p13 }
  0x75   :  { %512 = vmatprep.subr.bf16.mxu0 %v1142_v28  ;;  %553 = vmatprep.subr.bf16.mxu1 %v1144_v29  ;;  %v1211_v16 = vld [vmem:[#allocation8 + $0xd8] sm:$0xff]   ;;  %v1215_v20 = vld [vmem:[#allocation8 + $0xe0] sm:$0xff]   ;;  %v1219_v24 = vld [vmem:[#allocation8 + $0xe8] sm:$0xff]  }
  0x76   :  { %v1212_v17 = vld [vmem:[#allocation8 + $0x18] sm:$0xff]   ;;  %v1216_v21 = vld [vmem:[#allocation8 + $0x20] sm:$0xff]   ;;  %v1220_v25 = vld [vmem:[#allocation8 + $0x28] sm:$0xff]   ;;  %p1348_p2 = pnand %p1347_p1, %p1341_p12 }
  0x77   :  { %v1213_v18 = vld [vmem:[#allocation8 + $0x98] sm:$0xff]   ;;  %v1217_v22 = vld [vmem:[#allocation8 + $0xa0] sm:$0xff]   ;;  %v1221_v26 = vld [vmem:[#allocation8 + $0xa8] sm:$0xff]  }
  0x78   :  { %513 = vmatpush1.bf16.msra.mxu0 %v1146_v30  ;;  %554 = vmatpush1.bf16.msra.mxu1 %v1147_v31  ;;  %v1222_v27 = vld [vmem:[#allocation8 + $0x70] sm:$0xff]   ;;  %v1226_v31 = vld [vmem:[#allocation8 + $0x78] sm:$0xff]  }
  0x79   :  { %514 = vmatprep.subr.bf16.mxu0 %v1148_v32  ;;  %555 = vmatprep.subr.bf16.mxu1 %v1150_v33  ;;  %v1223_v28 = vld [vmem:[#allocation8 + $0xf0] sm:$0xff]   ;;  %v1227_v32 = vld [vmem:[#allocation8 + $0xf8] sm:$0xff]  }
  0x7a   :  { %v1224_v29 = vld [vmem:[#allocation8 + $0x30] sm:$0xff]   ;;  %v1228_v33 = vld [vmem:[#allocation8 + $0x38] sm:$0xff]  }
  0x7b   :  { %v1225_v30 = vld [vmem:[#allocation8 + $0xb0] sm:$0xff]  }
  0x7c   :  { %515 = vmatpush1.bf16.msra.mxu0 %v1152_v34  ;;  %556 = vmatpush1.bf16.msra.mxu1 %v1153_v35  ;;  %v1229_v34 = vld [vmem:[#allocation8 + $0xb8] sm:$0xff]   ;;  %v151_v35 = vlaneseq }
  0x7d   :  { %516 = vmatprep.subr.bf16.mxu0 %v1154_v36  ;;  %557 = vmatprep.subr.bf16.mxu1 %v1156_v37 }
  0x7e   :  { %v152_v36 = vshrl.u32 %v151_v35, 7 }
  0x80   :  { %517 = vmatpush1.bf16.msra.mxu0 %v1158_v38  ;;  %558 = vmatpush1.bf16.msra.mxu1 %v1159_v39  ;;  %v153_v37 = vsub.s32 0, %v152_v36  ;;  %v161_v38 = vsub.s32 2, %v152_v36  ;;  %v149_v39 = vld [vmem:[#allocation7] ss:$8 sm:$0xf] }
  0x81   :  { %518 = vmatprep.subr.bf16.mxu0 %v1160_v40  ;;  %559 = vmatprep.subr.bf16.mxu1 %v1162_v41  ;;  %v157_v40 = vsub.s32 1, %v152_v36  ;;  %v165_v41 = vsub.s32 3, %v152_v36 }
  0x84   :  { %519 = vmatpush1.bf16.msra.mxu0 %v1164_v42  ;;  %560 = vmatpush1.bf16.msra.mxu1 %v1165_v43  ;;  %v154_v42 = vrot.slane %v149_v39, %v153_v37  ;;  %v162_v43 = vrot.slane %v149_v39, %v161_v38 }
  0x85   :  { %520 = vmatprep.subr.bf16.mxu0 %v1166_v44  ;;  %561 = vmatprep.subr.bf16.mxu1 %v1168_v45  ;;  %v158_v44 = vrot.slane %v149_v39, %v157_v40  ;;  %v166_v45 = vrot.slane %v149_v39, %v165_v41 }
  0x88   :  { %521 = vmatpush1.bf16.msra.mxu0 %v1170_v46  ;;  %562 = vmatpush1.bf16.msra.mxu1 %v1171_v48 }
  0x89   :  { %522 = vmatprep.subr.bf16.mxu0 %v1172_v50  ;;  %563 = vmatprep.subr.bf16.mxu1 %v1174_v51 }
  0x8c   :  { %523 = vmatpush1.bf16.msra.mxu0 %v1176_v52  ;;  %564 = vmatpush1.bf16.msra.mxu1 %v1177_v53 }
  0x8d   :  { %524 = vmatprep.subr.bf16.mxu0 %v1178_v54  ;;  %565 = vmatprep.subr.bf16.mxu1 %v1180_v55 }
  0x90   :  { %525 = vmatpush1.bf16.msra.mxu0 %v1182_v56  ;;  %566 = vmatpush1.bf16.msra.mxu1 %v1183_v57 }
  0x91   :  { %526 = vmatprep.subr.bf16.mxu0 %v1184_v58  ;;  %567 = vmatprep.subr.bf16.mxu1 %v1186_v59 }
  0x94   :  { %527 = vmatpush1.bf16.msra.mxu0 %v1188_v60  ;;  %568 = vmatpush1.bf16.msra.mxu1 %v1189_v61 }
  0x95   :  { %528 = vmatprep.subr.bf16.mxu0 %v1190_v62  ;;  %569 = vmatprep.subr.bf16.mxu1 %v1192_v63 }
  0x98   :  { %529 = vmatpush1.bf16.msra.mxu0 %v1194_v0  ;;  %570 = vmatpush1.bf16.msra.mxu1 %v1195_v1 }
  0x99   :  { %1046 = vmatprep.subr.bf16.mxu0 %v1198_v2  ;;  %1068 = vmatprep.subr.bf16.mxu1 %v1199_v3 }
  0x9b   :  { %531 = vmatmul.mubr.bf16.vlgmr.msra.gmra.mrb[0].mxu0 %v947_v5  ;;  %572 = vmatmul.mubr.bf16.vlgmr.msra.gmra.mrb[0].mxu1 %v947_v5 }
  0x9c   :  { %1047 = vmatpush3.bf16.msra.mxu0 %v1200_v4  ;;  %1069 = vmatpush3.bf16.msra.mxu1 %v1201_v6  ;;  %v1013_v4 = vld [vmem:[#allocation10] ss:$0 sm:$0xff] }
  0x9d   :  { %1048 = vmatprep.subr.bf16.mxu0 %v1202_v7  ;;  %1070 = vmatprep.subr.bf16.mxu1 %v1203_v8 }
  0xa0   :  { %1049 = vmatpush3.bf16.msra.mxu0 %v1204_v9  ;;  %1071 = vmatpush3.bf16.msra.mxu1 %v1205_v10 }
  0xa1   :  { %1050 = vmatprep.subr.bf16.mxu0 %v1206_v11  ;;  %1072 = vmatprep.subr.bf16.mxu1 %v1207_v12 }
  0xa4   :  { %1051 = vmatpush3.bf16.msra.mxu0 %v1208_v13  ;;  %1073 = vmatpush3.bf16.msra.mxu1 %v1209_v14 }
  0xa5   :  { %1052 = vmatprep.subr.bf16.mxu0 %v1210_v15  ;;  %1074 = vmatprep.subr.bf16.mxu1 %v1211_v16 }
  0xa8   :  { %1053 = vmatpush3.bf16.msra.mxu0 %v1212_v17  ;;  %1075 = vmatpush3.bf16.msra.mxu1 %v1213_v18 }
  0xa9   :  { %1054 = vmatprep.subr.bf16.mxu0 %v1214_v19  ;;  %1076 = vmatprep.subr.bf16.mxu1 %v1215_v20 }
  0xac   :  { %1055 = vmatpush3.bf16.msra.mxu0 %v1216_v21  ;;  %1077 = vmatpush3.bf16.msra.mxu1 %v1217_v22 }
  0xad   :  { %1056 = vmatprep.subr.bf16.mxu0 %v1218_v23  ;;  %1078 = vmatprep.subr.bf16.mxu1 %v1219_v24 }
  0xb0   :  { %1057 = vmatpush3.bf16.msra.mxu0 %v1220_v25  ;;  %1079 = vmatpush3.bf16.msra.mxu1 %v1221_v26 }
  0xb1   :  { %1058 = vmatprep.subr.bf16.mxu0 %v1222_v27  ;;  %1080 = vmatprep.subr.bf16.mxu1 %v1223_v28 }
  0xb4   :  { %1059 = vmatpush3.bf16.msra.mxu0 %v1224_v29  ;;  %1081 = vmatpush3.bf16.msra.mxu1 %v1225_v30 }
  0xb5   :  { %1060 = vmatprep.subr.bf16.mxu0 %v1226_v31  ;;  %1082 = vmatprep.subr.bf16.mxu1 %v1227_v32 }
  0xb8   :  { %1061 = vmatpush3.bf16.msra.mxu0 %v1228_v33  ;;  %1083 = vmatpush3.bf16.msra.mxu1 %v1229_v34 }
 0x16e   :  { %v532_v46 = vpop.f32.mrb[0].mxu0  ;;  %v573_v47 = vpop.f32.mrb[0].mxu1 }
 0x16f   :  { %v533_v48 = vadd.f32 %v532_v46, %v154_v42  ;;  %v574_v49 = vadd.f32 %v573_v47, %v162_v43  ;;  %v534_v50 = vpop.f32.mrb[1].mxu0  ;;  %v575_v51 = vpop.f32.mrb[1].mxu1 }
 0x170   :  { %v535_v52 = vadd.f32 %v534_v50, %v158_v44  ;;  %v576_v53 = vadd.f32 %v575_v51, %v166_v45  ;;  %v536_v54 = vpop.f32.mrb[2].mxu0  ;;  %v577_v55 = vpop.f32.mrb[2].mxu1 }
 0x171   :  { %v580_v56 = vmax.f32 %v533_v48, 0.0  ;;  %v582_v57 = vmax.f32 %v574_v49, 0.0  ;;  %v537_v58 = vpop.f32.mrb[3].mxu0  ;;  %v578_v59 = vpop.f32.mrb[3].mxu1 }
 0x172   :  { %v581_v60 = vmax.f32 %v535_v52, 0.0  ;;  %v583_v61 = vmax.f32 %v576_v53, 0.0 }
 0x173   :  { %v586_v62 = vpack.c.bf16 %v582_v57, %v582_v57  ;;  %v584_v1 = vpack.c.bf16 %v580_v56, %v580_v56 }
 0x174   :  { %v585_v63 = vpack.c.bf16 %v581_v60, %v581_v60  ;;  %v587_v0 = vpack.c.bf16 %v583_v61, %v583_v61 }
 0x176   :  { %881 = vmatprep.mubr.bf16.mxu0 %v585_v63  ;;  %921 = vmatprep.mubr.bf16.mxu1 %v587_v0 }
 0x177   :  { %882 = vmatmul.mubr.bf16.vlgmr.msra.gmra.mrb[4].mxu0 %v584_v1  ;;  %922 = vmatmul.mubr.bf16.vlgmr.msra.gmra.mrb[4].mxu1 %v586_v62 }
 0x24a   :  { %v1062_v2 = vpop.f32.mrb[4].mxu0  ;;  %v1084_v3 = vpop.f32.mrb[4].mxu1 }
 0x24b   :  { %v1063_v5 = vpop.f32.mrb[5].mxu0  ;;  %v1085_v6 = vpop.f32.mrb[5].mxu1 }
 0x24c   :  { %v1064_v7 = vadd.f32 %v1063_v5, %v1062_v2  ;;  %v1086_v8 = vadd.f32 %v1085_v6, %v1084_v3  ;;  %v1065_v9 = vpop.f32.mrb[6].mxu0  ;;  %v1087_v10 = vpop.f32.mrb[6].mxu1 }
 0x24d   :  { %v1066_v11 = vpop.f32.mrb[7].mxu0  ;;  %v1088_v12 = vpop.f32.mrb[7].mxu1 }
 0x24e   :  { %v884_v13 = vadd.f32 %v1064_v7, %v1013_v4 }
 0x250   :  { %v924_v14 = vadd.f32 %v1086_v8, %v884_v13 }
 0x252   :  { %929 = vst [vmem:[#allocation11] sm:$0xff] %v924_v14 }
 0x253   :  { %1351 = shalt.err (!%p1348_p2)
}
 0x254   :  { %s1352_s3 = scalar_lea.hbm %s1487_s5, 128 }
 0x255   :  { %p1353_p3 = scmp.ne.s32.totalorder %s1487_s5, %s1352_s3  ;;  %p1356_p4 = scmp.lt.u32.totalorder %s1352_s3, %s1487_s5 }
 0x257   :  { %p1358_p5 = pnand %p1356_p4, %p1353_p3 }
 0x259   :  { %1361 = shalt.err (!%p1358_p5)
}
 0x25a   :  { %939 = dma.vmem_to_hbm [thread:$0]  %s937_s27, 128, %s1487_s5, [#allocation4]  }
 0x25b   :  { %1368 = dma.done.wait [#allocation4], 128  }
 0x25c   :  { %1369 = vsyncadd [#allocation4], 4294967168 }
 0x25d   :  { %943 = vsyncpa [#allocation3], 1 }
 0x25e   :  { %944 = vsyncpa [#allocation6], 1 }
 0x25f   :  { %945 = vsyncpa [#allocation9], 1 }
 0x260   :  { %946 = vsyncpa [#allocation4], 1 }

</bundles_post_ra>
